<compile_context>
chip_gen: v5e
topology: v5e:2x2
jax: 0.10.0
libtpu: 0.0.40
codegen_flags: <defaults>
</compile_context>

<pallas_src>
import jax
import jax.numpy as jnp
from jax import lax
from jax.experimental import pallas as pl
from jax.experimental.pallas import tpu as pltpu

# ---------------- config (small synthetic shapes) ----------------
IMG_IN = 16                      # input resolution (x in [0, 1])
IMG_RES = 8                      # self.img_resolution of the tiny ViT
PATCH = 4
N_PATCH = (IMG_RES // PATCH) ** 2   # 4 patches
N_TOK = N_PATCH + 1                 # +1 cls token
EMBED = 32                          # self.embed_dim
HEADS = 4
HEAD_DIM = EMBED // HEADS
MLP_HIDDEN = 4 * EMBED
DEPTH = 4
HOOKS = [0, 1, 2, 3]                # analogue of hooks=[2,5,8,11] on a 12-block ViT
HOOK_PATCH = True
N_HOOKS = len(HOOKS) + int(HOOK_PATCH)
LN_EPS = 1e-6
PATCH_FLAT = 3 * PATCH * PATCH      # 48

IMAGENET_MEAN = (0.485, 0.456, 0.406)
IMAGENET_STD = (0.229, 0.224, 0.225)


# ---------------- fused forward kernel (one grid step = one batch element) ----------------
def _dino_kernel(patches_ref, pw_ref, pb_ref, cls_ref, pos_ref,
                 ln1g_ref, ln1b_ref, qkvw_ref, qkvb_ref, projw_ref, projb_ref,
                 ln2g_ref, ln2b_ref, fc1w_ref, fc1b_ref, fc2w_ref, fc2b_ref,
                 hooks_ref):
    scale = float(HEAD_DIM) ** -0.5

    def ln(x, g, b):
        mu = jnp.mean(x, axis=-1, keepdims=True)
        xc = x - mu
        var = jnp.mean(xc * xc, axis=-1, keepdims=True)
        return xc * lax.rsqrt(var + LN_EPS) * g + b

    def gelu(x):
        # tanh-approximate GELU: transcendental goes to the EUP slot
        return 0.5 * x * (1.0 + jnp.tanh(0.7978845608028654 * (x + 0.044715 * x * x * x)))

    def write_hook(idx, t):
        # AddReadout(start_index=1): patch tokens + cls token
        hooks_ref[idx, 0] = t[1:, :] + t[0:1, :]

    # patch embed (ImageNet normalization already folded into pw/pb)
    tok = jnp.dot(patches_ref[0], pw_ref[...],
                  preferred_element_type=jnp.float32) + pb_ref[...]       # (N_PATCH, D)
    t = jnp.concatenate([cls_ref[...], tok], axis=0) + pos_ref[...]       # (N_TOK, D)

    idx = 0
    if HOOK_PATCH:
        write_hook(idx, t)
        idx += 1

    for d in range(DEPTH):
        # ---------------- MHSA ----------------
        h = ln(t, ln1g_ref[d], ln1b_ref[d])
        qkv = jnp.dot(h, qkvw_ref[d],
                      preferred_element_type=jnp.float32) + qkvb_ref[d]   # (N_TOK, 3D)

        heads = []
        for hh in range(HEADS):
            lo = hh * HEAD_DIM
            q_h = qkv[:, lo:lo + HEAD_DIM]
            k_h = qkv[:, EMBED + lo:EMBED + lo + HEAD_DIM]
            v_h = qkv[:, 2 * EMBED + lo:2 * EMBED + lo + HEAD_DIM]
            # q @ k.T without materializing a transpose (contract last dims)
            s = lax.dot_general(q_h, k_h, (((1,), (1,)), ((), ())),
                                preferred_element_type=jnp.float32) * scale   # (N, N)
            m = jnp.max(s, axis=-1, keepdims=True)
            e = jnp.exp(s - m)
            p = e * pl.reciprocal(jnp.sum(e, axis=-1, keepdims=True), approx=True)
            heads.append(jnp.dot(p, v_h, preferred_element_type=jnp.float32))  # (N, Dh)
        a = jnp.concatenate(heads, axis=1)                                 # (N_TOK, D)

        t = t + jnp.dot(a, projw_ref[d],
                        preferred_element_type=jnp.float32) + projb_ref[d]

        # ---------------- MLP ----------------
        h2 = ln(t, ln2g_ref[d], ln2b_ref[d])
        m1 = gelu(jnp.dot(h2, fc1w_ref[d],
                          preferred_element_type=jnp.float32) + fc1b_ref[d])
        t = t + jnp.dot(m1, fc2w_ref[d],
                        preferred_element_type=jnp.float32) + fc2b_ref[d]

        if d in HOOKS:
            write_hook(idx, t)
            idx += 1


# ---------------- wrapper ----------------
def dino_forward(x, params):
    """input: x in [0, 1], NCHW; output: dict of hook activations (B, EMBED, N_PATCH)."""
    B = x.shape[0]
    g = IMG_RES // PATCH
    factor = IMG_IN // IMG_RES

    # F.interpolate(mode='area') with integer factor == exact average pool: reshape+mean
    x_res = x.reshape(B, 3, IMG_RES, factor, IMG_RES, factor).mean(axis=(3, 5))
    # conv(kernel=PATCH, stride=PATCH) == unfold (c, ph, pw) + matmul (matmul runs in-kernel)
    patches = x_res.reshape(B, 3, g, PATCH, g, PATCH).transpose(0, 2, 4, 1, 3, 5)
    patches = patches.reshape(B, g * g, PATCH_FLAT)

    # fold ImageNet Normalize into the patch-embed affine: (x-m)/s then linear is affine
    mean = jnp.asarray(IMAGENET_MEAN, jnp.float32)
    std = jnp.asarray(IMAGENET_STD, jnp.float32)
    mean_vec = jnp.repeat(mean, PATCH * PATCH)          # (48,), channel-major flatten order
    inv_std_vec = jnp.repeat(1.0 / std, PATCH * PATCH)  # (48,)
    pw = params["patch_w"] * inv_std_vec[:, None]
    pb = params["patch_b"] - (mean_vec * inv_std_vec) @ params["patch_w"]

    in_arrays = [
        patches,
        pw,
        pb.reshape(1, EMBED),
        params["cls_token"].reshape(1, EMBED),
        params["pos_embed"].reshape(N_TOK, EMBED),
        params["ln1_g"], params["ln1_b"],
        params["qkv_w"], params["qkv_b"],
        params["proj_w"], params["proj_b"],
        params["ln2_g"], params["ln2_b"],
        params["fc1_w"], params["fc1_b"],
        params["fc2_w"], params["fc2_b"],
    ]

    def const_spec(shape):
        zeros = (0,) * len(shape)
        return pl.BlockSpec(shape, lambda b, z=zeros: z)   # same block every step -> stays in VMEM

    in_specs = [pl.BlockSpec((1, N_PATCH, PATCH_FLAT), lambda b: (b, 0, 0))]
    in_specs += [const_spec(a.shape) for a in in_arrays[1:]]

    # NOTE: at real ViT-S sizes (D=384, N=197) cast matmul operands to bf16 and set
    # vmem_limit_bytes explicitly (v7x has 64 MiB VMEM vs 128 MiB on v5e/v6e).
    hooks = pl.pallas_call(
        _dino_kernel,
        grid=(B,),
        in_specs=in_specs,
        out_specs=pl.BlockSpec((N_HOOKS, 1, N_PATCH, EMBED), lambda b: (0, b, 0, 0)),
        out_shape=jax.ShapeDtypeStruct((N_HOOKS, B, N_PATCH, EMBED), jnp.float32),
        compiler_params=pltpu.CompilerParams(dimension_semantics=("parallel",)),
    )(*in_arrays)

    # forward_vit final layout: Transpose(1, 2) -> (B, EMBED, N_PATCH); single stacked op
    hooks_t = jnp.transpose(hooks, (0, 1, 3, 2))
    return {str(i): hooks_t[i] for i in range(N_HOOKS)}


# ---------------- deterministic parameter init (synthetic, no checkpoint) ----------------
# TODO(synk): the original module loads pretrained timm 'vit_small_patch16_224_dino'
# weights; a deterministic synthetic init with the same forward structure is used here.
def init_params(key):
    keys = iter(jax.random.split(key, 32))

    def nrm(shape, scale=0.02):
        return scale * jax.random.normal(next(keys), shape, jnp.float32)

    return {
        "patch_w": nrm((PATCH_FLAT, EMBED)),
        "patch_b": jnp.zeros((EMBED,), jnp.float32),
        "cls_token": nrm((1, 1, EMBED)),
        "pos_embed": nrm((1, N_TOK, EMBED)),
        # per-block weights stacked along a leading DEPTH axis (indexed with ref[d] in-kernel)
        "ln1_g": jnp.ones((DEPTH, 1, EMBED), jnp.float32),
        "ln1_b": jnp.zeros((DEPTH, 1, EMBED), jnp.float32),
        "qkv_w": nrm((DEPTH, EMBED, 3 * EMBED)),
        "qkv_b": jnp.zeros((DEPTH, 1, 3 * EMBED), jnp.float32),
        "proj_w": nrm((DEPTH, EMBED, EMBED)),
        "proj_b": jnp.zeros((DEPTH, 1, EMBED), jnp.float32),
        "ln2_g": jnp.ones((DEPTH, 1, EMBED), jnp.float32),
        "ln2_b": jnp.zeros((DEPTH, 1, EMBED), jnp.float32),
        "fc1_w": nrm((DEPTH, EMBED, MLP_HIDDEN)),
        "fc1_b": jnp.zeros((DEPTH, 1, MLP_HIDDEN), jnp.float32),
        "fc2_w": nrm((DEPTH, MLP_HIDDEN, EMBED)),
        "fc2_b": jnp.zeros((DEPTH, 1, EMBED), jnp.float32),
    }


if __name__ == "__main__":
    key = jax.random.PRNGKey(0)
    kx, kp = jax.random.split(key)
    x = jax.random.uniform(kx, (2, 3, IMG_IN, IMG_IN), jnp.float32)   # x in [0, 1]
    params = init_params(kp)

    feats = jax.jit(dino_forward)(x, params)
    feats = jax.block_until_ready(feats)

    assert set(feats.keys()) == {str(i) for i in range(N_HOOKS)}
    for v in feats.values():
        assert v.shape == (2, EMBED, N_PATCH)
        assert bool(jnp.all(jnp.isfinite(v)))
    print("KERNEL_OK")
</pallas_src>

<mosaic_0001>
module attributes {stable_mosaic.version = 11 : i64} {
  func.func @_dino_kernel(%arg0: i32, %arg1: memref<1x4x48xf32, #tpu.memory_space<vmem>>, %arg2: memref<48x32xf32, #tpu.memory_space<vmem>>, %arg3: memref<1x32xf32, #tpu.memory_space<vmem>>, %arg4: memref<1x32xf32, #tpu.memory_space<vmem>>, %arg5: memref<5x32xf32, #tpu.memory_space<vmem>>, %arg6: memref<4x1x32xf32, #tpu.memory_space<vmem>>, %arg7: memref<4x1x32xf32, #tpu.memory_space<vmem>>, %arg8: memref<4x32x96xf32, #tpu.memory_space<vmem>>, %arg9: memref<4x1x96xf32, #tpu.memory_space<vmem>>, %arg10: memref<4x32x32xf32, #tpu.memory_space<vmem>>, %arg11: memref<4x1x32xf32, #tpu.memory_space<vmem>>, %arg12: memref<4x1x32xf32, #tpu.memory_space<vmem>>, %arg13: memref<4x1x32xf32, #tpu.memory_space<vmem>>, %arg14: memref<4x32x128xf32, #tpu.memory_space<vmem>>, %arg15: memref<4x1x128xf32, #tpu.memory_space<vmem>>, %arg16: memref<4x128x32xf32, #tpu.memory_space<vmem>>, %arg17: memref<4x1x32xf32, #tpu.memory_space<vmem>>, %arg18: memref<5x1x4x32xf32, #tpu.memory_space<vmem>>) attributes {dimension_semantics = [#tpu.dimension_semantics<parallel>], iteration_bounds = array<i64: 2>, scalar_prefetch = 0 : i64, scratch_operands = 0 : i64, tpu.core_type = #tpu.core_type<tc>, window_params = [{transform_indices = @transform_0, window_bounds = array<i64: 1, 4, 48>}, {pipeline_mode = #tpu.pipeline_mode<synchronous>, transform_indices = @transform_1, window_bounds = array<i64: 48, 32>}, {pipeline_mode = #tpu.pipeline_mode<synchronous>, transform_indices = @transform_2, window_bounds = array<i64: 1, 32>}, {pipeline_mode = #tpu.pipeline_mode<synchronous>, transform_indices = @transform_3, window_bounds = array<i64: 1, 32>}, {pipeline_mode = #tpu.pipeline_mode<synchronous>, transform_indices = @transform_4, window_bounds = array<i64: 5, 32>}, {pipeline_mode = #tpu.pipeline_mode<synchronous>, transform_indices = @transform_5, window_bounds = array<i64: 4, 1, 32>}, {pipeline_mode = #tpu.pipeline_mode<synchronous>, transform_indices = @transform_6, window_bounds = array<i64: 4, 1, 32>}, {pipeline_mode = #tpu.pipeline_mode<synchronous>, transform_indices = @transform_7, window_bounds = array<i64: 4, 32, 96>}, {pipeline_mode = #tpu.pipeline_mode<synchronous>, transform_indices = @transform_8, window_bounds = array<i64: 4, 1, 96>}, {pipeline_mode = #tpu.pipeline_mode<synchronous>, transform_indices = @transform_9, window_bounds = array<i64: 4, 32, 32>}, {pipeline_mode = #tpu.pipeline_mode<synchronous>, transform_indices = @transform_10, window_bounds = array<i64: 4, 1, 32>}, {pipeline_mode = #tpu.pipeline_mode<synchronous>, transform_indices = @transform_11, window_bounds = array<i64: 4, 1, 32>}, {pipeline_mode = #tpu.pipeline_mode<synchronous>, transform_indices = @transform_12, window_bounds = array<i64: 4, 1, 32>}, {pipeline_mode = #tpu.pipeline_mode<synchronous>, transform_indices = @transform_13, window_bounds = array<i64: 4, 32, 128>}, {pipeline_mode = #tpu.pipeline_mode<synchronous>, transform_indices = @transform_14, window_bounds = array<i64: 4, 1, 128>}, {pipeline_mode = #tpu.pipeline_mode<synchronous>, transform_indices = @transform_15, window_bounds = array<i64: 4, 128, 32>}, {pipeline_mode = #tpu.pipeline_mode<synchronous>, transform_indices = @transform_16, window_bounds = array<i64: 4, 1, 32>}, {transform_indices = @transform_17, window_bounds = array<i64: 5, 1, 4, 32>}]} {
    %c0 = arith.constant 0 : index
    %c0_0 = arith.constant 0 : index
    %c0_1 = arith.constant 0 : index
    %0 = vector.load %arg1[%c0, %c0_0, %c0_1] : memref<1x4x48xf32, #tpu.memory_space<vmem>>, vector<1x4x48xf32>
    %1 = vector.shape_cast %0 : vector<1x4x48xf32> to vector<4x48xf32>
    %c0_2 = arith.constant 0 : index
    %c0_3 = arith.constant 0 : index
    %2 = vector.load %arg2[%c0_2, %c0_3] : memref<48x32xf32, #tpu.memory_space<vmem>>, vector<48x32xf32>
    %cst = arith.constant dense<0.000000e+00> : vector<4x32xf32>
    %3 = tpu.matmul %1, %2, %cst {dimension_numbers = #tpu.dot_dimension_numbers<[1], [0], [0], [1], [0, 0, 1, 1], [], []>} : vector<4x48xf32>, vector<48x32xf32>, vector<4x32xf32> -> vector<4x32xf32>
    %c0_4 = arith.constant 0 : index
    %c0_5 = arith.constant 0 : index
    %4 = vector.load %arg3[%c0_4, %c0_5] : memref<1x32xf32, #tpu.memory_space<vmem>>, vector<1x32xf32>
    %5 = vector.broadcast %4 : vector<1x32xf32> to vector<4x32xf32>
    %6 = arith.addf %3, %5 : vector<4x32xf32>
    %c0_6 = arith.constant 0 : index
    %c0_7 = arith.constant 0 : index
    %7 = vector.load %arg4[%c0_6, %c0_7] : memref<1x32xf32, #tpu.memory_space<vmem>>, vector<1x32xf32>
    %8 = tpu.concatenate %7, %6 in 0 : vector<1x32xf32>, vector<4x32xf32> -> vector<5x32xf32>
    %c0_8 = arith.constant 0 : index
    %c0_9 = arith.constant 0 : index
    %9 = vector.load %arg5[%c0_8, %c0_9] : memref<5x32xf32, #tpu.memory_space<vmem>>, vector<5x32xf32>
    %10 = arith.addf %8, %9 : vector<5x32xf32>
    %11 = vector.extract_strided_slice %10 {offsets = [1, 0], sizes = [4, 32], strides = [1, 1]} : vector<5x32xf32> to vector<4x32xf32>
    %12 = vector.extract_strided_slice %10 {offsets = [0, 0], sizes = [1, 32], strides = [1, 1]} : vector<5x32xf32> to vector<1x32xf32>
    %13 = vector.broadcast %12 : vector<1x32xf32> to vector<4x32xf32>
    %14 = arith.addf %11, %13 : vector<4x32xf32>
    %c0_10 = arith.constant 0 : index
    %c0_11 = arith.constant 0 : index
    %c0_12 = arith.constant 0 : index
    %c0_13 = arith.constant 0 : index
    %15 = vector.load %arg18[%c0_10, %c0_11, %c0_12, %c0_13] : memref<5x1x4x32xf32, #tpu.memory_space<vmem>>, vector<1x1x4x32xf32>
    %16 = vector.shape_cast %15 : vector<1x1x4x32xf32> to vector<4x32xf32>
    %17 = vector.shape_cast %14 : vector<4x32xf32> to vector<1x1x4x32xf32>
    tpu.vector_store %arg18[%c0_10, %c0_11, %c0_12, %c0_13], %17 {strides = array<i32>} : memref<5x1x4x32xf32, #tpu.memory_space<vmem>>, vector<1x1x4x32xf32>,
    %c0_14 = arith.constant 0 : index
    %c0_15 = arith.constant 0 : index
    %c0_16 = arith.constant 0 : index
    %18 = vector.load %arg6[%c0_14, %c0_15, %c0_16] : memref<4x1x32xf32, #tpu.memory_space<vmem>>, vector<1x1x32xf32>
    %19 = vector.shape_cast %18 : vector<1x1x32xf32> to vector<1x32xf32>
    %c0_17 = arith.constant 0 : index
    %c0_18 = arith.constant 0 : index
    %c0_19 = arith.constant 0 : index
    %20 = vector.load %arg7[%c0_17, %c0_18, %c0_19] : memref<4x1x32xf32, #tpu.memory_space<vmem>>, vector<1x1x32xf32>
    %21 = vector.shape_cast %20 : vector<1x1x32xf32> to vector<1x32xf32>
    %cst_20 = arith.constant dense<0.000000e+00> : vector<5xf32>
    %22 = vector.multi_reduction <add>, %10, %cst_20 [1] : vector<5x32xf32> to vector<5xf32>
    %23 = vector.shape_cast %22 : vector<5xf32> to vector<5x1xf32>
    %cst_21 = arith.constant 3.200000e+01 : f32
    %24 = vector.broadcast %cst_21 : f32 to vector<5x1xf32>
    %25 = arith.divf %23, %24 : vector<5x1xf32>
    %26 = vector.broadcast %25 : vector<5x1xf32> to vector<5x32xf32>
    %27 = arith.subf %10, %26 : vector<5x32xf32>
    %28 = arith.mulf %27, %27 : vector<5x32xf32>
    %cst_22 = arith.constant dense<0.000000e+00> : vector<5xf32>
    %29 = vector.multi_reduction <add>, %28, %cst_22 [1] : vector<5x32xf32> to vector<5xf32>
    %30 = vector.shape_cast %29 : vector<5xf32> to vector<5x1xf32>
    %cst_23 = arith.constant 3.200000e+01 : f32
    %31 = vector.broadcast %cst_23 : f32 to vector<5x1xf32>
    %32 = arith.divf %30, %31 : vector<5x1xf32>
    %cst_24 = arith.constant 9.99999997E-7 : f32
    %33 = vector.broadcast %cst_24 : f32 to vector<5x1xf32>
    %34 = arith.addf %32, %33 : vector<5x1xf32>
    %35 = math.rsqrt %34 : vector<5x1xf32>
    %36 = vector.broadcast %35 : vector<5x1xf32> to vector<5x32xf32>
    %37 = arith.mulf %27, %36 : vector<5x32xf32>
    %38 = vector.broadcast %19 : vector<1x32xf32> to vector<5x32xf32>
    %39 = arith.mulf %37, %38 : vector<5x32xf32>
    %40 = vector.broadcast %21 : vector<1x32xf32> to vector<5x32xf32>
    %41 = arith.addf %39, %40 : vector<5x32xf32>
    %c0_25 = arith.constant 0 : index
    %c0_26 = arith.constant 0 : index
    %c0_27 = arith.constant 0 : index
    %42 = vector.load %arg8[%c0_25, %c0_26, %c0_27] : memref<4x32x96xf32, #tpu.memory_space<vmem>>, vector<1x32x96xf32>
    %43 = vector.shape_cast %42 : vector<1x32x96xf32> to vector<32x96xf32>
    %cst_28 = arith.constant dense<0.000000e+00> : vector<5x96xf32>
    %44 = tpu.matmul %41, %43, %cst_28 {dimension_numbers = #tpu.dot_dimension_numbers<[1], [0], [0], [1], [0, 0, 1, 1], [], []>} : vector<5x32xf32>, vector<32x96xf32>, vector<5x96xf32> -> vector<5x96xf32>
    %c0_29 = arith.constant 0 : index
    %c0_30 = arith.constant 0 : index
    %c0_31 = arith.constant 0 : index
    %45 = vector.load %arg9[%c0_29, %c0_30, %c0_31] : memref<4x1x96xf32, #tpu.memory_space<vmem>>, vector<1x1x96xf32>
    %46 = vector.shape_cast %45 : vector<1x1x96xf32> to vector<1x96xf32>
    %47 = vector.broadcast %46 : vector<1x96xf32> to vector<5x96xf32>
    %48 = arith.addf %44, %47 : vector<5x96xf32>
    %49 = vector.extract_strided_slice %48 {offsets = [0, 0], sizes = [5, 8], strides = [1, 1]} : vector<5x96xf32> to vector<5x8xf32>
    %50 = vector.extract_strided_slice %48 {offsets = [0, 32], sizes = [5, 8], strides = [1, 1]} : vector<5x96xf32> to vector<5x8xf32>
    %51 = vector.extract_strided_slice %48 {offsets = [0, 64], sizes = [5, 8], strides = [1, 1]} : vector<5x96xf32> to vector<5x8xf32>
    %cst_32 = arith.constant dense<0.000000e+00> : vector<5x5xf32>
    %52 = tpu.matmul %49, %50, %cst_32 {dimension_numbers = #tpu.dot_dimension_numbers<[1], [1], [0], [0], [0, 0, 1, 0], [], []>} : vector<5x8xf32>, vector<5x8xf32>, vector<5x5xf32> -> vector<5x5xf32>
    %cst_33 = arith.constant 0.353553385 : f32
    %53 = vector.broadcast %cst_33 : f32 to vector<5x5xf32>
    %54 = arith.mulf %52, %53 : vector<5x5xf32>
    %cst_34 = arith.constant dense<0xFF800000> : vector<5xf32>
    %55 = vector.multi_reduction <maximumf>, %54, %cst_34 [1] : vector<5x5xf32> to vector<5xf32>
    %56 = vector.shape_cast %55 : vector<5xf32> to vector<5x1xf32>
    %57 = vector.broadcast %56 : vector<5x1xf32> to vector<5x5xf32>
    %58 = arith.subf %54, %57 : vector<5x5xf32>
    %59 = math.exp %58 : vector<5x5xf32>
    %cst_35 = arith.constant dense<0.000000e+00> : vector<5xf32>
    %60 = vector.multi_reduction <add>, %59, %cst_35 [1] : vector<5x5xf32> to vector<5xf32>
    %61 = vector.shape_cast %60 : vector<5xf32> to vector<5x1xf32>
    %62 = tpu.reciprocal %61 {approx = true} : vector<5x1xf32> -> vector<5x1xf32>
    %63 = vector.broadcast %62 : vector<5x1xf32> to vector<5x5xf32>
    %64 = arith.mulf %59, %63 : vector<5x5xf32>
    %cst_36 = arith.constant dense<0.000000e+00> : vector<5x8xf32>
    %65 = tpu.matmul %64, %51, %cst_36 {dimension_numbers = #tpu.dot_dimension_numbers<[1], [0], [0], [1], [0, 0, 1, 1], [], []>} : vector<5x5xf32>, vector<5x8xf32>, vector<5x8xf32> -> vector<5x8xf32>
    %66 = vector.extract_strided_slice %48 {offsets = [0, 8], sizes = [5, 8], strides = [1, 1]} : vector<5x96xf32> to vector<5x8xf32>
    %67 = vector.extract_strided_slice %48 {offsets = [0, 40], sizes = [5, 8], strides = [1, 1]} : vector<5x96xf32> to vector<5x8xf32>
    %68 = vector.extract_strided_slice %48 {offsets = [0, 72], sizes = [5, 8], strides = [1, 1]} : vector<5x96xf32> to vector<5x8xf32>
    %cst_37 = arith.constant dense<0.000000e+00> : vector<5x5xf32>
    %69 = tpu.matmul %66, %67, %cst_37 {dimension_numbers = #tpu.dot_dimension_numbers<[1], [1], [0], [0], [0, 0, 1, 0], [], []>} : vector<5x8xf32>, vector<5x8xf32>, vector<5x5xf32> -> vector<5x5xf32>
    %cst_38 = arith.constant 0.353553385 : f32
    %70 = vector.broadcast %cst_38 : f32 to vector<5x5xf32>
    %71 = arith.mulf %69, %70 : vector<5x5xf32>
    %cst_39 = arith.constant dense<0xFF800000> : vector<5xf32>
    %72 = vector.multi_reduction <maximumf>, %71, %cst_39 [1] : vector<5x5xf32> to vector<5xf32>
    %73 = vector.shape_cast %72 : vector<5xf32> to vector<5x1xf32>
    %74 = vector.broadcast %73 : vector<5x1xf32> to vector<5x5xf32>
    %75 = arith.subf %71, %74 : vector<5x5xf32>
    %76 = math.exp %75 : vector<5x5xf32>
    %cst_40 = arith.constant dense<0.000000e+00> : vector<5xf32>
    %77 = vector.multi_reduction <add>, %76, %cst_40 [1] : vector<5x5xf32> to vector<5xf32>
    %78 = vector.shape_cast %77 : vector<5xf32> to vector<5x1xf32>
    %79 = tpu.reciprocal %78 {approx = true} : vector<5x1xf32> -> vector<5x1xf32>
    %80 = vector.broadcast %79 : vector<5x1xf32> to vector<5x5xf32>
    %81 = arith.mulf %76, %80 : vector<5x5xf32>
    %cst_41 = arith.constant dense<0.000000e+00> : vector<5x8xf32>
    %82 = tpu.matmul %81, %68, %cst_41 {dimension_numbers = #tpu.dot_dimension_numbers<[1], [0], [0], [1], [0, 0, 1, 1], [], []>} : vector<5x5xf32>, vector<5x8xf32>, vector<5x8xf32> -> vector<5x8xf32>
    %83 = vector.extract_strided_slice %48 {offsets = [0, 16], sizes = [5, 8], strides = [1, 1]} : vector<5x96xf32> to vector<5x8xf32>
    %84 = vector.extract_strided_slice %48 {offsets = [0, 48], sizes = [5, 8], strides = [1, 1]} : vector<5x96xf32> to vector<5x8xf32>
    %85 = vector.extract_strided_slice %48 {offsets = [0, 80], sizes = [5, 8], strides = [1, 1]} : vector<5x96xf32> to vector<5x8xf32>
    %cst_42 = arith.constant dense<0.000000e+00> : vector<5x5xf32>
    %86 = tpu.matmul %83, %84, %cst_42 {dimension_numbers = #tpu.dot_dimension_numbers<[1], [1], [0], [0], [0, 0, 1, 0], [], []>} : vector<5x8xf32>, vector<5x8xf32>, vector<5x5xf32> -> vector<5x5xf32>
    %cst_43 = arith.constant 0.353553385 : f32
    %87 = vector.broadcast %cst_43 : f32 to vector<5x5xf32>
    %88 = arith.mulf %86, %87 : vector<5x5xf32>
    %cst_44 = arith.constant dense<0xFF800000> : vector<5xf32>
    %89 = vector.multi_reduction <maximumf>, %88, %cst_44 [1] : vector<5x5xf32> to vector<5xf32>
    %90 = vector.shape_cast %89 : vector<5xf32> to vector<5x1xf32>
    %91 = vector.broadcast %90 : vector<5x1xf32> to vector<5x5xf32>
    %92 = arith.subf %88, %91 : vector<5x5xf32>
    %93 = math.exp %92 : vector<5x5xf32>
    %cst_45 = arith.constant dense<0.000000e+00> : vector<5xf32>
    %94 = vector.multi_reduction <add>, %93, %cst_45 [1] : vector<5x5xf32> to vector<5xf32>
    %95 = vector.shape_cast %94 : vector<5xf32> to vector<5x1xf32>
    %96 = tpu.reciprocal %95 {approx = true} : vector<5x1xf32> -> vector<5x1xf32>
    %97 = vector.broadcast %96 : vector<5x1xf32> to vector<5x5xf32>
    %98 = arith.mulf %93, %97 : vector<5x5xf32>
    %cst_46 = arith.constant dense<0.000000e+00> : vector<5x8xf32>
    %99 = tpu.matmul %98, %85, %cst_46 {dimension_numbers = #tpu.dot_dimension_numbers<[1], [0], [0], [1], [0, 0, 1, 1], [], []>} : vector<5x5xf32>, vector<5x8xf32>, vector<5x8xf32> -> vector<5x8xf32>
    %100 = vector.extract_strided_slice %48 {offsets = [0, 24], sizes = [5, 8], strides = [1, 1]} : vector<5x96xf32> to vector<5x8xf32>
    %101 = vector.extract_strided_slice %48 {offsets = [0, 56], sizes = [5, 8], strides = [1, 1]} : vector<5x96xf32> to vector<5x8xf32>
    %102 = vector.extract_strided_slice %48 {offsets = [0, 88], sizes = [5, 8], strides = [1, 1]} : vector<5x96xf32> to vector<5x8xf32>
    %cst_47 = arith.constant dense<0.000000e+00> : vector<5x5xf32>
    %103 = tpu.matmul %100, %101, %cst_47 {dimension_numbers = #tpu.dot_dimension_numbers<[1], [1], [0], [0], [0, 0, 1, 0], [], []>} : vector<5x8xf32>, vector<5x8xf32>, vector<5x5xf32> -> vector<5x5xf32>
    %cst_48 = arith.constant 0.353553385 : f32
    %104 = vector.broadcast %cst_48 : f32 to vector<5x5xf32>
    %105 = arith.mulf %103, %104 : vector<5x5xf32>
    %cst_49 = arith.constant dense<0xFF800000> : vector<5xf32>
    %106 = vector.multi_reduction <maximumf>, %105, %cst_49 [1] : vector<5x5xf32> to vector<5xf32>
    %107 = vector.shape_cast %106 : vector<5xf32> to vector<5x1xf32>
    %108 = vector.broadcast %107 : vector<5x1xf32> to vector<5x5xf32>
    %109 = arith.subf %105, %108 : vector<5x5xf32>
    %110 = math.exp %109 : vector<5x5xf32>
    %cst_50 = arith.constant dense<0.000000e+00> : vector<5xf32>
    %111 = vector.multi_reduction <add>, %110, %cst_50 [1] : vector<5x5xf32> to vector<5xf32>
    %112 = vector.shape_cast %111 : vector<5xf32> to vector<5x1xf32>
    %113 = tpu.reciprocal %112 {approx = true} : vector<5x1xf32> -> vector<5x1xf32>
    %114 = vector.broadcast %113 : vector<5x1xf32> to vector<5x5xf32>
    %115 = arith.mulf %110, %114 : vector<5x5xf32>
    %cst_51 = arith.constant dense<0.000000e+00> : vector<5x8xf32>
    %116 = tpu.matmul %115, %102, %cst_51 {dimension_numbers = #tpu.dot_dimension_numbers<[1], [0], [0], [1], [0, 0, 1, 1], [], []>} : vector<5x5xf32>, vector<5x8xf32>, vector<5x8xf32> -> vector<5x8xf32>
    %117 = tpu.concatenate %65, %82, %99, %116 in 1 : vector<5x8xf32>, vector<5x8xf32>, vector<5x8xf32>, vector<5x8xf32> -> vector<5x32xf32>
    %c0_52 = arith.constant 0 : index
    %c0_53 = arith.constant 0 : index
    %c0_54 = arith.constant 0 : index
    %118 = vector.load %arg10[%c0_52, %c0_53, %c0_54] : memref<4x32x32xf32, #tpu.memory_space<vmem>>, vector<1x32x32xf32>
    %119 = vector.shape_cast %118 : vector<1x32x32xf32> to vector<32x32xf32>
    %cst_55 = arith.constant dense<0.000000e+00> : vector<5x32xf32>
    %120 = tpu.matmul %117, %119, %cst_55 {dimension_numbers = #tpu.dot_dimension_numbers<[1], [0], [0], [1], [0, 0, 1, 1], [], []>} : vector<5x32xf32>, vector<32x32xf32>, vector<5x32xf32> -> vector<5x32xf32>
    %121 = arith.addf %10, %120 : vector<5x32xf32>
    %c0_56 = arith.constant 0 : index
    %c0_57 = arith.constant 0 : index
    %c0_58 = arith.constant 0 : index
    %122 = vector.load %arg11[%c0_56, %c0_57, %c0_58] : memref<4x1x32xf32, #tpu.memory_space<vmem>>, vector<1x1x32xf32>
    %123 = vector.shape_cast %122 : vector<1x1x32xf32> to vector<1x32xf32>
    %124 = vector.broadcast %123 : vector<1x32xf32> to vector<5x32xf32>
    %125 = arith.addf %121, %124 : vector<5x32xf32>
    %c0_59 = arith.constant 0 : index
    %c0_60 = arith.constant 0 : index
    %c0_61 = arith.constant 0 : index
    %126 = vector.load %arg12[%c0_59, %c0_60, %c0_61] : memref<4x1x32xf32, #tpu.memory_space<vmem>>, vector<1x1x32xf32>
    %127 = vector.shape_cast %126 : vector<1x1x32xf32> to vector<1x32xf32>
    %c0_62 = arith.constant 0 : index
    %c0_63 = arith.constant 0 : index
    %c0_64 = arith.constant 0 : index
    %128 = vector.load %arg13[%c0_62, %c0_63, %c0_64] : memref<4x1x32xf32, #tpu.memory_space<vmem>>, vector<1x1x32xf32>
    %129 = vector.shape_cast %128 : vector<1x1x32xf32> to vector<1x32xf32>
    %cst_65 = arith.constant dense<0.000000e+00> : vector<5xf32>
    %130 = vector.multi_reduction <add>, %125, %cst_65 [1] : vector<5x32xf32> to vector<5xf32>
    %131 = vector.shape_cast %130 : vector<5xf32> to vector<5x1xf32>
    %cst_66 = arith.constant 3.200000e+01 : f32
    %132 = vector.broadcast %cst_66 : f32 to vector<5x1xf32>
    %133 = arith.divf %131, %132 : vector<5x1xf32>
    %134 = vector.broadcast %133 : vector<5x1xf32> to vector<5x32xf32>
    %135 = arith.subf %125, %134 : vector<5x32xf32>
    %136 = arith.mulf %135, %135 : vector<5x32xf32>
    %cst_67 = arith.constant dense<0.000000e+00> : vector<5xf32>
    %137 = vector.multi_reduction <add>, %136, %cst_67 [1] : vector<5x32xf32> to vector<5xf32>
    %138 = vector.shape_cast %137 : vector<5xf32> to vector<5x1xf32>
    %cst_68 = arith.constant 3.200000e+01 : f32
    %139 = vector.broadcast %cst_68 : f32 to vector<5x1xf32>
    %140 = arith.divf %138, %139 : vector<5x1xf32>
    %cst_69 = arith.constant 9.99999997E-7 : f32
    %141 = vector.broadcast %cst_69 : f32 to vector<5x1xf32>
    %142 = arith.addf %140, %141 : vector<5x1xf32>
    %143 = math.rsqrt %142 : vector<5x1xf32>
    %144 = vector.broadcast %143 : vector<5x1xf32> to vector<5x32xf32>
    %145 = arith.mulf %135, %144 : vector<5x32xf32>
    %146 = vector.broadcast %127 : vector<1x32xf32> to vector<5x32xf32>
    %147 = arith.mulf %145, %146 : vector<5x32xf32>
    %148 = vector.broadcast %129 : vector<1x32xf32> to vector<5x32xf32>
    %149 = arith.addf %147, %148 : vector<5x32xf32>
    %c0_70 = arith.constant 0 : index
    %c0_71 = arith.constant 0 : index
    %c0_72 = arith.constant 0 : index
    %150 = vector.load %arg14[%c0_70, %c0_71, %c0_72] : memref<4x32x128xf32, #tpu.memory_space<vmem>>, vector<1x32x128xf32>
    %151 = vector.shape_cast %150 : vector<1x32x128xf32> to vector<32x128xf32>
    %cst_73 = arith.constant dense<0.000000e+00> : vector<5x128xf32>
    %152 = tpu.matmul %149, %151, %cst_73 {dimension_numbers = #tpu.dot_dimension_numbers<[1], [0], [0], [1], [0, 0, 1, 1], [], []>} : vector<5x32xf32>, vector<32x128xf32>, vector<5x128xf32> -> vector<5x128xf32>
    %c0_74 = arith.constant 0 : index
    %c0_75 = arith.constant 0 : index
    %c0_76 = arith.constant 0 : index
    %153 = vector.load %arg15[%c0_74, %c0_75, %c0_76] : memref<4x1x128xf32, #tpu.memory_space<vmem>>, vector<1x1x128xf32>
    %154 = vector.shape_cast %153 : vector<1x1x128xf32> to vector<1x128xf32>
    %155 = vector.broadcast %154 : vector<1x128xf32> to vector<5x128xf32>
    %156 = arith.addf %152, %155 : vector<5x128xf32>
    %cst_77 = arith.constant 5.000000e-01 : f32
    %157 = vector.broadcast %cst_77 : f32 to vector<5x128xf32>
    %158 = arith.mulf %157, %156 : vector<5x128xf32>
    %cst_78 = arith.constant 4.471500e-02 : f32
    %159 = vector.broadcast %cst_78 : f32 to vector<5x128xf32>
    %160 = arith.mulf %159, %156 : vector<5x128xf32>
    %161 = arith.mulf %160, %156 : vector<5x128xf32>
    %162 = arith.mulf %161, %156 : vector<5x128xf32>
    %163 = arith.addf %156, %162 : vector<5x128xf32>
    %cst_79 = arith.constant 0.797884583 : f32
    %164 = vector.broadcast %cst_79 : f32 to vector<5x128xf32>
    %165 = arith.mulf %164, %163 : vector<5x128xf32>
    %166 = math.tanh %165 : vector<5x128xf32>
    %cst_80 = arith.constant 1.000000e+00 : f32
    %167 = vector.broadcast %cst_80 : f32 to vector<5x128xf32>
    %168 = arith.addf %167, %166 : vector<5x128xf32>
    %169 = arith.mulf %158, %168 : vector<5x128xf32>
    %c0_81 = arith.constant 0 : index
    %c0_82 = arith.constant 0 : index
    %c0_83 = arith.constant 0 : index
    %170 = vector.load %arg16[%c0_81, %c0_82, %c0_83] : memref<4x128x32xf32, #tpu.memory_space<vmem>>, vector<1x128x32xf32>
    %171 = vector.shape_cast %170 : vector<1x128x32xf32> to vector<128x32xf32>
    %cst_84 = arith.constant dense<0.000000e+00> : vector<5x32xf32>
    %172 = tpu.matmul %169, %171, %cst_84 {dimension_numbers = #tpu.dot_dimension_numbers<[1], [0], [0], [1], [0, 0, 1, 1], [], []>} : vector<5x128xf32>, vector<128x32xf32>, vector<5x32xf32> -> vector<5x32xf32>
    %173 = arith.addf %125, %172 : vector<5x32xf32>
    %c0_85 = arith.constant 0 : index
    %c0_86 = arith.constant 0 : index
    %c0_87 = arith.constant 0 : index
    %174 = vector.load %arg17[%c0_85, %c0_86, %c0_87] : memref<4x1x32xf32, #tpu.memory_space<vmem>>, vector<1x1x32xf32>
    %175 = vector.shape_cast %174 : vector<1x1x32xf32> to vector<1x32xf32>
    %176 = vector.broadcast %175 : vector<1x32xf32> to vector<5x32xf32>
    %177 = arith.addf %173, %176 : vector<5x32xf32>
    %178 = vector.extract_strided_slice %177 {offsets = [1, 0], sizes = [4, 32], strides = [1, 1]} : vector<5x32xf32> to vector<4x32xf32>
    %179 = vector.extract_strided_slice %177 {offsets = [0, 0], sizes = [1, 32], strides = [1, 1]} : vector<5x32xf32> to vector<1x32xf32>
    %180 = vector.broadcast %179 : vector<1x32xf32> to vector<4x32xf32>
    %181 = arith.addf %178, %180 : vector<4x32xf32>
    %c1 = arith.constant 1 : index
    %c0_88 = arith.constant 0 : index
    %c0_89 = arith.constant 0 : index
    %c0_90 = arith.constant 0 : index
    %182 = vector.load %arg18[%c1, %c0_88, %c0_89, %c0_90] : memref<5x1x4x32xf32, #tpu.memory_space<vmem>>, vector<1x1x4x32xf32>
    %183 = vector.shape_cast %182 : vector<1x1x4x32xf32> to vector<4x32xf32>
    %184 = vector.shape_cast %181 : vector<4x32xf32> to vector<1x1x4x32xf32>
    tpu.vector_store %arg18[%c1, %c0_88, %c0_89, %c0_90], %184 {strides = array<i32>} : memref<5x1x4x32xf32, #tpu.memory_space<vmem>>, vector<1x1x4x32xf32>,
    %c1_91 = arith.constant 1 : index
    %c0_92 = arith.constant 0 : index
    %c0_93 = arith.constant 0 : index
    %185 = vector.load %arg6[%c1_91, %c0_92, %c0_93] : memref<4x1x32xf32, #tpu.memory_space<vmem>>, vector<1x1x32xf32>
    %186 = vector.shape_cast %185 : vector<1x1x32xf32> to vector<1x32xf32>
    %c1_94 = arith.constant 1 : index
    %c0_95 = arith.constant 0 : index
    %c0_96 = arith.constant 0 : index
    %187 = vector.load %arg7[%c1_94, %c0_95, %c0_96] : memref<4x1x32xf32, #tpu.memory_space<vmem>>, vector<1x1x32xf32>
    %188 = vector.shape_cast %187 : vector<1x1x32xf32> to vector<1x32xf32>
    %cst_97 = arith.constant dense<0.000000e+00> : vector<5xf32>
    %189 = vector.multi_reduction <add>, %177, %cst_97 [1] : vector<5x32xf32> to vector<5xf32>
    %190 = vector.shape_cast %189 : vector<5xf32> to vector<5x1xf32>
    %cst_98 = arith.constant 3.200000e+01 : f32
    %191 = vector.broadcast %cst_98 : f32 to vector<5x1xf32>
    %192 = arith.divf %190, %191 : vector<5x1xf32>
    %193 = vector.broadcast %192 : vector<5x1xf32> to vector<5x32xf32>
    %194 = arith.subf %177, %193 : vector<5x32xf32>
    %195 = arith.mulf %194, %194 : vector<5x32xf32>
    %cst_99 = arith.constant dense<0.000000e+00> : vector<5xf32>
    %196 = vector.multi_reduction <add>, %195, %cst_99 [1] : vector<5x32xf32> to vector<5xf32>
    %197 = vector.shape_cast %196 : vector<5xf32> to vector<5x1xf32>
    %cst_100 = arith.constant 3.200000e+01 : f32
    %198 = vector.broadcast %cst_100 : f32 to vector<5x1xf32>
    %199 = arith.divf %197, %198 : vector<5x1xf32>
    %cst_101 = arith.constant 9.99999997E-7 : f32
    %200 = vector.broadcast %cst_101 : f32 to vector<5x1xf32>
    %201 = arith.addf %199, %200 : vector<5x1xf32>
    %202 = math.rsqrt %201 : vector<5x1xf32>
    %203 = vector.broadcast %202 : vector<5x1xf32> to vector<5x32xf32>
    %204 = arith.mulf %194, %203 : vector<5x32xf32>
    %205 = vector.broadcast %186 : vector<1x32xf32> to vector<5x32xf32>
    %206 = arith.mulf %204, %205 : vector<5x32xf32>
    %207 = vector.broadcast %188 : vector<1x32xf32> to vector<5x32xf32>
    %208 = arith.addf %206, %207 : vector<5x32xf32>
    %c1_102 = arith.constant 1 : index
    %c0_103 = arith.constant 0 : index
    %c0_104 = arith.constant 0 : index
    %209 = vector.load %arg8[%c1_102, %c0_103, %c0_104] : memref<4x32x96xf32, #tpu.memory_space<vmem>>, vector<1x32x96xf32>
    %210 = vector.shape_cast %209 : vector<1x32x96xf32> to vector<32x96xf32>
    %cst_105 = arith.constant dense<0.000000e+00> : vector<5x96xf32>
    %211 = tpu.matmul %208, %210, %cst_105 {dimension_numbers = #tpu.dot_dimension_numbers<[1], [0], [0], [1], [0, 0, 1, 1], [], []>} : vector<5x32xf32>, vector<32x96xf32>, vector<5x96xf32> -> vector<5x96xf32>
    %c1_106 = arith.constant 1 : index
    %c0_107 = arith.constant 0 : index
    %c0_108 = arith.constant 0 : index
    %212 = vector.load %arg9[%c1_106, %c0_107, %c0_108] : memref<4x1x96xf32, #tpu.memory_space<vmem>>, vector<1x1x96xf32>
    %213 = vector.shape_cast %212 : vector<1x1x96xf32> to vector<1x96xf32>
    %214 = vector.broadcast %213 : vector<1x96xf32> to vector<5x96xf32>
    %215 = arith.addf %211, %214 : vector<5x96xf32>
    %216 = vector.extract_strided_slice %215 {offsets = [0, 0], sizes = [5, 8], strides = [1, 1]} : vector<5x96xf32> to vector<5x8xf32>
    %217 = vector.extract_strided_slice %215 {offsets = [0, 32], sizes = [5, 8], strides = [1, 1]} : vector<5x96xf32> to vector<5x8xf32>
    %218 = vector.extract_strided_slice %215 {offsets = [0, 64], sizes = [5, 8], strides = [1, 1]} : vector<5x96xf32> to vector<5x8xf32>
    %cst_109 = arith.constant dense<0.000000e+00> : vector<5x5xf32>
    %219 = tpu.matmul %216, %217, %cst_109 {dimension_numbers = #tpu.dot_dimension_numbers<[1], [1], [0], [0], [0, 0, 1, 0], [], []>} : vector<5x8xf32>, vector<5x8xf32>, vector<5x5xf32> -> vector<5x5xf32>
    %cst_110 = arith.constant 0.353553385 : f32
    %220 = vector.broadcast %cst_110 : f32 to vector<5x5xf32>
    %221 = arith.mulf %219, %220 : vector<5x5xf32>
    %cst_111 = arith.constant dense<0xFF800000> : vector<5xf32>
    %222 = vector.multi_reduction <maximumf>, %221, %cst_111 [1] : vector<5x5xf32> to vector<5xf32>
    %223 = vector.shape_cast %222 : vector<5xf32> to vector<5x1xf32>
    %224 = vector.broadcast %223 : vector<5x1xf32> to vector<5x5xf32>
    %225 = arith.subf %221, %224 : vector<5x5xf32>
    %226 = math.exp %225 : vector<5x5xf32>
    %cst_112 = arith.constant dense<0.000000e+00> : vector<5xf32>
    %227 = vector.multi_reduction <add>, %226, %cst_112 [1] : vector<5x5xf32> to vector<5xf32>
    %228 = vector.shape_cast %227 : vector<5xf32> to vector<5x1xf32>
    %229 = tpu.reciprocal %228 {approx = true} : vector<5x1xf32> -> vector<5x1xf32>
    %230 = vector.broadcast %229 : vector<5x1xf32> to vector<5x5xf32>
    %231 = arith.mulf %226, %230 : vector<5x5xf32>
    %cst_113 = arith.constant dense<0.000000e+00> : vector<5x8xf32>
    %232 = tpu.matmul %231, %218, %cst_113 {dimension_numbers = #tpu.dot_dimension_numbers<[1], [0], [0], [1], [0, 0, 1, 1], [], []>} : vector<5x5xf32>, vector<5x8xf32>, vector<5x8xf32> -> vector<5x8xf32>
    %233 = vector.extract_strided_slice %215 {offsets = [0, 8], sizes = [5, 8], strides = [1, 1]} : vector<5x96xf32> to vector<5x8xf32>
    %234 = vector.extract_strided_slice %215 {offsets = [0, 40], sizes = [5, 8], strides = [1, 1]} : vector<5x96xf32> to vector<5x8xf32>
    %235 = vector.extract_strided_slice %215 {offsets = [0, 72], sizes = [5, 8], strides = [1, 1]} : vector<5x96xf32> to vector<5x8xf32>
    %cst_114 = arith.constant dense<0.000000e+00> : vector<5x5xf32>
    %236 = tpu.matmul %233, %234, %cst_114 {dimension_numbers = #tpu.dot_dimension_numbers<[1], [1], [0], [0], [0, 0, 1, 0], [], []>} : vector<5x8xf32>, vector<5x8xf32>, vector<5x5xf32> -> vector<5x5xf32>
    %cst_115 = arith.constant 0.353553385 : f32
    %237 = vector.broadcast %cst_115 : f32 to vector<5x5xf32>
    %238 = arith.mulf %236, %237 : vector<5x5xf32>
    %cst_116 = arith.constant dense<0xFF800000> : vector<5xf32>
    %239 = vector.multi_reduction <maximumf>, %238, %cst_116 [1] : vector<5x5xf32> to vector<5xf32>
    %240 = vector.shape_cast %239 : vector<5xf32> to vector<5x1xf32>
    %241 = vector.broadcast %240 : vector<5x1xf32> to vector<5x5xf32>
    %242 = arith.subf %238, %241 : vector<5x5xf32>
    %243 = math.exp %242 : vector<5x5xf32>
    %cst_117 = arith.constant dense<0.000000e+00> : vector<5xf32>
    %244 = vector.multi_reduction <add>, %243, %cst_117 [1] : vector<5x5xf32> to vector<5xf32>
    %245 = vector.shape_cast %244 : vector<5xf32> to vector<5x1xf32>
    %246 = tpu.reciprocal %245 {approx = true} : vector<5x1xf32> -> vector<5x1xf32>
    %247 = vector.broadcast %246 : vector<5x1xf32> to vector<5x5xf32>
    %248 = arith.mulf %243, %247 : vector<5x5xf32>
    %cst_118 = arith.constant dense<0.000000e+00> : vector<5x8xf32>
    %249 = tpu.matmul %248, %235, %cst_118 {dimension_numbers = #tpu.dot_dimension_numbers<[1], [0], [0], [1], [0, 0, 1, 1], [], []>} : vector<5x5xf32>, vector<5x8xf32>, vector<5x8xf32> -> vector<5x8xf32>
    %250 = vector.extract_strided_slice %215 {offsets = [0, 16], sizes = [5, 8], strides = [1, 1]} : vector<5x96xf32> to vector<5x8xf32>
    %251 = vector.extract_strided_slice %215 {offsets = [0, 48], sizes = [5, 8], strides = [1, 1]} : vector<5x96xf32> to vector<5x8xf32>
    %252 = vector.extract_strided_slice %215 {offsets = [0, 80], sizes = [5, 8], strides = [1, 1]} : vector<5x96xf32> to vector<5x8xf32>
    %cst_119 = arith.constant dense<0.000000e+00> : vector<5x5xf32>
    %253 = tpu.matmul %250, %251, %cst_119 {dimension_numbers = #tpu.dot_dimension_numbers<[1], [1], [0], [0], [0, 0, 1, 0], [], []>} : vector<5x8xf32>, vector<5x8xf32>, vector<5x5xf32> -> vector<5x5xf32>
    %cst_120 = arith.constant 0.353553385 : f32
    %254 = vector.broadcast %cst_120 : f32 to vector<5x5xf32>
    %255 = arith.mulf %253, %254 : vector<5x5xf32>
    %cst_121 = arith.constant dense<0xFF800000> : vector<5xf32>
    %256 = vector.multi_reduction <maximumf>, %255, %cst_121 [1] : vector<5x5xf32> to vector<5xf32>
    %257 = vector.shape_cast %256 : vector<5xf32> to vector<5x1xf32>
    %258 = vector.broadcast %257 : vector<5x1xf32> to vector<5x5xf32>
    %259 = arith.subf %255, %258 : vector<5x5xf32>
    %260 = math.exp %259 : vector<5x5xf32>
    %cst_122 = arith.constant dense<0.000000e+00> : vector<5xf32>
    %261 = vector.multi_reduction <add>, %260, %cst_122 [1] : vector<5x5xf32> to vector<5xf32>
    %262 = vector.shape_cast %261 : vector<5xf32> to vector<5x1xf32>
    %263 = tpu.reciprocal %262 {approx = true} : vector<5x1xf32> -> vector<5x1xf32>
    %264 = vector.broadcast %263 : vector<5x1xf32> to vector<5x5xf32>
    %265 = arith.mulf %260, %264 : vector<5x5xf32>
    %cst_123 = arith.constant dense<0.000000e+00> : vector<5x8xf32>
    %266 = tpu.matmul %265, %252, %cst_123 {dimension_numbers = #tpu.dot_dimension_numbers<[1], [0], [0], [1], [0, 0, 1, 1], [], []>} : vector<5x5xf32>, vector<5x8xf32>, vector<5x8xf32> -> vector<5x8xf32>
    %267 = vector.extract_strided_slice %215 {offsets = [0, 24], sizes = [5, 8], strides = [1, 1]} : vector<5x96xf32> to vector<5x8xf32>
    %268 = vector.extract_strided_slice %215 {offsets = [0, 56], sizes = [5, 8], strides = [1, 1]} : vector<5x96xf32> to vector<5x8xf32>
    %269 = vector.extract_strided_slice %215 {offsets = [0, 88], sizes = [5, 8], strides = [1, 1]} : vector<5x96xf32> to vector<5x8xf32>
    %cst_124 = arith.constant dense<0.000000e+00> : vector<5x5xf32>
    %270 = tpu.matmul %267, %268, %cst_124 {dimension_numbers = #tpu.dot_dimension_numbers<[1], [1], [0], [0], [0, 0, 1, 0], [], []>} : vector<5x8xf32>, vector<5x8xf32>, vector<5x5xf32> -> vector<5x5xf32>
    %cst_125 = arith.constant 0.353553385 : f32
    %271 = vector.broadcast %cst_125 : f32 to vector<5x5xf32>
    %272 = arith.mulf %270, %271 : vector<5x5xf32>
    %cst_126 = arith.constant dense<0xFF800000> : vector<5xf32>
    %273 = vector.multi_reduction <maximumf>, %272, %cst_126 [1] : vector<5x5xf32> to vector<5xf32>
    %274 = vector.shape_cast %273 : vector<5xf32> to vector<5x1xf32>
    %275 = vector.broadcast %274 : vector<5x1xf32> to vector<5x5xf32>
    %276 = arith.subf %272, %275 : vector<5x5xf32>
    %277 = math.exp %276 : vector<5x5xf32>
    %cst_127 = arith.constant dense<0.000000e+00> : vector<5xf32>
    %278 = vector.multi_reduction <add>, %277, %cst_127 [1] : vector<5x5xf32> to vector<5xf32>
    %279 = vector.shape_cast %278 : vector<5xf32> to vector<5x1xf32>
    %280 = tpu.reciprocal %279 {approx = true} : vector<5x1xf32> -> vector<5x1xf32>
    %281 = vector.broadcast %280 : vector<5x1xf32> to vector<5x5xf32>
    %282 = arith.mulf %277, %281 : vector<5x5xf32>
    %cst_128 = arith.constant dense<0.000000e+00> : vector<5x8xf32>
    %283 = tpu.matmul %282, %269, %cst_128 {dimension_numbers = #tpu.dot_dimension_numbers<[1], [0], [0], [1], [0, 0, 1, 1], [], []>} : vector<5x5xf32>, vector<5x8xf32>, vector<5x8xf32> -> vector<5x8xf32>
    %284 = tpu.concatenate %232, %249, %266, %283 in 1 : vector<5x8xf32>, vector<5x8xf32>, vector<5x8xf32>, vector<5x8xf32> -> vector<5x32xf32>
    %c1_129 = arith.constant 1 : index
    %c0_130 = arith.constant 0 : index
    %c0_131 = arith.constant 0 : index
    %285 = vector.load %arg10[%c1_129, %c0_130, %c0_131] : memref<4x32x32xf32, #tpu.memory_space<vmem>>, vector<1x32x32xf32>
    %286 = vector.shape_cast %285 : vector<1x32x32xf32> to vector<32x32xf32>
    %cst_132 = arith.constant dense<0.000000e+00> : vector<5x32xf32>
    %287 = tpu.matmul %284, %286, %cst_132 {dimension_numbers = #tpu.dot_dimension_numbers<[1], [0], [0], [1], [0, 0, 1, 1], [], []>} : vector<5x32xf32>, vector<32x32xf32>, vector<5x32xf32> -> vector<5x32xf32>
    %288 = arith.addf %177, %287 : vector<5x32xf32>
    %c1_133 = arith.constant 1 : index
    %c0_134 = arith.constant 0 : index
    %c0_135 = arith.constant 0 : index
    %289 = vector.load %arg11[%c1_133, %c0_134, %c0_135] : memref<4x1x32xf32, #tpu.memory_space<vmem>>, vector<1x1x32xf32>
    %290 = vector.shape_cast %289 : vector<1x1x32xf32> to vector<1x32xf32>
    %291 = vector.broadcast %290 : vector<1x32xf32> to vector<5x32xf32>
    %292 = arith.addf %288, %291 : vector<5x32xf32>
    %c1_136 = arith.constant 1 : index
    %c0_137 = arith.constant 0 : index
    %c0_138 = arith.constant 0 : index
    %293 = vector.load %arg12[%c1_136, %c0_137, %c0_138] : memref<4x1x32xf32, #tpu.memory_space<vmem>>, vector<1x1x32xf32>
    %294 = vector.shape_cast %293 : vector<1x1x32xf32> to vector<1x32xf32>
    %c1_139 = arith.constant 1 : index
    %c0_140 = arith.constant 0 : index
    %c0_141 = arith.constant 0 : index
    %295 = vector.load %arg13[%c1_139, %c0_140, %c0_141] : memref<4x1x32xf32, #tpu.memory_space<vmem>>, vector<1x1x32xf32>
    %296 = vector.shape_cast %295 : vector<1x1x32xf32> to vector<1x32xf32>
    %cst_142 = arith.constant dense<0.000000e+00> : vector<5xf32>
    %297 = vector.multi_reduction <add>, %292, %cst_142 [1] : vector<5x32xf32> to vector<5xf32>
    %298 = vector.shape_cast %297 : vector<5xf32> to vector<5x1xf32>
    %cst_143 = arith.constant 3.200000e+01 : f32
    %299 = vector.broadcast %cst_143 : f32 to vector<5x1xf32>
    %300 = arith.divf %298, %299 : vector<5x1xf32>
    %301 = vector.broadcast %300 : vector<5x1xf32> to vector<5x32xf32>
    %302 = arith.subf %292, %301 : vector<5x32xf32>
    %303 = arith.mulf %302, %302 : vector<5x32xf32>
    %cst_144 = arith.constant dense<0.000000e+00> : vector<5xf32>
    %304 = vector.multi_reduction <add>, %303, %cst_144 [1] : vector<5x32xf32> to vector<5xf32>
    %305 = vector.shape_cast %304 : vector<5xf32> to vector<5x1xf32>
    %cst_145 = arith.constant 3.200000e+01 : f32
    %306 = vector.broadcast %cst_145 : f32 to vector<5x1xf32>
    %307 = arith.divf %305, %306 : vector<5x1xf32>
    %cst_146 = arith.constant 9.99999997E-7 : f32
    %308 = vector.broadcast %cst_146 : f32 to vector<5x1xf32>
    %309 = arith.addf %307, %308 : vector<5x1xf32>
    %310 = math.rsqrt %309 : vector<5x1xf32>
    %311 = vector.broadcast %310 : vector<5x1xf32> to vector<5x32xf32>
    %312 = arith.mulf %302, %311 : vector<5x32xf32>
    %313 = vector.broadcast %294 : vector<1x32xf32> to vector<5x32xf32>
    %314 = arith.mulf %312, %313 : vector<5x32xf32>
    %315 = vector.broadcast %296 : vector<1x32xf32> to vector<5x32xf32>
    %316 = arith.addf %314, %315 : vector<5x32xf32>
    %c1_147 = arith.constant 1 : index
    %c0_148 = arith.constant 0 : index
    %c0_149 = arith.constant 0 : index
    %317 = vector.load %arg14[%c1_147, %c0_148, %c0_149] : memref<4x32x128xf32, #tpu.memory_space<vmem>>, vector<1x32x128xf32>
    %318 = vector.shape_cast %317 : vector<1x32x128xf32> to vector<32x128xf32>
    %cst_150 = arith.constant dense<0.000000e+00> : vector<5x128xf32>
    %319 = tpu.matmul %316, %318, %cst_150 {dimension_numbers = #tpu.dot_dimension_numbers<[1], [0], [0], [1], [0, 0, 1, 1], [], []>} : vector<5x32xf32>, vector<32x128xf32>, vector<5x128xf32> -> vector<5x128xf32>
    %c1_151 = arith.constant 1 : index
    %c0_152 = arith.constant 0 : index
    %c0_153 = arith.constant 0 : index
    %320 = vector.load %arg15[%c1_151, %c0_152, %c0_153] : memref<4x1x128xf32, #tpu.memory_space<vmem>>, vector<1x1x128xf32>
    %321 = vector.shape_cast %320 : vector<1x1x128xf32> to vector<1x128xf32>
    %322 = vector.broadcast %321 : vector<1x128xf32> to vector<5x128xf32>
    %323 = arith.addf %319, %322 : vector<5x128xf32>
    %cst_154 = arith.constant 5.000000e-01 : f32
    %324 = vector.broadcast %cst_154 : f32 to vector<5x128xf32>
    %325 = arith.mulf %324, %323 : vector<5x128xf32>
    %cst_155 = arith.constant 4.471500e-02 : f32
    %326 = vector.broadcast %cst_155 : f32 to vector<5x128xf32>
    %327 = arith.mulf %326, %323 : vector<5x128xf32>
    %328 = arith.mulf %327, %323 : vector<5x128xf32>
    %329 = arith.mulf %328, %323 : vector<5x128xf32>
    %330 = arith.addf %323, %329 : vector<5x128xf32>
    %cst_156 = arith.constant 0.797884583 : f32
    %331 = vector.broadcast %cst_156 : f32 to vector<5x128xf32>
    %332 = arith.mulf %331, %330 : vector<5x128xf32>
    %333 = math.tanh %332 : vector<5x128xf32>
    %cst_157 = arith.constant 1.000000e+00 : f32
    %334 = vector.broadcast %cst_157 : f32 to vector<5x128xf32>
    %335 = arith.addf %334, %333 : vector<5x128xf32>
    %336 = arith.mulf %325, %335 : vector<5x128xf32>
    %c1_158 = arith.constant 1 : index
    %c0_159 = arith.constant 0 : index
    %c0_160 = arith.constant 0 : index
    %337 = vector.load %arg16[%c1_158, %c0_159, %c0_160] : memref<4x128x32xf32, #tpu.memory_space<vmem>>, vector<1x128x32xf32>
    %338 = vector.shape_cast %337 : vector<1x128x32xf32> to vector<128x32xf32>
    %cst_161 = arith.constant dense<0.000000e+00> : vector<5x32xf32>
    %339 = tpu.matmul %336, %338, %cst_161 {dimension_numbers = #tpu.dot_dimension_numbers<[1], [0], [0], [1], [0, 0, 1, 1], [], []>} : vector<5x128xf32>, vector<128x32xf32>, vector<5x32xf32> -> vector<5x32xf32>
    %340 = arith.addf %292, %339 : vector<5x32xf32>
    %c1_162 = arith.constant 1 : index
    %c0_163 = arith.constant 0 : index
    %c0_164 = arith.constant 0 : index
    %341 = vector.load %arg17[%c1_162, %c0_163, %c0_164] : memref<4x1x32xf32, #tpu.memory_space<vmem>>, vector<1x1x32xf32>
    %342 = vector.shape_cast %341 : vector<1x1x32xf32> to vector<1x32xf32>
    %343 = vector.broadcast %342 : vector<1x32xf32> to vector<5x32xf32>
    %344 = arith.addf %340, %343 : vector<5x32xf32>
    %345 = vector.extract_strided_slice %344 {offsets = [1, 0], sizes = [4, 32], strides = [1, 1]} : vector<5x32xf32> to vector<4x32xf32>
    %346 = vector.extract_strided_slice %344 {offsets = [0, 0], sizes = [1, 32], strides = [1, 1]} : vector<5x32xf32> to vector<1x32xf32>
    %347 = vector.broadcast %346 : vector<1x32xf32> to vector<4x32xf32>
    %348 = arith.addf %345, %347 : vector<4x32xf32>
    %c2 = arith.constant 2 : index
    %c0_165 = arith.constant 0 : index
    %c0_166 = arith.constant 0 : index
    %c0_167 = arith.constant 0 : index
    %349 = vector.load %arg18[%c2, %c0_165, %c0_166, %c0_167] : memref<5x1x4x32xf32, #tpu.memory_space<vmem>>, vector<1x1x4x32xf32>
    %350 = vector.shape_cast %349 : vector<1x1x4x32xf32> to vector<4x32xf32>
    %351 = vector.shape_cast %348 : vector<4x32xf32> to vector<1x1x4x32xf32>
    tpu.vector_store %arg18[%c2, %c0_165, %c0_166, %c0_167], %351 {strides = array<i32>} : memref<5x1x4x32xf32, #tpu.memory_space<vmem>>, vector<1x1x4x32xf32>,
    %c2_168 = arith.constant 2 : index
    %c0_169 = arith.constant 0 : index
    %c0_170 = arith.constant 0 : index
    %352 = vector.load %arg6[%c2_168, %c0_169, %c0_170] : memref<4x1x32xf32, #tpu.memory_space<vmem>>, vector<1x1x32xf32>
    %353 = vector.shape_cast %352 : vector<1x1x32xf32> to vector<1x32xf32>
    %c2_171 = arith.constant 2 : index
    %c0_172 = arith.constant 0 : index
    %c0_173 = arith.constant 0 : index
    %354 = vector.load %arg7[%c2_171, %c0_172, %c0_173] : memref<4x1x32xf32, #tpu.memory_space<vmem>>, vector<1x1x32xf32>
    %355 = vector.shape_cast %354 : vector<1x1x32xf32> to vector<1x32xf32>
    %cst_174 = arith.constant dense<0.000000e+00> : vector<5xf32>
    %356 = vector.multi_reduction <add>, %344, %cst_174 [1] : vector<5x32xf32> to vector<5xf32>
    %357 = vector.shape_cast %356 : vector<5xf32> to vector<5x1xf32>
    %cst_175 = arith.constant 3.200000e+01 : f32
    %358 = vector.broadcast %cst_175 : f32 to vector<5x1xf32>
    %359 = arith.divf %357, %358 : vector<5x1xf32>
    %360 = vector.broadcast %359 : vector<5x1xf32> to vector<5x32xf32>
    %361 = arith.subf %344, %360 : vector<5x32xf32>
    %362 = arith.mulf %361, %361 : vector<5x32xf32>
    %cst_176 = arith.constant dense<0.000000e+00> : vector<5xf32>
    %363 = vector.multi_reduction <add>, %362, %cst_176 [1] : vector<5x32xf32> to vector<5xf32>
    %364 = vector.shape_cast %363 : vector<5xf32> to vector<5x1xf32>
    %cst_177 = arith.constant 3.200000e+01 : f32
    %365 = vector.broadcast %cst_177 : f32 to vector<5x1xf32>
    %366 = arith.divf %364, %365 : vector<5x1xf32>
    %cst_178 = arith.constant 9.99999997E-7 : f32
    %367 = vector.broadcast %cst_178 : f32 to vector<5x1xf32>
    %368 = arith.addf %366, %367 : vector<5x1xf32>
    %369 = math.rsqrt %368 : vector<5x1xf32>
    %370 = vector.broadcast %369 : vector<5x1xf32> to vector<5x32xf32>
    %371 = arith.mulf %361, %370 : vector<5x32xf32>
    %372 = vector.broadcast %353 : vector<1x32xf32> to vector<5x32xf32>
    %373 = arith.mulf %371, %372 : vector<5x32xf32>
    %374 = vector.broadcast %355 : vector<1x32xf32> to vector<5x32xf32>
    %375 = arith.addf %373, %374 : vector<5x32xf32>
    %c2_179 = arith.constant 2 : index
    %c0_180 = arith.constant 0 : index
    %c0_181 = arith.constant 0 : index
    %376 = vector.load %arg8[%c2_179, %c0_180, %c0_181] : memref<4x32x96xf32, #tpu.memory_space<vmem>>, vector<1x32x96xf32>
    %377 = vector.shape_cast %376 : vector<1x32x96xf32> to vector<32x96xf32>
    %cst_182 = arith.constant dense<0.000000e+00> : vector<5x96xf32>
    %378 = tpu.matmul %375, %377, %cst_182 {dimension_numbers = #tpu.dot_dimension_numbers<[1], [0], [0], [1], [0, 0, 1, 1], [], []>} : vector<5x32xf32>, vector<32x96xf32>, vector<5x96xf32> -> vector<5x96xf32>
    %c2_183 = arith.constant 2 : index
    %c0_184 = arith.constant 0 : index
    %c0_185 = arith.constant 0 : index
    %379 = vector.load %arg9[%c2_183, %c0_184, %c0_185] : memref<4x1x96xf32, #tpu.memory_space<vmem>>, vector<1x1x96xf32>
    %380 = vector.shape_cast %379 : vector<1x1x96xf32> to vector<1x96xf32>
    %381 = vector.broadcast %380 : vector<1x96xf32> to vector<5x96xf32>
    %382 = arith.addf %378, %381 : vector<5x96xf32>
    %383 = vector.extract_strided_slice %382 {offsets = [0, 0], sizes = [5, 8], strides = [1, 1]} : vector<5x96xf32> to vector<5x8xf32>
    %384 = vector.extract_strided_slice %382 {offsets = [0, 32], sizes = [5, 8], strides = [1, 1]} : vector<5x96xf32> to vector<5x8xf32>
    %385 = vector.extract_strided_slice %382 {offsets = [0, 64], sizes = [5, 8], strides = [1, 1]} : vector<5x96xf32> to vector<5x8xf32>
    %cst_186 = arith.constant dense<0.000000e+00> : vector<5x5xf32>
    %386 = tpu.matmul %383, %384, %cst_186 {dimension_numbers = #tpu.dot_dimension_numbers<[1], [1], [0], [0], [0, 0, 1, 0], [], []>} : vector<5x8xf32>, vector<5x8xf32>, vector<5x5xf32> -> vector<5x5xf32>
    %cst_187 = arith.constant 0.353553385 : f32
    %387 = vector.broadcast %cst_187 : f32 to vector<5x5xf32>
    %388 = arith.mulf %386, %387 : vector<5x5xf32>
    %cst_188 = arith.constant dense<0xFF800000> : vector<5xf32>
    %389 = vector.multi_reduction <maximumf>, %388, %cst_188 [1] : vector<5x5xf32> to vector<5xf32>
    %390 = vector.shape_cast %389 : vector<5xf32> to vector<5x1xf32>
    %391 = vector.broadcast %390 : vector<5x1xf32> to vector<5x5xf32>
    %392 = arith.subf %388, %391 : vector<5x5xf32>
    %393 = math.exp %392 : vector<5x5xf32>
    %cst_189 = arith.constant dense<0.000000e+00> : vector<5xf32>
    %394 = vector.multi_reduction <add>, %393, %cst_189 [1] : vector<5x5xf32> to vector<5xf32>
    %395 = vector.shape_cast %394 : vector<5xf32> to vector<5x1xf32>
    %396 = tpu.reciprocal %395 {approx = true} : vector<5x1xf32> -> vector<5x1xf32>
    %397 = vector.broadcast %396 : vector<5x1xf32> to vector<5x5xf32>
    %398 = arith.mulf %393, %397 : vector<5x5xf32>
    %cst_190 = arith.constant dense<0.000000e+00> : vector<5x8xf32>
    %399 = tpu.matmul %398, %385, %cst_190 {dimension_numbers = #tpu.dot_dimension_numbers<[1], [0], [0], [1], [0, 0, 1, 1], [], []>} : vector<5x5xf32>, vector<5x8xf32>, vector<5x8xf32> -> vector<5x8xf32>
    %400 = vector.extract_strided_slice %382 {offsets = [0, 8], sizes = [5, 8], strides = [1, 1]} : vector<5x96xf32> to vector<5x8xf32>
    %401 = vector.extract_strided_slice %382 {offsets = [0, 40], sizes = [5, 8], strides = [1, 1]} : vector<5x96xf32> to vector<5x8xf32>
    %402 = vector.extract_strided_slice %382 {offsets = [0, 72], sizes = [5, 8], strides = [1, 1]} : vector<5x96xf32> to vector<5x8xf32>
    %cst_191 = arith.constant dense<0.000000e+00> : vector<5x5xf32>
    %403 = tpu.matmul %400, %401, %cst_191 {dimension_numbers = #tpu.dot_dimension_numbers<[1], [1], [0], [0], [0, 0, 1, 0], [], []>} : vector<5x8xf32>, vector<5x8xf32>, vector<5x5xf32> -> vector<5x5xf32>
    %cst_192 = arith.constant 0.353553385 : f32
    %404 = vector.broadcast %cst_192 : f32 to vector<5x5xf32>
    %405 = arith.mulf %403, %404 : vector<5x5xf32>
    %cst_193 = arith.constant dense<0xFF800000> : vector<5xf32>
    %406 = vector.multi_reduction <maximumf>, %405, %cst_193 [1] : vector<5x5xf32> to vector<5xf32>
    %407 = vector.shape_cast %406 : vector<5xf32> to vector<5x1xf32>
    %408 = vector.broadcast %407 : vector<5x1xf32> to vector<5x5xf32>
    %409 = arith.subf %405, %408 : vector<5x5xf32>
    %410 = math.exp %409 : vector<5x5xf32>
    %cst_194 = arith.constant dense<0.000000e+00> : vector<5xf32>
    %411 = vector.multi_reduction <add>, %410, %cst_194 [1] : vector<5x5xf32> to vector<5xf32>
    %412 = vector.shape_cast %411 : vector<5xf32> to vector<5x1xf32>
    %413 = tpu.reciprocal %412 {approx = true} : vector<5x1xf32> -> vector<5x1xf32>
    %414 = vector.broadcast %413 : vector<5x1xf32> to vector<5x5xf32>
    %415 = arith.mulf %410, %414 : vector<5x5xf32>
    %cst_195 = arith.constant dense<0.000000e+00> : vector<5x8xf32>
    %416 = tpu.matmul %415, %402, %cst_195 {dimension_numbers = #tpu.dot_dimension_numbers<[1], [0], [0], [1], [0, 0, 1, 1], [], []>} : vector<5x5xf32>, vector<5x8xf32>, vector<5x8xf32> -> vector<5x8xf32>
    %417 = vector.extract_strided_slice %382 {offsets = [0, 16], sizes = [5, 8], strides = [1, 1]} : vector<5x96xf32> to vector<5x8xf32>
    %418 = vector.extract_strided_slice %382 {offsets = [0, 48], sizes = [5, 8], strides = [1, 1]} : vector<5x96xf32> to vector<5x8xf32>
    %419 = vector.extract_strided_slice %382 {offsets = [0, 80], sizes = [5, 8], strides = [1, 1]} : vector<5x96xf32> to vector<5x8xf32>
    %cst_196 = arith.constant dense<0.000000e+00> : vector<5x5xf32>
    %420 = tpu.matmul %417, %418, %cst_196 {dimension_numbers = #tpu.dot_dimension_numbers<[1], [1], [0], [0], [0, 0, 1, 0], [], []>} : vector<5x8xf32>, vector<5x8xf32>, vector<5x5xf32> -> vector<5x5xf32>
    %cst_197 = arith.constant 0.353553385 : f32
    %421 = vector.broadcast %cst_197 : f32 to vector<5x5xf32>
    %422 = arith.mulf %420, %421 : vector<5x5xf32>
    %cst_198 = arith.constant dense<0xFF800000> : vector<5xf32>
    %423 = vector.multi_reduction <maximumf>, %422, %cst_198 [1] : vector<5x5xf32> to vector<5xf32>
    %424 = vector.shape_cast %423 : vector<5xf32> to vector<5x1xf32>
    %425 = vector.broadcast %424 : vector<5x1xf32> to vector<5x5xf32>
    %426 = arith.subf %422, %425 : vector<5x5xf32>
    %427 = math.exp %426 : vector<5x5xf32>
    %cst_199 = arith.constant dense<0.000000e+00> : vector<5xf32>
    %428 = vector.multi_reduction <add>, %427, %cst_199 [1] : vector<5x5xf32> to vector<5xf32>
    %429 = vector.shape_cast %428 : vector<5xf32> to vector<5x1xf32>
    %430 = tpu.reciprocal %429 {approx = true} : vector<5x1xf32> -> vector<5x1xf32>
    %431 = vector.broadcast %430 : vector<5x1xf32> to vector<5x5xf32>
    %432 = arith.mulf %427, %431 : vector<5x5xf32>
    %cst_200 = arith.constant dense<0.000000e+00> : vector<5x8xf32>
    %433 = tpu.matmul %432, %419, %cst_200 {dimension_numbers = #tpu.dot_dimension_numbers<[1], [0], [0], [1], [0, 0, 1, 1], [], []>} : vector<5x5xf32>, vector<5x8xf32>, vector<5x8xf32> -> vector<5x8xf32>
    %434 = vector.extract_strided_slice %382 {offsets = [0, 24], sizes = [5, 8], strides = [1, 1]} : vector<5x96xf32> to vector<5x8xf32>
    %435 = vector.extract_strided_slice %382 {offsets = [0, 56], sizes = [5, 8], strides = [1, 1]} : vector<5x96xf32> to vector<5x8xf32>
    %436 = vector.extract_strided_slice %382 {offsets = [0, 88], sizes = [5, 8], strides = [1, 1]} : vector<5x96xf32> to vector<5x8xf32>
    %cst_201 = arith.constant dense<0.000000e+00> : vector<5x5xf32>
    %437 = tpu.matmul %434, %435, %cst_201 {dimension_numbers = #tpu.dot_dimension_numbers<[1], [1], [0], [0], [0, 0, 1, 0], [], []>} : vector<5x8xf32>, vector<5x8xf32>, vector<5x5xf32> -> vector<5x5xf32>
    %cst_202 = arith.constant 0.353553385 : f32
    %438 = vector.broadcast %cst_202 : f32 to vector<5x5xf32>
    %439 = arith.mulf %437, %438 : vector<5x5xf32>
    %cst_203 = arith.constant dense<0xFF800000> : vector<5xf32>
    %440 = vector.multi_reduction <maximumf>, %439, %cst_203 [1] : vector<5x5xf32> to vector<5xf32>
    %441 = vector.shape_cast %440 : vector<5xf32> to vector<5x1xf32>
    %442 = vector.broadcast %441 : vector<5x1xf32> to vector<5x5xf32>
    %443 = arith.subf %439, %442 : vector<5x5xf32>
    %444 = math.exp %443 : vector<5x5xf32>
    %cst_204 = arith.constant dense<0.000000e+00> : vector<5xf32>
    %445 = vector.multi_reduction <add>, %444, %cst_204 [1] : vector<5x5xf32> to vector<5xf32>
    %446 = vector.shape_cast %445 : vector<5xf32> to vector<5x1xf32>
    %447 = tpu.reciprocal %446 {approx = true} : vector<5x1xf32> -> vector<5x1xf32>
    %448 = vector.broadcast %447 : vector<5x1xf32> to vector<5x5xf32>
    %449 = arith.mulf %444, %448 : vector<5x5xf32>
    %cst_205 = arith.constant dense<0.000000e+00> : vector<5x8xf32>
    %450 = tpu.matmul %449, %436, %cst_205 {dimension_numbers = #tpu.dot_dimension_numbers<[1], [0], [0], [1], [0, 0, 1, 1], [], []>} : vector<5x5xf32>, vector<5x8xf32>, vector<5x8xf32> -> vector<5x8xf32>
    %451 = tpu.concatenate %399, %416, %433, %450 in 1 : vector<5x8xf32>, vector<5x8xf32>, vector<5x8xf32>, vector<5x8xf32> -> vector<5x32xf32>
    %c2_206 = arith.constant 2 : index
    %c0_207 = arith.constant 0 : index
    %c0_208 = arith.constant 0 : index
    %452 = vector.load %arg10[%c2_206, %c0_207, %c0_208] : memref<4x32x32xf32, #tpu.memory_space<vmem>>, vector<1x32x32xf32>
    %453 = vector.shape_cast %452 : vector<1x32x32xf32> to vector<32x32xf32>
    %cst_209 = arith.constant dense<0.000000e+00> : vector<5x32xf32>
    %454 = tpu.matmul %451, %453, %cst_209 {dimension_numbers = #tpu.dot_dimension_numbers<[1], [0], [0], [1], [0, 0, 1, 1], [], []>} : vector<5x32xf32>, vector<32x32xf32>, vector<5x32xf32> -> vector<5x32xf32>
    %455 = arith.addf %344, %454 : vector<5x32xf32>
    %c2_210 = arith.constant 2 : index
    %c0_211 = arith.constant 0 : index
    %c0_212 = arith.constant 0 : index
    %456 = vector.load %arg11[%c2_210, %c0_211, %c0_212] : memref<4x1x32xf32, #tpu.memory_space<vmem>>, vector<1x1x32xf32>
    %457 = vector.shape_cast %456 : vector<1x1x32xf32> to vector<1x32xf32>
    %458 = vector.broadcast %457 : vector<1x32xf32> to vector<5x32xf32>
    %459 = arith.addf %455, %458 : vector<5x32xf32>
    %c2_213 = arith.constant 2 : index
    %c0_214 = arith.constant 0 : index
    %c0_215 = arith.constant 0 : index
    %460 = vector.load %arg12[%c2_213, %c0_214, %c0_215] : memref<4x1x32xf32, #tpu.memory_space<vmem>>, vector<1x1x32xf32>
    %461 = vector.shape_cast %460 : vector<1x1x32xf32> to vector<1x32xf32>
    %c2_216 = arith.constant 2 : index
    %c0_217 = arith.constant 0 : index
    %c0_218 = arith.constant 0 : index
    %462 = vector.load %arg13[%c2_216, %c0_217, %c0_218] : memref<4x1x32xf32, #tpu.memory_space<vmem>>, vector<1x1x32xf32>
    %463 = vector.shape_cast %462 : vector<1x1x32xf32> to vector<1x32xf32>
    %cst_219 = arith.constant dense<0.000000e+00> : vector<5xf32>
    %464 = vector.multi_reduction <add>, %459, %cst_219 [1] : vector<5x32xf32> to vector<5xf32>
    %465 = vector.shape_cast %464 : vector<5xf32> to vector<5x1xf32>
    %cst_220 = arith.constant 3.200000e+01 : f32
    %466 = vector.broadcast %cst_220 : f32 to vector<5x1xf32>
    %467 = arith.divf %465, %466 : vector<5x1xf32>
    %468 = vector.broadcast %467 : vector<5x1xf32> to vector<5x32xf32>
    %469 = arith.subf %459, %468 : vector<5x32xf32>
    %470 = arith.mulf %469, %469 : vector<5x32xf32>
    %cst_221 = arith.constant dense<0.000000e+00> : vector<5xf32>
    %471 = vector.multi_reduction <add>, %470, %cst_221 [1] : vector<5x32xf32> to vector<5xf32>
    %472 = vector.shape_cast %471 : vector<5xf32> to vector<5x1xf32>
    %cst_222 = arith.constant 3.200000e+01 : f32
    %473 = vector.broadcast %cst_222 : f32 to vector<5x1xf32>
    %474 = arith.divf %472, %473 : vector<5x1xf32>
    %cst_223 = arith.constant 9.99999997E-7 : f32
    %475 = vector.broadcast %cst_223 : f32 to vector<5x1xf32>
    %476 = arith.addf %474, %475 : vector<5x1xf32>
    %477 = math.rsqrt %476 : vector<5x1xf32>
    %478 = vector.broadcast %477 : vector<5x1xf32> to vector<5x32xf32>
    %479 = arith.mulf %469, %478 : vector<5x32xf32>
    %480 = vector.broadcast %461 : vector<1x32xf32> to vector<5x32xf32>
    %481 = arith.mulf %479, %480 : vector<5x32xf32>
    %482 = vector.broadcast %463 : vector<1x32xf32> to vector<5x32xf32>
    %483 = arith.addf %481, %482 : vector<5x32xf32>
    %c2_224 = arith.constant 2 : index
    %c0_225 = arith.constant 0 : index
    %c0_226 = arith.constant 0 : index
    %484 = vector.load %arg14[%c2_224, %c0_225, %c0_226] : memref<4x32x128xf32, #tpu.memory_space<vmem>>, vector<1x32x128xf32>
    %485 = vector.shape_cast %484 : vector<1x32x128xf32> to vector<32x128xf32>
    %cst_227 = arith.constant dense<0.000000e+00> : vector<5x128xf32>
    %486 = tpu.matmul %483, %485, %cst_227 {dimension_numbers = #tpu.dot_dimension_numbers<[1], [0], [0], [1], [0, 0, 1, 1], [], []>} : vector<5x32xf32>, vector<32x128xf32>, vector<5x128xf32> -> vector<5x128xf32>
    %c2_228 = arith.constant 2 : index
    %c0_229 = arith.constant 0 : index
    %c0_230 = arith.constant 0 : index
    %487 = vector.load %arg15[%c2_228, %c0_229, %c0_230] : memref<4x1x128xf32, #tpu.memory_space<vmem>>, vector<1x1x128xf32>
    %488 = vector.shape_cast %487 : vector<1x1x128xf32> to vector<1x128xf32>
    %489 = vector.broadcast %488 : vector<1x128xf32> to vector<5x128xf32>
    %490 = arith.addf %486, %489 : vector<5x128xf32>
    %cst_231 = arith.constant 5.000000e-01 : f32
    %491 = vector.broadcast %cst_231 : f32 to vector<5x128xf32>
    %492 = arith.mulf %491, %490 : vector<5x128xf32>
    %cst_232 = arith.constant 4.471500e-02 : f32
    %493 = vector.broadcast %cst_232 : f32 to vector<5x128xf32>
    %494 = arith.mulf %493, %490 : vector<5x128xf32>
    %495 = arith.mulf %494, %490 : vector<5x128xf32>
    %496 = arith.mulf %495, %490 : vector<5x128xf32>
    %497 = arith.addf %490, %496 : vector<5x128xf32>
    %cst_233 = arith.constant 0.797884583 : f32
    %498 = vector.broadcast %cst_233 : f32 to vector<5x128xf32>
    %499 = arith.mulf %498, %497 : vector<5x128xf32>
    %500 = math.tanh %499 : vector<5x128xf32>
    %cst_234 = arith.constant 1.000000e+00 : f32
    %501 = vector.broadcast %cst_234 : f32 to vector<5x128xf32>
    %502 = arith.addf %501, %500 : vector<5x128xf32>
    %503 = arith.mulf %492, %502 : vector<5x128xf32>
    %c2_235 = arith.constant 2 : index
    %c0_236 = arith.constant 0 : index
    %c0_237 = arith.constant 0 : index
    %504 = vector.load %arg16[%c2_235, %c0_236, %c0_237] : memref<4x128x32xf32, #tpu.memory_space<vmem>>, vector<1x128x32xf32>
    %505 = vector.shape_cast %504 : vector<1x128x32xf32> to vector<128x32xf32>
    %cst_238 = arith.constant dense<0.000000e+00> : vector<5x32xf32>
    %506 = tpu.matmul %503, %505, %cst_238 {dimension_numbers = #tpu.dot_dimension_numbers<[1], [0], [0], [1], [0, 0, 1, 1], [], []>} : vector<5x128xf32>, vector<128x32xf32>, vector<5x32xf32> -> vector<5x32xf32>
    %507 = arith.addf %459, %506 : vector<5x32xf32>
    %c2_239 = arith.constant 2 : index
    %c0_240 = arith.constant 0 : index
    %c0_241 = arith.constant 0 : index
    %508 = vector.load %arg17[%c2_239, %c0_240, %c0_241] : memref<4x1x32xf32, #tpu.memory_space<vmem>>, vector<1x1x32xf32>
    %509 = vector.shape_cast %508 : vector<1x1x32xf32> to vector<1x32xf32>
    %510 = vector.broadcast %509 : vector<1x32xf32> to vector<5x32xf32>
    %511 = arith.addf %507, %510 : vector<5x32xf32>
    %512 = vector.extract_strided_slice %511 {offsets = [1, 0], sizes = [4, 32], strides = [1, 1]} : vector<5x32xf32> to vector<4x32xf32>
    %513 = vector.extract_strided_slice %511 {offsets = [0, 0], sizes = [1, 32], strides = [1, 1]} : vector<5x32xf32> to vector<1x32xf32>
    %514 = vector.broadcast %513 : vector<1x32xf32> to vector<4x32xf32>
    %515 = arith.addf %512, %514 : vector<4x32xf32>
    %c3 = arith.constant 3 : index
    %c0_242 = arith.constant 0 : index
    %c0_243 = arith.constant 0 : index
    %c0_244 = arith.constant 0 : index
    %516 = vector.load %arg18[%c3, %c0_242, %c0_243, %c0_244] : memref<5x1x4x32xf32, #tpu.memory_space<vmem>>, vector<1x1x4x32xf32>
    %517 = vector.shape_cast %516 : vector<1x1x4x32xf32> to vector<4x32xf32>
    %518 = vector.shape_cast %515 : vector<4x32xf32> to vector<1x1x4x32xf32>
    tpu.vector_store %arg18[%c3, %c0_242, %c0_243, %c0_244], %518 {strides = array<i32>} : memref<5x1x4x32xf32, #tpu.memory_space<vmem>>, vector<1x1x4x32xf32>,
    %c3_245 = arith.constant 3 : index
    %c0_246 = arith.constant 0 : index
    %c0_247 = arith.constant 0 : index
    %519 = vector.load %arg6[%c3_245, %c0_246, %c0_247] : memref<4x1x32xf32, #tpu.memory_space<vmem>>, vector<1x1x32xf32>
    %520 = vector.shape_cast %519 : vector<1x1x32xf32> to vector<1x32xf32>
    %c3_248 = arith.constant 3 : index
    %c0_249 = arith.constant 0 : index
    %c0_250 = arith.constant 0 : index
    %521 = vector.load %arg7[%c3_248, %c0_249, %c0_250] : memref<4x1x32xf32, #tpu.memory_space<vmem>>, vector<1x1x32xf32>
    %522 = vector.shape_cast %521 : vector<1x1x32xf32> to vector<1x32xf32>
    %cst_251 = arith.constant dense<0.000000e+00> : vector<5xf32>
    %523 = vector.multi_reduction <add>, %511, %cst_251 [1] : vector<5x32xf32> to vector<5xf32>
    %524 = vector.shape_cast %523 : vector<5xf32> to vector<5x1xf32>
    %cst_252 = arith.constant 3.200000e+01 : f32
    %525 = vector.broadcast %cst_252 : f32 to vector<5x1xf32>
    %526 = arith.divf %524, %525 : vector<5x1xf32>
    %527 = vector.broadcast %526 : vector<5x1xf32> to vector<5x32xf32>
    %528 = arith.subf %511, %527 : vector<5x32xf32>
    %529 = arith.mulf %528, %528 : vector<5x32xf32>
    %cst_253 = arith.constant dense<0.000000e+00> : vector<5xf32>
    %530 = vector.multi_reduction <add>, %529, %cst_253 [1] : vector<5x32xf32> to vector<5xf32>
    %531 = vector.shape_cast %530 : vector<5xf32> to vector<5x1xf32>
    %cst_254 = arith.constant 3.200000e+01 : f32
    %532 = vector.broadcast %cst_254 : f32 to vector<5x1xf32>
    %533 = arith.divf %531, %532 : vector<5x1xf32>
    %cst_255 = arith.constant 9.99999997E-7 : f32
    %534 = vector.broadcast %cst_255 : f32 to vector<5x1xf32>
    %535 = arith.addf %533, %534 : vector<5x1xf32>
    %536 = math.rsqrt %535 : vector<5x1xf32>
    %537 = vector.broadcast %536 : vector<5x1xf32> to vector<5x32xf32>
    %538 = arith.mulf %528, %537 : vector<5x32xf32>
    %539 = vector.broadcast %520 : vector<1x32xf32> to vector<5x32xf32>
    %540 = arith.mulf %538, %539 : vector<5x32xf32>
    %541 = vector.broadcast %522 : vector<1x32xf32> to vector<5x32xf32>
    %542 = arith.addf %540, %541 : vector<5x32xf32>
    %c3_256 = arith.constant 3 : index
    %c0_257 = arith.constant 0 : index
    %c0_258 = arith.constant 0 : index
    %543 = vector.load %arg8[%c3_256, %c0_257, %c0_258] : memref<4x32x96xf32, #tpu.memory_space<vmem>>, vector<1x32x96xf32>
    %544 = vector.shape_cast %543 : vector<1x32x96xf32> to vector<32x96xf32>
    %cst_259 = arith.constant dense<0.000000e+00> : vector<5x96xf32>
    %545 = tpu.matmul %542, %544, %cst_259 {dimension_numbers = #tpu.dot_dimension_numbers<[1], [0], [0], [1], [0, 0, 1, 1], [], []>} : vector<5x32xf32>, vector<32x96xf32>, vector<5x96xf32> -> vector<5x96xf32>
    %c3_260 = arith.constant 3 : index
    %c0_261 = arith.constant 0 : index
    %c0_262 = arith.constant 0 : index
    %546 = vector.load %arg9[%c3_260, %c0_261, %c0_262] : memref<4x1x96xf32, #tpu.memory_space<vmem>>, vector<1x1x96xf32>
    %547 = vector.shape_cast %546 : vector<1x1x96xf32> to vector<1x96xf32>
    %548 = vector.broadcast %547 : vector<1x96xf32> to vector<5x96xf32>
    %549 = arith.addf %545, %548 : vector<5x96xf32>
    %550 = vector.extract_strided_slice %549 {offsets = [0, 0], sizes = [5, 8], strides = [1, 1]} : vector<5x96xf32> to vector<5x8xf32>
    %551 = vector.extract_strided_slice %549 {offsets = [0, 32], sizes = [5, 8], strides = [1, 1]} : vector<5x96xf32> to vector<5x8xf32>
    %552 = vector.extract_strided_slice %549 {offsets = [0, 64], sizes = [5, 8], strides = [1, 1]} : vector<5x96xf32> to vector<5x8xf32>
    %cst_263 = arith.constant dense<0.000000e+00> : vector<5x5xf32>
    %553 = tpu.matmul %550, %551, %cst_263 {dimension_numbers = #tpu.dot_dimension_numbers<[1], [1], [0], [0], [0, 0, 1, 0], [], []>} : vector<5x8xf32>, vector<5x8xf32>, vector<5x5xf32> -> vector<5x5xf32>
    %cst_264 = arith.constant 0.353553385 : f32
    %554 = vector.broadcast %cst_264 : f32 to vector<5x5xf32>
    %555 = arith.mulf %553, %554 : vector<5x5xf32>
    %cst_265 = arith.constant dense<0xFF800000> : vector<5xf32>
    %556 = vector.multi_reduction <maximumf>, %555, %cst_265 [1] : vector<5x5xf32> to vector<5xf32>
    %557 = vector.shape_cast %556 : vector<5xf32> to vector<5x1xf32>
    %558 = vector.broadcast %557 : vector<5x1xf32> to vector<5x5xf32>
    %559 = arith.subf %555, %558 : vector<5x5xf32>
    %560 = math.exp %559 : vector<5x5xf32>
    %cst_266 = arith.constant dense<0.000000e+00> : vector<5xf32>
    %561 = vector.multi_reduction <add>, %560, %cst_266 [1] : vector<5x5xf32> to vector<5xf32>
    %562 = vector.shape_cast %561 : vector<5xf32> to vector<5x1xf32>
    %563 = tpu.reciprocal %562 {approx = true} : vector<5x1xf32> -> vector<5x1xf32>
    %564 = vector.broadcast %563 : vector<5x1xf32> to vector<5x5xf32>
    %565 = arith.mulf %560, %564 : vector<5x5xf32>
    %cst_267 = arith.constant dense<0.000000e+00> : vector<5x8xf32>
    %566 = tpu.matmul %565, %552, %cst_267 {dimension_numbers = #tpu.dot_dimension_numbers<[1], [0], [0], [1], [0, 0, 1, 1], [], []>} : vector<5x5xf32>, vector<5x8xf32>, vector<5x8xf32> -> vector<5x8xf32>
    %567 = vector.extract_strided_slice %549 {offsets = [0, 8], sizes = [5, 8], strides = [1, 1]} : vector<5x96xf32> to vector<5x8xf32>
    %568 = vector.extract_strided_slice %549 {offsets = [0, 40], sizes = [5, 8], strides = [1, 1]} : vector<5x96xf32> to vector<5x8xf32>
    %569 = vector.extract_strided_slice %549 {offsets = [0, 72], sizes = [5, 8], strides = [1, 1]} : vector<5x96xf32> to vector<5x8xf32>
    %cst_268 = arith.constant dense<0.000000e+00> : vector<5x5xf32>
    %570 = tpu.matmul %567, %568, %cst_268 {dimension_numbers = #tpu.dot_dimension_numbers<[1], [1], [0], [0], [0, 0, 1, 0], [], []>} : vector<5x8xf32>, vector<5x8xf32>, vector<5x5xf32> -> vector<5x5xf32>
    %cst_269 = arith.constant 0.353553385 : f32
    %571 = vector.broadcast %cst_269 : f32 to vector<5x5xf32>
    %572 = arith.mulf %570, %571 : vector<5x5xf32>
    %cst_270 = arith.constant dense<0xFF800000> : vector<5xf32>
    %573 = vector.multi_reduction <maximumf>, %572, %cst_270 [1] : vector<5x5xf32> to vector<5xf32>
    %574 = vector.shape_cast %573 : vector<5xf32> to vector<5x1xf32>
    %575 = vector.broadcast %574 : vector<5x1xf32> to vector<5x5xf32>
    %576 = arith.subf %572, %575 : vector<5x5xf32>
    %577 = math.exp %576 : vector<5x5xf32>
    %cst_271 = arith.constant dense<0.000000e+00> : vector<5xf32>
    %578 = vector.multi_reduction <add>, %577, %cst_271 [1] : vector<5x5xf32> to vector<5xf32>
    %579 = vector.shape_cast %578 : vector<5xf32> to vector<5x1xf32>
    %580 = tpu.reciprocal %579 {approx = true} : vector<5x1xf32> -> vector<5x1xf32>
    %581 = vector.broadcast %580 : vector<5x1xf32> to vector<5x5xf32>
    %582 = arith.mulf %577, %581 : vector<5x5xf32>
    %cst_272 = arith.constant dense<0.000000e+00> : vector<5x8xf32>
    %583 = tpu.matmul %582, %569, %cst_272 {dimension_numbers = #tpu.dot_dimension_numbers<[1], [0], [0], [1], [0, 0, 1, 1], [], []>} : vector<5x5xf32>, vector<5x8xf32>, vector<5x8xf32> -> vector<5x8xf32>
    %584 = vector.extract_strided_slice %549 {offsets = [0, 16], sizes = [5, 8], strides = [1, 1]} : vector<5x96xf32> to vector<5x8xf32>
    %585 = vector.extract_strided_slice %549 {offsets = [0, 48], sizes = [5, 8], strides = [1, 1]} : vector<5x96xf32> to vector<5x8xf32>
    %586 = vector.extract_strided_slice %549 {offsets = [0, 80], sizes = [5, 8], strides = [1, 1]} : vector<5x96xf32> to vector<5x8xf32>
    %cst_273 = arith.constant dense<0.000000e+00> : vector<5x5xf32>
    %587 = tpu.matmul %584, %585, %cst_273 {dimension_numbers = #tpu.dot_dimension_numbers<[1], [1], [0], [0], [0, 0, 1, 0], [], []>} : vector<5x8xf32>, vector<5x8xf32>, vector<5x5xf32> -> vector<5x5xf32>
    %cst_274 = arith.constant 0.353553385 : f32
    %588 = vector.broadcast %cst_274 : f32 to vector<5x5xf32>
    %589 = arith.mulf %587, %588 : vector<5x5xf32>
    %cst_275 = arith.constant dense<0xFF800000> : vector<5xf32>
    %590 = vector.multi_reduction <maximumf>, %589, %cst_275 [1] : vector<5x5xf32> to vector<5xf32>
    %591 = vector.shape_cast %590 : vector<5xf32> to vector<5x1xf32>
    %592 = vector.broadcast %591 : vector<5x1xf32> to vector<5x5xf32>
    %593 = arith.subf %589, %592 : vector<5x5xf32>
    %594 = math.exp %593 : vector<5x5xf32>
    %cst_276 = arith.constant dense<0.000000e+00> : vector<5xf32>
    %595 = vector.multi_reduction <add>, %594, %cst_276 [1] : vector<5x5xf32> to vector<5xf32>
    %596 = vector.shape_cast %595 : vector<5xf32> to vector<5x1xf32>
    %597 = tpu.reciprocal %596 {approx = true} : vector<5x1xf32> -> vector<5x1xf32>
    %598 = vector.broadcast %597 : vector<5x1xf32> to vector<5x5xf32>
    %599 = arith.mulf %594, %598 : vector<5x5xf32>
    %cst_277 = arith.constant dense<0.000000e+00> : vector<5x8xf32>
    %600 = tpu.matmul %599, %586, %cst_277 {dimension_numbers = #tpu.dot_dimension_numbers<[1], [0], [0], [1], [0, 0, 1, 1], [], []>} : vector<5x5xf32>, vector<5x8xf32>, vector<5x8xf32> -> vector<5x8xf32>
    %601 = vector.extract_strided_slice %549 {offsets = [0, 24], sizes = [5, 8], strides = [1, 1]} : vector<5x96xf32> to vector<5x8xf32>
    %602 = vector.extract_strided_slice %549 {offsets = [0, 56], sizes = [5, 8], strides = [1, 1]} : vector<5x96xf32> to vector<5x8xf32>
    %603 = vector.extract_strided_slice %549 {offsets = [0, 88], sizes = [5, 8], strides = [1, 1]} : vector<5x96xf32> to vector<5x8xf32>
    %cst_278 = arith.constant dense<0.000000e+00> : vector<5x5xf32>
    %604 = tpu.matmul %601, %602, %cst_278 {dimension_numbers = #tpu.dot_dimension_numbers<[1], [1], [0], [0], [0, 0, 1, 0], [], []>} : vector<5x8xf32>, vector<5x8xf32>, vector<5x5xf32> -> vector<5x5xf32>
    %cst_279 = arith.constant 0.353553385 : f32
    %605 = vector.broadcast %cst_279 : f32 to vector<5x5xf32>
    %606 = arith.mulf %604, %605 : vector<5x5xf32>
    %cst_280 = arith.constant dense<0xFF800000> : vector<5xf32>
    %607 = vector.multi_reduction <maximumf>, %606, %cst_280 [1] : vector<5x5xf32> to vector<5xf32>
    %608 = vector.shape_cast %607 : vector<5xf32> to vector<5x1xf32>
    %609 = vector.broadcast %608 : vector<5x1xf32> to vector<5x5xf32>
    %610 = arith.subf %606, %609 : vector<5x5xf32>
    %611 = math.exp %610 : vector<5x5xf32>
    %cst_281 = arith.constant dense<0.000000e+00> : vector<5xf32>
    %612 = vector.multi_reduction <add>, %611, %cst_281 [1] : vector<5x5xf32> to vector<5xf32>
    %613 = vector.shape_cast %612 : vector<5xf32> to vector<5x1xf32>
    %614 = tpu.reciprocal %613 {approx = true} : vector<5x1xf32> -> vector<5x1xf32>
    %615 = vector.broadcast %614 : vector<5x1xf32> to vector<5x5xf32>
    %616 = arith.mulf %611, %615 : vector<5x5xf32>
    %cst_282 = arith.constant dense<0.000000e+00> : vector<5x8xf32>
    %617 = tpu.matmul %616, %603, %cst_282 {dimension_numbers = #tpu.dot_dimension_numbers<[1], [0], [0], [1], [0, 0, 1, 1], [], []>} : vector<5x5xf32>, vector<5x8xf32>, vector<5x8xf32> -> vector<5x8xf32>
    %618 = tpu.concatenate %566, %583, %600, %617 in 1 : vector<5x8xf32>, vector<5x8xf32>, vector<5x8xf32>, vector<5x8xf32> -> vector<5x32xf32>
    %c3_283 = arith.constant 3 : index
    %c0_284 = arith.constant 0 : index
    %c0_285 = arith.constant 0 : index
    %619 = vector.load %arg10[%c3_283, %c0_284, %c0_285] : memref<4x32x32xf32, #tpu.memory_space<vmem>>, vector<1x32x32xf32>
    %620 = vector.shape_cast %619 : vector<1x32x32xf32> to vector<32x32xf32>
    %cst_286 = arith.constant dense<0.000000e+00> : vector<5x32xf32>
    %621 = tpu.matmul %618, %620, %cst_286 {dimension_numbers = #tpu.dot_dimension_numbers<[1], [0], [0], [1], [0, 0, 1, 1], [], []>} : vector<5x32xf32>, vector<32x32xf32>, vector<5x32xf32> -> vector<5x32xf32>
    %622 = arith.addf %511, %621 : vector<5x32xf32>
    %c3_287 = arith.constant 3 : index
    %c0_288 = arith.constant 0 : index
    %c0_289 = arith.constant 0 : index
    %623 = vector.load %arg11[%c3_287, %c0_288, %c0_289] : memref<4x1x32xf32, #tpu.memory_space<vmem>>, vector<1x1x32xf32>
    %624 = vector.shape_cast %623 : vector<1x1x32xf32> to vector<1x32xf32>
    %625 = vector.broadcast %624 : vector<1x32xf32> to vector<5x32xf32>
    %626 = arith.addf %622, %625 : vector<5x32xf32>
    %c3_290 = arith.constant 3 : index
    %c0_291 = arith.constant 0 : index
    %c0_292 = arith.constant 0 : index
    %627 = vector.load %arg12[%c3_290, %c0_291, %c0_292] : memref<4x1x32xf32, #tpu.memory_space<vmem>>, vector<1x1x32xf32>
    %628 = vector.shape_cast %627 : vector<1x1x32xf32> to vector<1x32xf32>
    %c3_293 = arith.constant 3 : index
    %c0_294 = arith.constant 0 : index
    %c0_295 = arith.constant 0 : index
    %629 = vector.load %arg13[%c3_293, %c0_294, %c0_295] : memref<4x1x32xf32, #tpu.memory_space<vmem>>, vector<1x1x32xf32>
    %630 = vector.shape_cast %629 : vector<1x1x32xf32> to vector<1x32xf32>
    %cst_296 = arith.constant dense<0.000000e+00> : vector<5xf32>
    %631 = vector.multi_reduction <add>, %626, %cst_296 [1] : vector<5x32xf32> to vector<5xf32>
    %632 = vector.shape_cast %631 : vector<5xf32> to vector<5x1xf32>
    %cst_297 = arith.constant 3.200000e+01 : f32
    %633 = vector.broadcast %cst_297 : f32 to vector<5x1xf32>
    %634 = arith.divf %632, %633 : vector<5x1xf32>
    %635 = vector.broadcast %634 : vector<5x1xf32> to vector<5x32xf32>
    %636 = arith.subf %626, %635 : vector<5x32xf32>
    %637 = arith.mulf %636, %636 : vector<5x32xf32>
    %cst_298 = arith.constant dense<0.000000e+00> : vector<5xf32>
    %638 = vector.multi_reduction <add>, %637, %cst_298 [1] : vector<5x32xf32> to vector<5xf32>
    %639 = vector.shape_cast %638 : vector<5xf32> to vector<5x1xf32>
    %cst_299 = arith.constant 3.200000e+01 : f32
    %640 = vector.broadcast %cst_299 : f32 to vector<5x1xf32>
    %641 = arith.divf %639, %640 : vector<5x1xf32>
    %cst_300 = arith.constant 9.99999997E-7 : f32
    %642 = vector.broadcast %cst_300 : f32 to vector<5x1xf32>
    %643 = arith.addf %641, %642 : vector<5x1xf32>
    %644 = math.rsqrt %643 : vector<5x1xf32>
    %645 = vector.broadcast %644 : vector<5x1xf32> to vector<5x32xf32>
    %646 = arith.mulf %636, %645 : vector<5x32xf32>
    %647 = vector.broadcast %628 : vector<1x32xf32> to vector<5x32xf32>
    %648 = arith.mulf %646, %647 : vector<5x32xf32>
    %649 = vector.broadcast %630 : vector<1x32xf32> to vector<5x32xf32>
    %650 = arith.addf %648, %649 : vector<5x32xf32>
    %c3_301 = arith.constant 3 : index
    %c0_302 = arith.constant 0 : index
    %c0_303 = arith.constant 0 : index
    %651 = vector.load %arg14[%c3_301, %c0_302, %c0_303] : memref<4x32x128xf32, #tpu.memory_space<vmem>>, vector<1x32x128xf32>
    %652 = vector.shape_cast %651 : vector<1x32x128xf32> to vector<32x128xf32>
    %cst_304 = arith.constant dense<0.000000e+00> : vector<5x128xf32>
    %653 = tpu.matmul %650, %652, %cst_304 {dimension_numbers = #tpu.dot_dimension_numbers<[1], [0], [0], [1], [0, 0, 1, 1], [], []>} : vector<5x32xf32>, vector<32x128xf32>, vector<5x128xf32> -> vector<5x128xf32>
    %c3_305 = arith.constant 3 : index
    %c0_306 = arith.constant 0 : index
    %c0_307 = arith.constant 0 : index
    %654 = vector.load %arg15[%c3_305, %c0_306, %c0_307] : memref<4x1x128xf32, #tpu.memory_space<vmem>>, vector<1x1x128xf32>
    %655 = vector.shape_cast %654 : vector<1x1x128xf32> to vector<1x128xf32>
    %656 = vector.broadcast %655 : vector<1x128xf32> to vector<5x128xf32>
    %657 = arith.addf %653, %656 : vector<5x128xf32>
    %cst_308 = arith.constant 5.000000e-01 : f32
    %658 = vector.broadcast %cst_308 : f32 to vector<5x128xf32>
    %659 = arith.mulf %658, %657 : vector<5x128xf32>
    %cst_309 = arith.constant 4.471500e-02 : f32
    %660 = vector.broadcast %cst_309 : f32 to vector<5x128xf32>
    %661 = arith.mulf %660, %657 : vector<5x128xf32>
    %662 = arith.mulf %661, %657 : vector<5x128xf32>
    %663 = arith.mulf %662, %657 : vector<5x128xf32>
    %664 = arith.addf %657, %663 : vector<5x128xf32>
    %cst_310 = arith.constant 0.797884583 : f32
    %665 = vector.broadcast %cst_310 : f32 to vector<5x128xf32>
    %666 = arith.mulf %665, %664 : vector<5x128xf32>
    %667 = math.tanh %666 : vector<5x128xf32>
    %cst_311 = arith.constant 1.000000e+00 : f32
    %668 = vector.broadcast %cst_311 : f32 to vector<5x128xf32>
    %669 = arith.addf %668, %667 : vector<5x128xf32>
    %670 = arith.mulf %659, %669 : vector<5x128xf32>
    %c3_312 = arith.constant 3 : index
    %c0_313 = arith.constant 0 : index
    %c0_314 = arith.constant 0 : index
    %671 = vector.load %arg16[%c3_312, %c0_313, %c0_314] : memref<4x128x32xf32, #tpu.memory_space<vmem>>, vector<1x128x32xf32>
    %672 = vector.shape_cast %671 : vector<1x128x32xf32> to vector<128x32xf32>
    %cst_315 = arith.constant dense<0.000000e+00> : vector<5x32xf32>
    %673 = tpu.matmul %670, %672, %cst_315 {dimension_numbers = #tpu.dot_dimension_numbers<[1], [0], [0], [1], [0, 0, 1, 1], [], []>} : vector<5x128xf32>, vector<128x32xf32>, vector<5x32xf32> -> vector<5x32xf32>
    %674 = arith.addf %626, %673 : vector<5x32xf32>
    %c3_316 = arith.constant 3 : index
    %c0_317 = arith.constant 0 : index
    %c0_318 = arith.constant 0 : index
    %675 = vector.load %arg17[%c3_316, %c0_317, %c0_318] : memref<4x1x32xf32, #tpu.memory_space<vmem>>, vector<1x1x32xf32>
    %676 = vector.shape_cast %675 : vector<1x1x32xf32> to vector<1x32xf32>
    %677 = vector.broadcast %676 : vector<1x32xf32> to vector<5x32xf32>
    %678 = arith.addf %674, %677 : vector<5x32xf32>
    %679 = vector.extract_strided_slice %678 {offsets = [1, 0], sizes = [4, 32], strides = [1, 1]} : vector<5x32xf32> to vector<4x32xf32>
    %680 = vector.extract_strided_slice %678 {offsets = [0, 0], sizes = [1, 32], strides = [1, 1]} : vector<5x32xf32> to vector<1x32xf32>
    %681 = vector.broadcast %680 : vector<1x32xf32> to vector<4x32xf32>
    %682 = arith.addf %679, %681 : vector<4x32xf32>
    %c4 = arith.constant 4 : index
    %c0_319 = arith.constant 0 : index
    %c0_320 = arith.constant 0 : index
    %c0_321 = arith.constant 0 : index
    %683 = vector.load %arg18[%c4, %c0_319, %c0_320, %c0_321] : memref<5x1x4x32xf32, #tpu.memory_space<vmem>>, vector<1x1x4x32xf32>
    %684 = vector.shape_cast %683 : vector<1x1x4x32xf32> to vector<4x32xf32>
    %685 = vector.shape_cast %682 : vector<4x32xf32> to vector<1x1x4x32xf32>
    tpu.vector_store %arg18[%c4, %c0_319, %c0_320, %c0_321], %685 {strides = array<i32>} : memref<5x1x4x32xf32, #tpu.memory_space<vmem>>, vector<1x1x4x32xf32>,
    return
  }
  func.func @transform_0(%arg0: i32) -> (i32, i32, i32) {
    %c0_i32 = arith.constant 0 : i32
    %c0_i32_0 = arith.constant 0 : i32
    %c0_i32_1 = arith.constant 0 : i32
    return %arg0, %c0_i32, %c0_i32_0 : i32, i32, i32
  }
  func.func @transform_1(%arg0: i32) -> (i32, i32) {
    %c0_i32 = arith.constant 0 : i32
    %c0_i32_0 = arith.constant 0 : i32
    %c0_i32_1 = arith.constant 0 : i32
    return %c0_i32, %c0_i32_0 : i32, i32
  }
  func.func @transform_2(%arg0: i32) -> (i32, i32) {
    %c0_i32 = arith.constant 0 : i32
    %c0_i32_0 = arith.constant 0 : i32
    %c0_i32_1 = arith.constant 0 : i32
    return %c0_i32, %c0_i32_0 : i32, i32
  }
  func.func @transform_3(%arg0: i32) -> (i32, i32) {
    %c0_i32 = arith.constant 0 : i32
    %c0_i32_0 = arith.constant 0 : i32
    %c0_i32_1 = arith.constant 0 : i32
    return %c0_i32, %c0_i32_0 : i32, i32
  }
  func.func @transform_4(%arg0: i32) -> (i32, i32) {
    %c0_i32 = arith.constant 0 : i32
    %c0_i32_0 = arith.constant 0 : i32
    %c0_i32_1 = arith.constant 0 : i32
    return %c0_i32, %c0_i32_0 : i32, i32
  }
  func.func @transform_5(%arg0: i32) -> (i32, i32, i32) {
    %c0_i32 = arith.constant 0 : i32
    %c0_i32_0 = arith.constant 0 : i32
    %c0_i32_1 = arith.constant 0 : i32
    %c0_i32_2 = arith.constant 0 : i32
    return %c0_i32, %c0_i32_0, %c0_i32_1 : i32, i32, i32
  }
  func.func @transform_6(%arg0: i32) -> (i32, i32, i32) {
    %c0_i32 = arith.constant 0 : i32
    %c0_i32_0 = arith.constant 0 : i32
    %c0_i32_1 = arith.constant 0 : i32
    %c0_i32_2 = arith.constant 0 : i32
    return %c0_i32, %c0_i32_0, %c0_i32_1 : i32, i32, i32
  }
  func.func @transform_7(%arg0: i32) -> (i32, i32, i32) {
    %c0_i32 = arith.constant 0 : i32
    %c0_i32_0 = arith.constant 0 : i32
    %c0_i32_1 = arith.constant 0 : i32
    %c0_i32_2 = arith.constant 0 : i32
    return %c0_i32, %c0_i32_0, %c0_i32_1 : i32, i32, i32
  }
  func.func @transform_8(%arg0: i32) -> (i32, i32, i32) {
    %c0_i32 = arith.constant 0 : i32
    %c0_i32_0 = arith.constant 0 : i32
    %c0_i32_1 = arith.constant 0 : i32
    %c0_i32_2 = arith.constant 0 : i32
    return %c0_i32, %c0_i32_0, %c0_i32_1 : i32, i32, i32
  }
  func.func @transform_9(%arg0: i32) -> (i32, i32, i32) {
    %c0_i32 = arith.constant 0 : i32
    %c0_i32_0 = arith.constant 0 : i32
    %c0_i32_1 = arith.constant 0 : i32
    %c0_i32_2 = arith.constant 0 : i32
    return %c0_i32, %c0_i32_0, %c0_i32_1 : i32, i32, i32
  }
  func.func @transform_10(%arg0: i32) -> (i32, i32, i32) {
    %c0_i32 = arith.constant 0 : i32
    %c0_i32_0 = arith.constant 0 : i32
    %c0_i32_1 = arith.constant 0 : i32
    %c0_i32_2 = arith.constant 0 : i32
    return %c0_i32, %c0_i32_0, %c0_i32_1 : i32, i32, i32
  }
  func.func @transform_11(%arg0: i32) -> (i32, i32, i32) {
    %c0_i32 = arith.constant 0 : i32
    %c0_i32_0 = arith.constant 0 : i32
    %c0_i32_1 = arith.constant 0 : i32
    %c0_i32_2 = arith.constant 0 : i32
    return %c0_i32, %c0_i32_0, %c0_i32_1 : i32, i32, i32
  }
  func.func @transform_12(%arg0: i32) -> (i32, i32, i32) {
    %c0_i32 = arith.constant 0 : i32
    %c0_i32_0 = arith.constant 0 : i32
    %c0_i32_1 = arith.constant 0 : i32
    %c0_i32_2 = arith.constant 0 : i32
    return %c0_i32, %c0_i32_0, %c0_i32_1 : i32, i32, i32
  }
  func.func @transform_13(%arg0: i32) -> (i32, i32, i32) {
    %c0_i32 = arith.constant 0 : i32
    %c0_i32_0 = arith.constant 0 : i32
    %c0_i32_1 = arith.constant 0 : i32
    %c0_i32_2 = arith.constant 0 : i32
    return %c0_i32, %c0_i32_0, %c0_i32_1 : i32, i32, i32
  }
  func.func @transform_14(%arg0: i32) -> (i32, i32, i32) {
    %c0_i32 = arith.constant 0 : i32
    %c0_i32_0 = arith.constant 0 : i32
    %c0_i32_1 = arith.constant 0 : i32
    %c0_i32_2 = arith.constant 0 : i32
    return %c0_i32, %c0_i32_0, %c0_i32_1 : i32, i32, i32
  }
  func.func @transform_15(%arg0: i32) -> (i32, i32, i32) {
    %c0_i32 = arith.constant 0 : i32
    %c0_i32_0 = arith.constant 0 : i32
    %c0_i32_1 = arith.constant 0 : i32
    %c0_i32_2 = arith.constant 0 : i32
    return %c0_i32, %c0_i32_0, %c0_i32_1 : i32, i32, i32
  }
  func.func @transform_16(%arg0: i32) -> (i32, i32, i32) {
    %c0_i32 = arith.constant 0 : i32
    %c0_i32_0 = arith.constant 0 : i32
    %c0_i32_1 = arith.constant 0 : i32
    %c0_i32_2 = arith.constant 0 : i32
    return %c0_i32, %c0_i32_0, %c0_i32_1 : i32, i32, i32
  }
  func.func @transform_17(%arg0: i32) -> (i32, i32, i32, i32) {
    %c0_i32 = arith.constant 0 : i32
    %c0_i32_0 = arith.constant 0 : i32
    %c0_i32_1 = arith.constant 0 : i32
    %c0_i32_2 = arith.constant 0 : i32
    return %c0_i32, %arg0, %c0_i32_0, %c0_i32_1 : i32, i32, i32, i32
  }
}

</mosaic_0001>

<bundles_post_ra>
// kernel: mul.6
= control target key start
LH: loop header
LB: loop body
LE: loop exit
PB: predicated region body
PF: predicated region fallthrough
CT: control target
= control target key end

     0   :  { %s30_s8 = smov 16   ;;  %vm7_vm0 = vcmask 130048   ;;  %vm13_vm1 = vcmask 392448   ;;  %vm19_vm2 = vcmask 261248   ;;  %s47_s0 = inlined_call_operand.vmem [shape: f32[3,16], index: 0, kind: input, shape index: {}]   ;;  %s48_s1 = inlined_call_operand.vmem [shape: f32[48], index: 1, kind: output, shape index: {}]  }
   0x1   :  { %v4_v0 = vld [vmem:[%s47_s0] sm:$0xf]  ;;  %s29_s0 = smov 32  }
   0x2   :  { %5 = vst [vmem:[#allocation1] sm:$0xf] %v4_v0 }
   0x9   :  { %v10_v1 = vld [vmem:[#allocation1 + $0x2] sm:$0x1]   ;;  %v16_v2 = vld [vmem:[#allocation1 + $0x1] sm:$0x1]   ;;  %v6_v3 = vld [vmem:[#allocation1] sm:$0x1]  }
   0xa   :  { %11 = vrot.lane.b32.xlu0 %v10_v1, %s29_s0  ;;  %8 = vst.msk [vmem:[#allocation0] sm:$0x1] %vm7_vm0, %v6_v3  }
  0x12   :  { %17 = vrot.lane.b32.xlu0 %v16_v2, %s30_s8 }
  0x7c   :  { %v12_v4 = vpop.permute.xlu0 %11  }
  0x7d   :  { %14 = vst.msk [vmem:[#allocation0] sm:$0x1] %vm13_vm1, %v12_v4  }
  0x84   :  { %v18_v5 = vpop.permute.xlu0 %17  }
  0x85   :  { %20 = vst.msk [vmem:[#allocation0] sm:$0x1] %vm19_vm2, %v18_v5  }
  0x8c   :  { %v23_v6 = vld [vmem:[#allocation0] sm:$0x1] }
  0x8d   :  { %26 = vst [vmem:[%s48_s1] sm:$0x1] %v23_v6 }

// kernel: mul.9
= control target key start
LH: loop header
LB: loop body
LE: loop exit
PB: predicated region body
PF: predicated region fallthrough
CT: control target
= control target key end

     0   :  { %s34_s0 = inlined_call_operand.vmem [shape: f32[48], index: 0, kind: input, shape index: {}]   ;;  %s35_s1 = inlined_call_operand.vmem [shape: f32[48], index: 1, kind: input, shape index: {}]   ;;  %s36_s2 = inlined_call_operand.vmem [shape: f32[48], index: 2, kind: output, shape index: {}]  }
   0x1   :  { %v3_v0 = vld [vmem:[%s34_s0] sm:$0x1] }
   0x2   :  { %v4_v1 = vld [vmem:[%s35_s1] sm:$0x1] }
   0x3   :  { %v7_v2 = vmul.f32 %v4_v1, %v3_v0 }
   0x5   :  { %9 = vst [vmem:[%s36_s2] sm:$0x1] %v7_v2 }

// kernel: dino_forward.1
= control target key start
LH: loop header
LB: loop body
LE: loop exit
PB: predicated region body
PF: predicated region fallthrough
CT: control target
= control target key end

     0   :  { %s4072_s0 = inlined_call_operand.vmem [shape: f32[2,4,48], index: 0, kind: input, shape index: {}]   ;;  %s4073_s1 = inlined_call_operand.vmem [shape: f32[48,32], index: 1, kind: input, shape index: {}]   ;;  %s4074_s2 = inlined_call_operand.vmem [shape: f32[1,32], index: 2, kind: input, shape index: {}]   ;;  %s4075_s3 = inlined_call_operand.vmem [shape: f32[1,32], index: 3, kind: input, shape index: {}]   ;;  %s4076_s4 = inlined_call_operand.vmem [shape: f32[5,32], index: 4, kind: input, shape index: {}]   ;;  %s4077_s5 = inlined_call_operand.vmem [shape: f32[4,1,32], index: 5, kind: input, shape index: {}]   ;;  %s4078_s6 = inlined_call_operand.vmem [shape: f32[4,1,32], index: 6, kind: input, shape index: {}]   ;;  %s4079_s7 = inlined_call_operand.vmem [shape: f32[4,32,96], index: 7, kind: input, shape index: {}]   ;;  %s4080_s8 = inlined_call_operand.vmem [shape: f32[4,1,96], index: 8, kind: input, shape index: {}]   ;;  %s4081_s9 = inlined_call_operand.vmem [shape: f32[4,32,32], index: 9, kind: input, shape index: {}]   ;;  %s4082_s10 = inlined_call_operand.vmem [shape: f32[4,1,32], index: 10, kind: input, shape index: {}]   ;;  %s4083_s11 = inlined_call_operand.vmem [shape: f32[4,1,32], index: 11, kind: input, shape index: {}]   ;;  %s4084_s12 = inlined_call_operand.vmem [shape: f32[4,1,32], index: 12, kind: input, shape index: {}]   ;;  %s4085_s13 = inlined_call_operand.vmem [shape: f32[4,32,128], index: 13, kind: input, shape index: {}]   ;;  %s4086_s14 = inlined_call_operand.vmem [shape: f32[4,1,128], index: 14, kind: input, shape index: {}]   ;;  %s4087_s15 = inlined_call_operand.vmem [shape: f32[4,128,32], index: 15, kind: input, shape index: {}]   ;;  %s4088_s16 = inlined_call_operand.vmem [shape: f32[4,1,32], index: 16, kind: input, shape index: {}]   ;;  %s4089_s17 = inlined_call_operand.vmem [shape: f32[5,2,4,32], index: 17, kind: output, shape index: {}]  }
   0x1   :  { %4131 = sst [smem:[#allocation8_spill]] %s4072_s0 }
   0x2   :  { %4132 = sst [smem:[#allocation9_spill]] %s4073_s1 }
   0x3   :  { %4133 = sst [smem:[#allocation10_spill]] %s4074_s2 }
   0x4   :  { %4134 = sst [smem:[#allocation11_spill]] %s4075_s3 }
   0x5   :  { %4135 = sst [smem:[#allocation12_spill]] %s4076_s4 }
   0x6   :  { %4136 = sst [smem:[#allocation13_spill]] %s4081_s9 }
   0x7   :  { %4137 = sst [smem:[#allocation14_spill]] %s4082_s10 }
   0x8   :  { %4138 = sst [smem:[#allocation15_spill]] %s4089_s17 }
   0x9   :  { %s3228_s24 = smov 0   ;;  %s3230_s25 = smov 0  }
   0xa   :  { %s3232_s26 = smov 0  }
   0xb LB: > { %4139 = sst [smem:[#allocation3_spill]] %s3117_s25  ;;  %s3241_s27 = sadd.s32 4294967295, %s3121_s26   ;;  %s3121_s26 = sphi %s3232_s26, %s4178_s26   ;;  %s3117_s25 = sphi %s3230_s25, %s4180_s25   ;;  %s3113_s24 = sphi %s3228_s24, %s4179_s24  }
   0xc   : > { %4140 = sst [smem:[#allocation4_spill]] %s3241_s27  ;;  %s3243_s28 = sadd.s32 1, %s3121_s26  }
   0xd   : > { %4141 = sst [smem:[#allocation5_spill]] %s3243_s28  ;;  %s393_s29 = ssub.s32 %s3121_s26, %s3243_s28 }
   0xe   : > { %s396_s0 = sadd.s32 1, %s3117_s25  ;;  %p394_p0 = scmp.eq.s32.totalorder %s393_s29, 0 }
   0xf   : > { %p406_p1 = scmp.ne.s32.totalorder %s3117_s25, %s3113_s24  ;;  %p407_p2 = scmp.eq.s32.totalorder %s3241_s27, 1 }
  0x10   : > { %p2742_p3 = scmp.ge.s32.totalorder %s3121_s26, 1  ;;  %p486_p5 = scmp.lt.s32.totalorder %s3121_s26, 3 }
  0x11   : > { %s3251_s30 = scalar_select %p394_p0, %s3117_s25, %s396_s0  }
  0x12   : > { %p3253_p4 = por %p407_p2, %p406_p1  ;;  %p487_p6 = pnand %p2742_p3, %p486_p5 }
  0x13   : > { %4142 = sst [smem:[#allocation6_spill]] %s3251_s30  ;;  %p536_p7 = scmp.lt.s32.totalorder (!%p487_p6), %s3241_s27, 1 }
  0x14   : > { %s4143_s18 = scalar_select %p3253_p4, 1, 0 }
  0x15   : > { %490 = sbr.rel (%p487_p6) target bundleno = 9116 (0x239c), region = 88  ;;  %s4145_s20 = sld [smem:[#allocation9_spill]] (!%p487_p6) }
  0x16   : > { %4144 = sst [smem:[#allocation7_spill]] %s4143_s18  ;;  %s4119_s1 = smov (!%p487_p6), 88  }
  0x17   : > { %s4146_s28 = sld [smem:[#allocation8_spill]] (!%p487_p6)  ;;  %s4105_s21 = smov (!%p487_p6), 64  }
  0x18   : > { %s4147_s2 = sld [smem:[#allocation10_spill]] (!%p487_p6)  ;;  %s4117_s22 = smov (!%p487_p6), 96  }
  0x19   : > { %s4148_s3 = sld [smem:[#allocation11_spill]] (!%p487_p6)  ;;  %s4107_s23 = smov (!%p487_p6), 80  }
  0x1a   : > { %s537_s30 = scalar_select %p536_p7, %s3241_s27, 1  ;;  %vm551_vm0 = vcmask 392192   ;;  %vm579_vm1 = vcmask 1040384   ;;  %vm589_vm2 = vcmask 258048   ;;  %vm585_vm3 = vcmask 258049   ;;  %v630_v30 = vld [vmem:[%s4079_s7 + $0x18] sm:$0xff] }
  0x1b   : > { %v546_v0 = vld [vmem:[%s4145_s20 + $0x28] sm:$0xff]  ;;  %v545_v1 = vld [vmem:[%s4145_s20 + $0x20] sm:$0xff]  ;;  %v544_v2 = vld [vmem:[%s4145_s20 + $0x18] sm:$0xff]  ;;  %s4149_s4 = sld [smem:[#allocation12_spill]]  ;;  %v3123_v18 = vmov 32.0   ;;  %651 = vmatpush.msra.mxu1 %v630_v30  ;;  %vm635_vm8 = vcmask 261120  }
  0x1c   : > { %565 = vmatpush.msra.mxu0 %v546_v0  ;;  %v543_v3 = vld [vmem:[%s4145_s20 + $0x10] sm:$0xff]  ;;  %v542_v4 = vld [vmem:[%s4145_s20 + $0x8] sm:$0xff]  ;;  %s2743_s25 = sshll.u32 %s537_s30, 2  ;;  %v541_v5 = vld [vmem:[%s4145_s20] sm:$0xff]  ;;  %3009 = vrcp.f32 %v3123_v18  ;;  %s4121_s29 = smov 120   ;;  %vm706_vm9 = vcmask 1044480  }
  0x1d   : > { %s539_s17 = scalar_lea.vmem %s4146_s28, %s2743_s25  ;;  %s533_s25 = sand.u32 1, %s3113_s24   ;;  %v629_v31 = vld [vmem:[%s4079_s7 + $0x10] sm:$0xff]  ;;  %v628_v32 = vld [vmem:[%s4079_s7 + $0x8] sm:$0xff]  ;;  %v627_v33 = vld [vmem:[%s4079_s7] sm:$0xff]  ;;  %vm662_vm10 = vcmask 64512   ;;  %vm688_vm11 = vcmask 36864  }
  0x1e   : > { %566 = vmatpush.msra.mxu0 %v545_v1  ;;  %v540_v6 = vld [vmem:[%s539_s17] sm:$0xf]  ;;  %s2936_s17 = smul.u32 20, %s533_s25  ;;  %652 = vmatpush.msra.mxu1 %v629_v31  ;;  %s4099_s0 = smov 112   ;;  %vm702_vm12 = vcmask 39936   ;;  %vm943_vm13 = vcmask 130048  }
  0x1f   : > { %v2976_v7 = vld [vmem:[%s4147_s2] ss:$0 sm:$0xff]  ;;  %s4103_s30 = smov 72   ;;  %s4101_s26 = smov 104   ;;  %vm945_vm14 = vcmask 195584  }
  0x20   : > { %567 = vmatpush.msra.mxu0 %v544_v2  ;;  %v575_v10 = vld [vmem:[%s4148_s3] sm:$0x1]  ;;  %s3296_s24 = scalar_lea.vmem [#allocation2], %s2936_s17  ;;  %653 = vmatpush.msra.mxu1 %v628_v32  ;;  %s4097_s25 = smov 48  }
  0x21   : > { %v581_v12 = vld [vmem:[%s4149_s4] sm:$0x1f]  ;;  %s4115_s28 = smov 56   ;;  %s4095_s18 = smov 40  }
  0x22   : > { %568 = vmatpush.msra.mxu0 %v543_v3  ;;  %v3010_v19 = vpop.eup %3009  ;;  %654 = vmatpush.msra.mxu1 %v627_v33  ;;  %v2977_v43 = vld [vmem:[%s4077_s5] ss:$0 sm:$0xff]  ;;  %s4111_s17 = smov 8   ;;  %s4109_s19 = smov 16  }
  0x23   : > { %v594_v20 = vmul.f32 32.0, %v3010_v19  ;;  %vm598_vm4 = vweird.f32 %v3010_v19  ;;  %v2978_v46 = vld [vmem:[%s4078_s6] ss:$0 sm:$0xff]  ;;  %s4150_s9 = sld [smem:[#allocation13_spill]]  ;;  %s4161_s4 = smov 16  }
  0x24   : > { %569 = vmatpush.msra.mxu0 %v542_v4  ;;  %v2979_v49 = vld [vmem:[%s4080_s8] ss:$0 sm:$0xff]  ;;  %s4151_s10 = sld [smem:[#allocation14_spill]]  ;;  %s4162_s20 = smov 24  }
  0x25   : > { %v595_v21 = vsub.f32 1.0, %v594_v20  ;;  %s4167_s2 = sld [smem:[#allocation13_spill]]  ;;  %s4173_s3 = smov 24  }
  0x26   : > { %570 = vmatpush.msra.mxu0 %v541_v5 }
  0x27   : > { %2744 = vmatmul.msk.f32.vlgmr.msra.gmra.mxu0 %vm551_vm0, %v540_v6  ;;  %v596_v22 = vmul.f32 %v3010_v19, %v595_v21 }
  0x29   : > { %v597_v23 = vadd.f32 %v3010_v19, %v596_v22 }
  0x2b   : > { %v3300_v24 = vsel %vm598_vm4, %v3010_v19, %v597_v23 }
  0xa4   : > { %v572_v8 = vpop.f32.mrf.mxu0 }
  0xa5   : > { %v573_v9 = vadd.f32 %v2976_v7, %v572_v8 }
  0xa7   : > { %v577_v11 = vrot.slane %v573_v9, 7 }
  0xa9   : > { %v580_v13 = vsel %vm579_vm1, %v575_v10, %v577_v11 }
  0xaa   : > { %v3290_v14 = vadd.f32 %v581_v12, %v580_v13 }
  0xac   : > { %v583_v15 = vperm.slane %v3290_v14, 0  ;;  %v590_v16 = vsel %vm589_vm2, %v3290_v14, 0.0 }
  0xad   : > { %591 = vadd.xlane.f32.xlu0 %v590_v16 }
  0xae   : > { %v584_v17 = vadd.f32 %v583_v15, %v3290_v14 }
  0xb0   : > { %586 = vst.msk [vmem:[%s3296_s24 - $0x1] sm:$0x1e] %vm585_vm3, %v584_v17 }
 0x120   : > { %v592_v25 = vpop.xlane.xlu0 %591 }
 0x121   : > { %v600_v26 = vmul.f32 %v3300_v24, %v592_v25 }
 0x123   : > { %v601_v27 = vsub.f32 %v3290_v14, %v600_v26 }
 0x125   : > { %v602_v28 = vmul.f32 %v601_v27, %v601_v27 }
 0x127   : > { %v603_v29 = vsel %vm589_vm2, %v602_v28, 0.0 }
 0x128   : > { %604 = vadd.xlane.f32.xlu0 %v603_v29 }
 0x19b   : > { %v605_v34 = vpop.xlane.xlu0 %604 }
 0x19c   : > { %v606_v35 = vmul.f32 %v605_v34, %v3300_v24 }
 0x19e   : > { %v607_v36 = vadd.f32 1e-06, %v606_v35 }
 0x1a0   : > { %3011 = vrsqrt.f32 %v607_v36  ;;  %vm614_vm6 = vweird.f32 %v607_v36 }
 0x1a6   : > { %v3012_v37 = vpop.eup %3011 }
 0x1a7   : > { %v609_v38 = vmul.f32 %v3012_v37, %v607_v36  ;;  %vm615_vm5 = vweird.f32 %v3012_v37 }
 0x1a8   : > { %vm616_vm7 = vmor %vm614_vm6, %vm615_vm5 }
 0x1a9   : > { %v610_v39 = vmul.f32 %v3012_v37, %v609_v38 }
 0x1ab   : > { %v611_v40 = vmul.f32 0.5, %v610_v39 }
 0x1ad   : > { %v612_v41 = vsub.f32 1.5, %v611_v40 }
 0x1af   : > { %v613_v42 = vmul.f32 %v3012_v37, %v612_v41 }
 0x1b1   : > { %v617_v44 = vsel %vm616_vm7, %v3012_v37, %v613_v42 }
 0x1b2   : > { %v618_v45 = vmul.f32 %v617_v44, %v601_v27 }
 0x1b4   : > { %v622_v47 = vmul.f32 %v2977_v43, %v618_v45 }
 0x1b6   : > { %v626_v48 = vadd.f32 %v2978_v46, %v622_v47 }
 0x1b8   : > { %2745 = vmatmul.msk.f32.vlgmr.msra.gmra.mxu1 %vm635_vm8, %v626_v48 }
 0x235   : > { %v656_v50 = vpop.f32.mrf.mxu1 }
 0x236   : > { %v3328_v51 = vadd.f32 %v2979_v49, %v656_v50  ;;  %v950_v49 = vld [vmem:[%s4150_s9 + $0x18] sm:$0xff]  ;;  %v949_v50 = vld [vmem:[%s4150_s9 + $0x10] sm:$0xff] }
 0x238   : > { %731 = vrot.lane.b32.xlu0 %v3328_v51, %s4119_s1  ;;  %700 = vrot.lane.b32.xlu2 %v3328_v51, %s4105_s21  ;;  %s4158_s21 = smov 48  }
 0x239   : > { %660 = vrot.lane.b32.xlu1 %v3328_v51, %s4117_s22 }
 0x240   : > { %798 = vrot.lane.b32.xlu0 %v3328_v51, %s4107_s23  ;;  %729 = vrot.lane.b32.xlu2 %v3328_v51, %s4121_s29  ;;  %s4159_s23 = smov 8  }
 0x248   : > { %796 = vrot.lane.b32.xlu0 %v3328_v51, %s4099_s0  ;;  %865 = vrot.lane.b32.xlu2 %v3328_v51, %s4103_s30  ;;  %s4160_s0 = smov 40   ;;  %s4164_s30 = smov 88  }
 0x292   : > { %v701_v52 = vpop.permute.xlu2 %700 }
 0x293   : > { %2748 = vmatpush.msk.msra.mxu3 %vm706_vm9, %v701_v52  ;;  %v947_v52 = vld [vmem:[%s4150_s9] sm:$0xff] }
 0x29a   : > { %v730_v53 = vpop.permute.xlu2 %729 }
 0x2a2   : > { %v866_v54 = vpop.permute.xlu2 %865 }
 0x2a3   : > { %2758 = vmatpush.xpose.msk.msrb.mxu0 %vm662_vm10, %v866_v54 }
 0x2aa   : > { %v732_v55 = vpop.permute.xlu0 %731 }
 0x2ab   : > { %v661_v56 = vpop.permute.xlu1 %660  ;;  %2750 = vmatpush.xpose.msk.msrb.mxu3 %vm662_vm10, %v732_v55 }
 0x2ac   : > { %2746 = vmatpush.xpose.msk.msrb.mxu1 %vm662_vm10, %v661_v56 }
 0x2af   : > { %2747 = vmatmul.msk.f32.vlgmr.msrb.gmra.mxu1 %vm662_vm10, %v3328_v51 }
 0x2b2   : > { %v799_v57 = vpop.permute.xlu0 %798 }
 0x2b3   : > { %2754 = vmatpush.xpose.msk.msra.mxu1 %vm662_vm10, %v799_v57 }
 0x2b7   : > { %966 = vmatpush.msrb.mxu1 %v950_v49 }
 0x2b9   : > { %967 = vmatpush.msrb.mxu1 %v949_v50 }
 0x2ba   : > { %v797_v58 = vpop.permute.xlu0 %796 }
 0x2bb   : > { %2755 = vmatmul.msk.f32.vlgmr.msra.gmra.mxu1 %vm662_vm10, %v797_v58 }
 0x32c   : > { %v684_v59 = vpop.f32.mrf.mxu1 }
 0x32d   : > { %v687_v60 = vmul.f32 0.35355338, %v684_v59  ;;  %v2980_v59 = vld [vmem:[%s4151_s10] ss:$0 sm:$0xff] }
 0x32f   : > { %v689_v61 = vsel %vm688_vm11, %v687_v60, -inf }
 0x330   : > { %690 = vmax.xlane.f32.xlu1 %v689_v61 }
 0x338   : > { %v821_v62 = vpop.f32.mrf.mxu1 }
 0x339   : > { %v824_v63 = vmul.f32 0.35355338, %v821_v62 }
 0x33b   : > { %v825_v0 = vsel %vm688_vm11, %v824_v63, -inf }
 0x33c   : > { %826 = vmax.xlane.f32.xlu0 %v825_v0 }
 0x3a3   : > { %v691_v1 = vpop.xlane.xlu1 %690 }
 0x3a4   : > { %v692_v2 = vsub.f32 %v687_v60, %v691_v1 }
 0x3a6   : > { %v693_v3 = vmul.f32 1.442695, %v692_v2 }
 0x3a8   : > { %3013 = vpow2.f32 %v693_v3 }
 0x3ae   : > { %v3014_v4 = vpop.eup %3013 }
 0x3af   : > { %v827_v5 = vpop.xlane.xlu0 %826  ;;  %v695_v6 = vsel %vm688_vm11, %v3014_v4, 0.0 }
 0x3b0   : > { %v828_v7 = vsub.f32 %v824_v63, %v827_v5  ;;  %696 = vadd.xlane.f32.xlu2 %v695_v6  ;;  %v1015_v5 = vld [vmem:[%s4085_s13 + $0x18] sm:$0xff]  ;;  %v1013_v6 = vld [vmem:[%s4085_s13 + $0x8] sm:$0xff] }
 0x3b2   : > { %v829_v8 = vmul.f32 1.442695, %v828_v7  ;;  %v1012_v7 = vld [vmem:[%s4085_s13] sm:$0xff] }
 0x3b4   : > { %3015 = vpow2.f32 %v829_v8  ;;  %v1067_v8 = vld [vmem:[%s4087_s15 + $0x78] sm:$0xff] }
 0x3b5   : > { %1068 = vmatpush.msra.mxu0 %v1067_v8 }
 0x3ba   : > { %v3016_v9 = vpop.eup %3015 }
 0x3bb   : > { %v831_v10 = vsel %vm688_vm11, %v3016_v9, 0.0 }
 0x3bc   : > { %832 = vadd.xlane.f32.xlu1 %v831_v10  ;;  %v1065_v10 = vld [vmem:[%s4087_s15 + $0x68] sm:$0xff] }
 0x3c8   : > { %863 = vrot.lane.b32.xlu2 %v3328_v51, %s4101_s26  ;;  %s4152_s26 = smov 56  }
 0x423   : > { %v697_v11 = vpop.xlane.xlu2 %696 }
 0x424   : > { %3017 = vrcp.f32 %v697_v11 }
 0x42a   : > { %v3018_v12 = vpop.eup %3017 }
 0x42b   : > { %v864_v13 = vpop.permute.xlu2 %863  ;;  %v699_v15 = vmul.f32 %v3018_v12, %v3014_v4 }
 0x42c   : > { %2759 = vmatmul.msk.f32.vlgmr.msrb.gmra.mxu0 %vm662_vm10, %v864_v13  ;;  %v1064_v13 = vld [vmem:[%s4087_s15 + $0x60] sm:$0xff] }
 0x42d   : > { %2749 = vmatmul.msk.f32.vlgmr.msra.gmra.mxu3 %vm702_vm12, %v699_v15 }
 0x42f   : > { %v833_v27 = vpop.xlane.xlu1 %832 }
 0x435   : > { %2751 = vmatmul.msk.f32.vlgmr.msrb.gmra.mxu3 %vm662_vm10, %v730_v53 }
 0x4a9   : > { %v888_v16 = vpop.f32.mrf.mxu0 }
 0x4aa   : > { %v891_v17 = vmul.f32 0.35355338, %v888_v16 }
 0x4ac   : > { %v892_v18 = vsel %vm688_vm11, %v891_v17, -inf }
 0x4ad   : > { %893 = vmax.xlane.f32.xlu2 %v892_v18 }
 0x4b0   : > { %v3362_v19 = vpop.f32.mrf.mxu3 }
 0x4b8   : > { %v754_v20 = vpop.f32.mrf.mxu3 }
 0x4b9   : > { %v757_v21 = vmul.f32 0.35355338, %v754_v20 }
 0x4bb   : > { %v758_v22 = vsel %vm688_vm11, %v757_v21, -inf }
 0x4bc   : > { %759 = vmax.xlane.f32.xlu1 %v758_v22  ;;  %v2981_v22 = vld [vmem:[%s4083_s11] ss:$0 sm:$0xff] }
 0x4c5   : > { %836 = vrot.lane.b32.xlu2 %v3328_v51, %s4097_s25  ;;  %s4153_s25 = smov 80  }
 0x4d5   : > { %769 = vrot.lane.b32.xlu1 %v3328_v51, %s4115_s28  ;;  %s4156_s28 = smov 104  }
 0x520   : > { %v894_v23 = vpop.xlane.xlu2 %893 }
 0x521   : > { %v895_v25 = vsub.f32 %v891_v17, %v894_v23 }
 0x523   : > { %v896_v26 = vmul.f32 1.442695, %v895_v25 }
 0x525   : > { %3019 = vpow2.f32 %v896_v26  ;;  %v2982_v26 = vld [vmem:[%s4084_s12] ss:$0 sm:$0xff] }
 0x528   : > { %v837_v36 = vpop.permute.xlu2 %836 }
 0x52b   : > { %v3020_v28 = vpop.eup %3019 }
 0x52c   : > { %v898_v29 = vsel %vm688_vm11, %v3020_v28, 0.0 }
 0x52d   : > { %899 = vadd.xlane.f32.xlu0 %v898_v29  ;;  %v1063_v29 = vld [vmem:[%s4087_s15 + $0x58] sm:$0xff] }
 0x52f   : > { %v760_v30 = vpop.xlane.xlu1 %759 }
 0x530   : > { %v761_v31 = vsub.f32 %v757_v21, %v760_v30  ;;  %v1062_v30 = vld [vmem:[%s4087_s15 + $0x50] sm:$0xff] }
 0x532   : > { %v762_v32 = vmul.f32 1.442695, %v761_v31  ;;  %v1061_v31 = vld [vmem:[%s4087_s15 + $0x48] sm:$0xff] }
 0x534   : > { %3021 = vpow2.f32 %v762_v32  ;;  %v1060_v32 = vld [vmem:[%s4087_s15 + $0x40] sm:$0xff] }
 0x53a   : > { %v3022_v33 = vpop.eup %3021 }
 0x53b   : > { %v764_v34 = vsel %vm688_vm11, %v3022_v33, 0.0 }
 0x53c   : > { %765 = vadd.xlane.f32.xlu1 %v764_v34  ;;  %v1058_v34 = vld [vmem:[%s4087_s15 + $0x30] sm:$0xff] }
 0x547   : > { %v770_v35 = vpop.permute.xlu1 %769 }
 0x548   : > { %2752 = vmatpush.msk.msra.mxu3 %vm706_vm9, %v770_v35  ;;  %v1057_v35 = vld [vmem:[%s4087_s15 + $0x28] sm:$0xff] }
 0x54a   : > { %2756 = vmatpush.msk.msrb.mxu3 %vm706_vm9, %v837_v36  ;;  %v1056_v36 = vld [vmem:[%s4087_s15 + $0x20] sm:$0xff] }
 0x555   : > { %903 = vrot.lane.b32.xlu1 %v3328_v51, %s4095_s18  ;;  %s4113_s18 = smov 24   ;;  %v948_v51 = vld [vmem:[%s4150_s9 + $0x8] sm:$0xff] }
 0x556   : > { %968 = vmatpush.msrb.mxu1 %v948_v51 }
 0x558   : > { %969 = vmatpush.msrb.mxu1 %v947_v52 }
 0x5a0   : > { %v900_v40 = vpop.xlane.xlu0 %899 }
 0x5af   : > { %v766_v37 = vpop.xlane.xlu1 %765 }
 0x5b0   : > { %3023 = vrcp.f32 %v766_v37  ;;  %v1055_v37 = vld [vmem:[%s4087_s15 + $0x18] sm:$0xff] }
 0x5b1   : > { %3025 = vrcp.f32 %v833_v27 }
 0x5b2   : > { %3027 = vrcp.f32 %v900_v40  ;;  %v1052_v40 = vld [vmem:[%s4087_s15] sm:$0xff] }
 0x5b6   : > { %v3024_v38 = vpop.eup %3023 }
 0x5b7   : > { %v768_v39 = vmul.f32 %v3024_v38, %v3022_v33  ;;  %v3026_v41 = vpop.eup %3025  ;;  %v1059_v33 = vld [vmem:[%s4087_s15 + $0x38] sm:$0xff]  ;;  %v1054_v38 = vld [vmem:[%s4087_s15 + $0x10] sm:$0xff] }
 0x5b8   : > { %v835_v42 = vmul.f32 %v3026_v41, %v3016_v9  ;;  %v3028_v43 = vpop.eup %3027  ;;  %v1066_v9 = vld [vmem:[%s4087_s15 + $0x70] sm:$0xff]  ;;  %v2983_v41 = vld [vmem:[%s4086_s14] ss:$0 sm:$0xff] }
 0x5b9   : > { %2753 = vmatmul.msk.f32.vlgmr.msra.gmra.mxu3 %vm702_vm12, %v768_v39  ;;  %v902_v45 = vmul.f32 %v3028_v43, %v3020_v28  ;;  %1069 = vmatpush.msra.mxu0 %v1066_v9  ;;  %v1053_v39 = vld [vmem:[%s4087_s15 + $0x8] sm:$0xff] }
 0x5ba   : > { %1035 = vmatpush.msra.mxu3 %v1015_v5 }
 0x5bb   : > { %1070 = vmatpush.msra.mxu0 %v1065_v10 }
 0x5bd   : > { %1071 = vmatpush.msra.mxu0 %v1064_v13  ;;  %v2985_v13 = vld [vmem:[%s4077_s5 + $0x1] ss:$0 sm:$0xff] }
 0x5bf   : > { %1072 = vmatpush.msra.mxu0 %v1063_v29 }
 0x5c1   : > { %2757 = vmatmul.msk.f32.vlgmr.msrb.gmra.mxu3 %vm702_vm12, %v835_v42  ;;  %1073 = vmatpush.msra.mxu0 %v1062_v30 }
 0x5c3   : > { %1074 = vmatpush.msra.mxu0 %v1061_v31 }
 0x5c5   : > { %1075 = vmatpush.msra.mxu0 %v1060_v32 }
 0x5c7   : > { %v904_v44 = vpop.permute.xlu1 %903  ;;  %1076 = vmatpush.msra.mxu0 %v1059_v33 }
 0x5c8   : > { %2760 = vmatpush.msk.msra.mxu2 %vm706_vm9, %v904_v44 }
 0x5c9   : > { %2761 = vmatmul.msk.f32.vlgmr.msra.gmra.mxu2 %vm702_vm12, %v902_v45  ;;  %1077 = vmatpush.msra.mxu0 %v1058_v34 }
 0x5cb   : > { %1078 = vmatpush.msra.mxu0 %v1057_v35 }
 0x5cd   : > { %1079 = vmatpush.msra.mxu0 %v1056_v36 }
 0x5cf   : > { %1080 = vmatpush.msra.mxu0 %v1055_v37 }
 0x5d1   : > { %1081 = vmatpush.msra.mxu0 %v1054_v38 }
 0x5d3   : > { %1082 = vmatpush.msra.mxu0 %v1053_v39 }
 0x5d5   : > { %1083 = vmatpush.msra.mxu0 %v1052_v40 }
 0x63c   : > { %v793_v46 = vpop.f32.mrf.mxu3 }
 0x63d   : > { %931 = vrot.lane.b32.xlu0 %v793_v46, %s4111_s17  ;;  %s4154_s17 = smov 64  }
 0x644   : > { %v860_v47 = vpop.f32.mrf.mxu3 }
 0x645   : > { %935 = vrot.lane.b32.xlu1 %v860_v47, %s4109_s19  ;;  %s4155_s19 = smov 72  }
 0x64c   : > { %v927_v48 = vpop.f32.mrf.mxu2 }
 0x64d   : > { %939 = vrot.lane.b32.xlu1 %v927_v48, %s4113_s18  ;;  %s4157_s18 = smov 112  }
 0x6af   : > { %v932_v54 = vpop.permute.xlu0 %931 }
 0x6b0   : > { %v942_v55 = vsel %vm662_vm10, %v3362_v19, %v932_v54 }
 0x6b7   : > { %v936_v53 = vpop.permute.xlu1 %935 }
 0x6b8   : > { %v944_v56 = vsel %vm943_vm13, %v942_v55, %v936_v53  ;;  %v2984_v53 = vld [vmem:[%s4088_s16] ss:$0 sm:$0xff] }
 0x6bf   : > { %v940_v57 = vpop.permute.xlu1 %939 }
 0x6c0   : > { %v946_v58 = vsel %vm945_vm14, %v944_v56, %v940_v57 }
 0x6c1   : > { %2762 = vmatmul.msk.f32.vlgmr.msrb.gmra.mxu1 %vm635_vm8, %v946_v58 }
 0x73e   : > { %v971_v60 = vpop.f32.mrf.mxu1 }
 0x73f   : > { %v974_v61 = vadd.f32 %v971_v60, %v3290_v14  ;;  %v1014_v14 = vld [vmem:[%s4085_s13 + $0x10] sm:$0xff] }
 0x740   : > { %1036 = vmatpush.msra.mxu3 %v1014_v14 }
 0x741   : > { %v3403_v62 = vadd.f32 %v2980_v59, %v974_v61 }
 0x742   : > { %1037 = vmatpush.msra.mxu3 %v1013_v6 }
 0x743   : > { %v982_v63 = vsel %vm589_vm2, %v3403_v62, 0.0 }
 0x744   : > { %983 = vadd.xlane.f32.xlu2 %v982_v63  ;;  %1038 = vmatpush.msra.mxu3 %v1012_v7 }
 0x7b7   : > { %v984_v0 = vpop.xlane.xlu2 %983 }
 0x7b8   : > { %v985_v1 = vmul.f32 %v984_v0, %v3300_v24 }
 0x7ba   : > { %v986_v2 = vsub.f32 %v3403_v62, %v985_v1  ;;  %v2770_v1 = vld [vmem:[%s4079_s7 + $0x38] sm:$0xff] }
 0x7bb   : > { %1157 = vmatpush.msrb.mxu2 %v2770_v1 }
 0x7bc   : > { %v987_v3 = vmul.f32 %v986_v2, %v986_v2 }
 0x7be   : > { %v988_v4 = vsel %vm589_vm2, %v987_v3, 0.0  ;;  %v2768_v3 = vld [vmem:[%s4079_s7 + $0x28] sm:$0xff] }
 0x7bf   : > { %989 = vadd.xlane.f32.xlu0 %v988_v4  ;;  %v2767_v4 = vld [vmem:[%s4079_s7 + $0x20] sm:$0xff] }
 0x832   : > { %v990_v11 = vpop.xlane.xlu0 %989 }
 0x833   : > { %v991_v12 = vmul.f32 %v990_v11, %v3300_v24 }
 0x835   : > { %v992_v15 = vadd.f32 1e-06, %v991_v12 }
 0x837   : > { %3029 = vrsqrt.f32 %v992_v15  ;;  %vm999_vm0 = vweird.f32 %v992_v15 }
 0x83d   : > { %v3030_v16 = vpop.eup %3029 }
 0x83e   : > { %v994_v17 = vmul.f32 %v3030_v16, %v992_v15  ;;  %vm1000_vm15 = vweird.f32 %v3030_v16 }
 0x83f   : > { %vm1001_vm1 = vmor %vm999_vm0, %vm1000_vm15 }
 0x840   : > { %v995_v18 = vmul.f32 %v3030_v16, %v994_v17  ;;  %v2986_v17 = vld [vmem:[%s4078_s6 + $0x1] ss:$0 sm:$0xff] }
 0x842   : > { %v996_v19 = vmul.f32 0.5, %v995_v18 }
 0x844   : > { %v997_v20 = vsub.f32 1.5, %v996_v19 }
 0x846   : > { %v998_v21 = vmul.f32 %v3030_v16, %v997_v20  ;;  %v2987_v20 = vld [vmem:[%s4080_s8 + $0x1] ss:$0 sm:$0xff] }
 0x848   : > { %v1002_v23 = vsel %vm1001_vm1, %v3030_v16, %v998_v21 }
 0x849   : > { %v1003_v25 = vmul.f32 %v1002_v23, %v986_v2  ;;  %v2769_v2 = vld [vmem:[%s4079_s7 + $0x30] sm:$0xff] }
 0x84a   : > { %1158 = vmatpush.msrb.mxu2 %v2769_v2 }
 0x84b   : > { %v1007_v27 = vmul.f32 %v2981_v22, %v1003_v25 }
 0x84c   : > { %1159 = vmatpush.msrb.mxu2 %v2768_v3 }
 0x84d   : > { %v1011_v28 = vadd.f32 %v2982_v26, %v1007_v27 }
 0x84e   : > { %1160 = vmatpush.msrb.mxu2 %v2767_v4 }
 0x84f   : > { %2763 = vmatmul.msk.f32.vlgmr.msra.gmra.mxu3 %vm635_vm8, %v1011_v28 }
 0x8d2   : > { %v1040_v42 = vpop.f32.mrf.mxu3 }
 0x8d3   : > { %v1041_v43 = vadd.f32 %v2983_v41, %v1040_v42 }
 0x8d5   : > { %v1044_v44 = vmul.f32 0.044715, %v1041_v43  ;;  %v1043_v50 = vmul.f32 0.5, %v1041_v43 }
 0x8d7   : > { %v1045_v45 = vmul.f32 %v1044_v44, %v1041_v43 }
 0x8d9   : > { %v1046_v46 = vmul.f32 %v1045_v45, %v1041_v43 }
 0x8db   : > { %v1047_v47 = vadd.f32 %v1046_v46, %v1041_v43 }
 0x8dd   : > { %v1048_v48 = vmul.f32 0.7978846, %v1047_v47 }
 0x8df   : > { %3031 = vtanh.f32 %v1048_v48 }
 0x8e5   : > { %v3032_v49 = vpop.eup %3031 }
 0x8e6   : > { %v1050_v51 = vadd.f32 1.0, %v3032_v49 }
 0x8e8   : > { %v1051_v52 = vmul.f32 %v1050_v51, %v1043_v50 }
 0x8ea   : > { %1084 = vmatmul.f32.vlgmr.msra.gmra.mxu0 %v1051_v52 }
 0x967   : > { %v1085_v54 = vpop.f32.mrf.mxu0 }
 0x968   : > { %v1088_v55 = vadd.f32 %v1085_v54, %v3403_v62 }
 0x96a   : > { %v3485_v56 = vadd.f32 %v2984_v53, %v1088_v55 }
 0x96c   : > { %v1094_v57 = vperm.slane %v3485_v56, 0  ;;  %v1102_v58 = vsel %vm589_vm2, %v3485_v56, 0.0 }
 0x96d   : > { %1103 = vadd.xlane.f32.xlu1 %v1102_v58 }
 0x96e   : > { %v1095_v59 = vadd.f32 %v1094_v57, %v3485_v56 }
 0x970   : > { %2764 = vst.msk [vmem:[%s3296_s24 + $0x3] sm:$0x1e] %vm585_vm3, %v1095_v59 }
 0x9e0   : > { %v1104_v60 = vpop.xlane.xlu1 %1103 }
 0x9e1   : > { %v1105_v61 = vmul.f32 %v1104_v60, %v3300_v24 }
 0x9e3   : > { %v1106_v63 = vsub.f32 %v3485_v56, %v1105_v61 }
 0x9e5   : > { %v1107_v0 = vmul.f32 %v1106_v63, %v1106_v63 }
 0x9e7   : > { %v1108_v62 = vsel %vm589_vm2, %v1107_v0, 0.0 }
 0x9e8   : > { %1109 = vadd.xlane.f32.xlu2 %v1108_v62 }
 0xa5b   : > { %v1110_v5 = vpop.xlane.xlu2 %1109 }
 0xa5c   : > { %v1111_v14 = vmul.f32 %v1110_v5, %v3300_v24 }
 0xa5e   : > { %v1112_v6 = vadd.f32 1e-06, %v1111_v14 }
 0xa60   : > { %3033 = vrsqrt.f32 %v1112_v6  ;;  %vm1119_vm5 = vweird.f32 %v1112_v6 }
 0xa66   : > { %v3034_v7 = vpop.eup %3033 }
 0xa67   : > { %v1114_v8 = vmul.f32 %v3034_v7, %v1112_v6  ;;  %vm1120_vm4 = vweird.f32 %v3034_v7 }
 0xa68   : > { %vm1121_vm6 = vmor %vm1119_vm5, %vm1120_vm4 }
 0xa69   : > { %v1115_v9 = vmul.f32 %v3034_v7, %v1114_v8 }
 0xa6b   : > { %v1116_v10 = vmul.f32 0.5, %v1115_v9 }
 0xa6d   : > { %v1117_v11 = vsub.f32 1.5, %v1116_v10 }
 0xa6f   : > { %v1118_v12 = vmul.f32 %v3034_v7, %v1117_v11 }
 0xa71   : > { %v1122_v15 = vsel %vm1121_vm6, %v3034_v7, %v1118_v12 }
 0xa72   : > { %v1123_v16 = vmul.f32 %v1122_v15, %v1106_v63 }
 0xa74   : > { %v1127_v18 = vmul.f32 %v2985_v13, %v1123_v16 }
 0xa76   : > { %v1131_v19 = vadd.f32 %v2986_v17, %v1127_v18  ;;  %v2792_v18 = vld [vmem:[%s4150_s9 + $0x38] sm:$0xff] }
 0xa78   : > { %2772 = vmatmul.msk.f32.vlgmr.msrb.gmra.mxu2 %vm635_vm8, %v1131_v19  ;;  %v2791_v19 = vld [vmem:[%s4150_s9 + $0x30] sm:$0xff] }
 0xafb   : > { %v1162_v21 = vpop.f32.mrf.mxu2 }
 0xafc   : > { %v3519_v22 = vadd.f32 %v2987_v20, %v1162_v21  ;;  %v2790_v20 = vld [vmem:[%s4150_s9 + $0x28] sm:$0xff] }
 0xafe   : > { %1231 = vrot.lane.b32.xlu2 %v3519_v22, %s4121_s29  ;;  %1233 = vrot.lane.b32.xlu1 %v3519_v22, %s4119_s1  ;;  %s4163_s29 = smov 120  }
 0xaff   : > { %1166 = vrot.lane.b32.xlu0 %v3519_v22, %s4117_s22  ;;  %s4166_s22 = smov 24  }
 0xb06   : > { %1271 = vrot.lane.b32.xlu2 %v3519_v22, %s4152_s26 }
 0xb58   : > { %v1232_v23 = vpop.permute.xlu2 %1231 }
 0xb60   : > { %v1272_v27 = vpop.permute.xlu2 %1271 }
 0xb70   : > { %v1234_v25 = vpop.permute.xlu1 %1233 }
 0xb71   : > { %v1167_v26 = vpop.permute.xlu0 %1166  ;;  %2777 = vmatpush.xpose.msk.msra.mxu2 %vm662_vm10, %v1234_v25 }
 0xb72   : > { %2773 = vmatpush.xpose.msk.msra.mxu1 %vm662_vm10, %v1167_v26 }
 0xb74   : > { %2778 = vmatmul.msk.f32.vlgmr.msra.gmra.mxu2 %vm662_vm10, %v1232_v23  ;;  %v2789_v23 = vld [vmem:[%s4150_s9 + $0x20] sm:$0xff] }
 0xb75   : > { %2774 = vmatmul.msk.f32.vlgmr.msra.gmra.mxu1 %vm662_vm10, %v3519_v22 }
 0xb76   : > { %2779 = vmatpush.msk.msrb.mxu1 %vm706_vm9, %v1272_v27 }
 0xbf2   : > { %v1189_v28 = vpop.f32.mrf.mxu1 }
 0xbf3   : > { %v1192_v29 = vmul.f32 0.35355338, %v1189_v28 }
 0xbf5   : > { %v1193_v30 = vsel %vm688_vm11, %v1192_v29, -inf }
 0xbf6   : > { %1194 = vmax.xlane.f32.xlu0 %v1193_v30 }
 0xbf7   : > { %v1256_v31 = vpop.f32.mrf.mxu2 }
 0xbf8   : > { %v1259_v32 = vmul.f32 0.35355338, %v1256_v31  ;;  %v2988_v31 = vld [vmem:[%s4151_s10 + $0x1] ss:$0 sm:$0xff]  ;;  %s4165_s10 = smov 96  }
 0xbfa   : > { %v1260_v33 = vsel %vm688_vm11, %v1259_v32, -inf }
 0xbfb   : > { %1261 = vmax.xlane.f32.xlu1 %v1260_v33 }
 0xc0a   : > { %1300 = vrot.lane.b32.xlu0 %v3519_v22, %s4153_s25 }
 0xc14   : > { %1204 = vrot.lane.b32.xlu1 %v3519_v22, %s4154_s17 }
 0xc1c   : > { %1367 = vrot.lane.b32.xlu1 %v3519_v22, %s4155_s19 }
 0xc69   : > { %v1195_v34 = vpop.xlane.xlu0 %1194 }
 0xc6a   : > { %v1196_v35 = vsub.f32 %v1192_v29, %v1195_v34 }
 0xc6c   : > { %v1197_v36 = vmul.f32 1.442695, %v1196_v35 }
 0xc6e   : > { %3035 = vpow2.f32 %v1197_v36  ;;  %v1262_v37 = vpop.xlane.xlu1 %1261 }
 0xc6f   : > { %v1263_v38 = vsub.f32 %v1259_v32, %v1262_v37 }
 0xc71   : > { %v1264_v39 = vmul.f32 1.442695, %v1263_v38 }
 0xc73   : > { %3037 = vpow2.f32 %v1264_v39 }
 0xc74   : > { %v3036_v40 = vpop.eup %3035 }
 0xc75   : > { %v1199_v41 = vsel %vm688_vm11, %v3036_v40, 0.0 }
 0xc76   : > { %1200 = vadd.xlane.f32.xlu2 %v1199_v41  ;;  %v2800_v41 = vld [vmem:[%s4085_s13 + $0x38] sm:$0xff] }
 0xc79   : > { %v3038_v42 = vpop.eup %3037 }
 0xc7a   : > { %v1266_v43 = vsel %vm688_vm11, %v3038_v42, 0.0 }
 0xc7b   : > { %1267 = vadd.xlane.f32.xlu0 %v1266_v43  ;;  %v2797_v43 = vld [vmem:[%s4085_s13 + $0x20] sm:$0xff] }
 0xc7c   : > { %v1301_v45 = vpop.permute.xlu0 %1300 }
 0xc86   : > { %v1205_v44 = vpop.permute.xlu1 %1204 }
 0xc87   : > { %2775 = vmatpush.msk.msrb.mxu3 %vm706_vm9, %v1205_v44  ;;  %v2818_v44 = vld [vmem:[%s4087_s15 + $0xf8] sm:$0xff] }
 0xc89   : > { %2781 = vmatpush.xpose.msk.msra.mxu3 %vm662_vm10, %v1301_v45  ;;  %v2817_v45 = vld [vmem:[%s4087_s15 + $0xf0] sm:$0xff] }
 0xc8e   : > { %1365 = vrot.lane.b32.xlu2 %v3519_v22, %s4156_s28  ;;  %v1368_v46 = vpop.permute.xlu1 %1367 }
 0xc8f   : > { %2785 = vmatpush.xpose.msk.msra.mxu1 %vm662_vm10, %v1368_v46  ;;  %1298 = vrot.lane.b32.xlu0 %v3519_v22, %s4157_s18  ;;  %v2816_v46 = vld [vmem:[%s4087_s15 + $0xe8] sm:$0xff] }
 0xce9   : > { %v1201_v47 = vpop.xlane.xlu2 %1200 }
 0xcea   : > { %3039 = vrcp.f32 %v1201_v47 }
 0xcee   : > { %v1268_v48 = vpop.xlane.xlu0 %1267 }
 0xcef   : > { %3041 = vrcp.f32 %v1268_v48 }
 0xcf0   : > { %v3040_v49 = vpop.eup %3039 }
 0xcf1   : > { %v1203_v50 = vmul.f32 %v3040_v49, %v3036_v40  ;;  %v1366_v53 = vpop.permute.xlu2 %1365  ;;  %v2815_v49 = vld [vmem:[%s4087_s15 + $0xe0] sm:$0xff] }
 0xcf3   : > { %2776 = vmatmul.msk.f32.vlgmr.msrb.gmra.mxu3 %vm702_vm12, %v1203_v50 }
 0xcf5   : > { %v3042_v51 = vpop.eup %3041 }
 0xcf6   : > { %v1270_v52 = vmul.f32 %v3042_v51, %v3038_v42  ;;  %v2798_v42 = vld [vmem:[%s4085_s13 + $0x28] sm:$0xff] }
 0xcf8   : > { %2780 = vmatmul.msk.f32.vlgmr.msrb.gmra.mxu1 %vm702_vm12, %v1270_v52 }
 0xcf9   : > { %1541 = vmatpush.msrb.mxu1 %v2800_v41 }
 0xd00   : > { %2786 = vmatmul.msk.f32.vlgmr.msra.gmra.mxu1 %vm662_vm10, %v1366_v53 }
 0xd01   : > { %v1299_v54 = vpop.permute.xlu0 %1298 }
 0xd02   : > { %2782 = vmatmul.msk.f32.vlgmr.msra.gmra.mxu3 %vm662_vm10, %v1299_v54 }
 0xd75   : > { %v1295_v55 = vpop.f32.mrf.mxu1 }
 0xd76   : > { %v1228_v57 = vpop.f32.mrf.mxu3 }
 0xd7d   : > { %v1390_v58 = vpop.f32.mrf.mxu1 }
 0xd7e   : > { %v1393_v59 = vmul.f32 0.35355338, %v1390_v58  ;;  %v2989_v58 = vld [vmem:[%s4083_s11 + $0x1] ss:$0 sm:$0xff] }
 0xd80   : > { %v1394_v60 = vsel %vm688_vm11, %v1393_v59, -inf }
 0xd81   : > { %1395 = vmax.xlane.f32.xlu1 %v1394_v60 }
 0xd85   : > { %v1323_v61 = vpop.f32.mrf.mxu3 }
 0xd86   : > { %v1326_v63 = vmul.f32 0.35355338, %v1323_v61  ;;  %v2990_v61 = vld [vmem:[%s4084_s12 + $0x1] ss:$0 sm:$0xff] }
 0xd88   : > { %v1327_v0 = vsel %vm688_vm11, %v1326_v63, -inf }
 0xd89   : > { %1328 = vmax.xlane.f32.xlu0 %v1327_v0 }
 0xd9a   : > { %1338 = vrot.lane.b32.xlu1 %v3519_v22, %s4158_s21 }
 0xdf4   : > { %v1396_v62 = vpop.xlane.xlu1 %1395 }
 0xdf5   : > { %v1397_v1 = vsub.f32 %v1393_v59, %v1396_v62  ;;  %v2814_v62 = vld [vmem:[%s4087_s15 + $0xd8] sm:$0xff] }
 0xdf7   : > { %v1398_v2 = vmul.f32 1.442695, %v1397_v1  ;;  %v2813_v1 = vld [vmem:[%s4087_s15 + $0xd0] sm:$0xff] }
 0xdf9   : > { %3043 = vpow2.f32 %v1398_v2  ;;  %v2812_v2 = vld [vmem:[%s4087_s15 + $0xc8] sm:$0xff] }
 0xdfc   : > { %v1329_v3 = vpop.xlane.xlu0 %1328 }
 0xdfd   : > { %v1330_v4 = vsub.f32 %v1326_v63, %v1329_v3  ;;  %v2811_v3 = vld [vmem:[%s4087_s15 + $0xc0] sm:$0xff] }
 0xdff   : > { %v3044_v5 = vpop.eup %3043  ;;  %v1331_v14 = vmul.f32 1.442695, %v1330_v4  ;;  %v2810_v4 = vld [vmem:[%s4087_s15 + $0xb8] sm:$0xff] }
 0xe00   : > { %v1400_v6 = vsel %vm688_vm11, %v3044_v5, 0.0 }
 0xe01   : > { %3045 = vpow2.f32 %v1331_v14  ;;  %1401 = vadd.xlane.f32.xlu0 %v1400_v6  ;;  %v2808_v14 = vld [vmem:[%s4087_s15 + $0xa8] sm:$0xff]  ;;  %v2807_v6 = vld [vmem:[%s4087_s15 + $0xa0] sm:$0xff] }
 0xe07   : > { %v3046_v7 = vpop.eup %3045 }
 0xe08   : > { %v1333_v8 = vsel %vm688_vm11, %v3046_v7, 0.0 }
 0xe09   : > { %1334 = vadd.xlane.f32.xlu2 %v1333_v8  ;;  %v2805_v8 = vld [vmem:[%s4087_s15 + $0x90] sm:$0xff] }
 0xe0c   : > { %v1339_v9 = vpop.permute.xlu1 %1338 }
 0xe0d   : > { %2783 = vmatpush.msk.msrb.mxu2 %vm706_vm9, %v1339_v9  ;;  %v2804_v9 = vld [vmem:[%s4087_s15 + $0x88] sm:$0xff] }
 0xe0f   : > { %1467 = vmatpush.msra.mxu2 %v2792_v18 }
 0xe11   : > { %1468 = vmatpush.msra.mxu2 %v2791_v19 }
 0xe13   : > { %1469 = vmatpush.msra.mxu2 %v2790_v20 }
 0xe15   : > { %1433 = vrot.lane.b32.xlu0 %v1295_v55, %s4159_s23  ;;  %1470 = vmatpush.msra.mxu2 %v2789_v23 }
 0xe21   : > { %1405 = vrot.lane.b32.xlu2 %v3519_v22, %s4160_s0 }
 0xe74   : > { %v1402_v10 = vpop.xlane.xlu0 %1401 }
 0xe75   : > { %3047 = vrcp.f32 %v1402_v10  ;;  %v2803_v10 = vld [vmem:[%s4087_s15 + $0x80] sm:$0xff] }
 0xe7b   : > { %v3048_v12 = vpop.eup %3047 }
 0xe7c   : > { %v1335_v11 = vpop.xlane.xlu2 %1334  ;;  %v1404_v15 = vmul.f32 %v3048_v12, %v3044_v5  ;;  %v2809_v5 = vld [vmem:[%s4087_s15 + $0xb0] sm:$0xff] }
 0xe7d   : > { %3049 = vrcp.f32 %v1335_v11  ;;  %v2991_v11 = vld [vmem:[%s4086_s14 + $0x1] ss:$0 sm:$0xff] }
 0xe83   : > { %v3050_v13 = vpop.eup %3049 }
 0xe84   : > { %v1337_v16 = vmul.f32 %v3050_v13, %v3046_v7  ;;  %v1406_v17 = vpop.permute.xlu2 %1405  ;;  %v2806_v7 = vld [vmem:[%s4087_s15 + $0x98] sm:$0xff] }
 0xe85   : > { %2787 = vmatpush.msk.msrb.mxu3 %vm706_vm9, %v1406_v17 }
 0xe86   : > { %2784 = vmatmul.msk.f32.vlgmr.msrb.gmra.mxu2 %vm702_vm12, %v1337_v16  ;;  %2788 = vmatmul.msk.f32.vlgmr.msrb.gmra.mxu3 %vm702_vm12, %v1404_v15 }
 0xe87   : > { %v1434_v25 = vpop.permute.xlu0 %1433  ;;  %1575 = vmatpush.msra.mxu3 %v2818_v44 }
 0xe88   : > { %v1444_v26 = vsel %vm662_vm10, %v1228_v57, %v1434_v25  ;;  %v2992_v25 = vld [vmem:[%s4088_s16 + $0x1] ss:$0 sm:$0xff] }
 0xe89   : > { %1576 = vmatpush.msra.mxu3 %v2817_v45 }
 0xe8b   : > { %1577 = vmatpush.msra.mxu3 %v2816_v46 }
 0xe8d   : > { %1578 = vmatpush.msra.mxu3 %v2815_v49  ;;  %v2993_v49 = vld [vmem:[%s4077_s5 + $0x2] ss:$0 sm:$0xff] }
 0xe8f   : > { %1579 = vmatpush.msra.mxu3 %v2814_v62 }
 0xe91   : > { %1580 = vmatpush.msra.mxu3 %v2813_v1 }
 0xe93   : > { %1581 = vmatpush.msra.mxu3 %v2812_v2 }
 0xe95   : > { %1582 = vmatpush.msra.mxu3 %v2811_v3 }
 0xe97   : > { %1583 = vmatpush.msra.mxu3 %v2810_v4 }
 0xe99   : > { %1584 = vmatpush.msra.mxu3 %v2809_v5 }
 0xe9b   : > { %1585 = vmatpush.msra.mxu3 %v2808_v14 }
 0xe9d   : > { %1586 = vmatpush.msra.mxu3 %v2807_v6 }
 0xe9f   : > { %1587 = vmatpush.msra.mxu3 %v2806_v7 }
 0xea1   : > { %1588 = vmatpush.msra.mxu3 %v2805_v8 }
 0xea3   : > { %1589 = vmatpush.msra.mxu3 %v2804_v9 }
 0xea5   : > { %1590 = vmatpush.msra.mxu3 %v2803_v10 }
 0xf09   : > { %v1362_v21 = vpop.f32.mrf.mxu2  ;;  %v1429_v22 = vpop.f32.mrf.mxu3 }
 0xf0a   : > { %1437 = vrot.lane.b32.xlu0 %v1362_v21, %s4161_s4  ;;  %1441 = vrot.lane.b32.xlu1 %v1429_v22, %s4162_s20  ;;  %s4168_s20 = sld [smem:[#allocation14_spill]] }
 0xf7c   : > { %v1442_v27 = vpop.permute.xlu1 %1441  ;;  %v1438_v28 = vpop.permute.xlu0 %1437 }
 0xf7d   : > { %v1445_v29 = vsel %vm943_vm13, %v1444_v26, %v1438_v28 }
 0xf7e   : > { %v1446_v30 = vsel %vm945_vm14, %v1445_v29, %v1442_v27 }
 0xf7f   : > { %2793 = vmatmul.msk.f32.vlgmr.msra.gmra.mxu2 %vm635_vm8, %v1446_v30 }
0x1002   : > { %v1472_v32 = vpop.f32.mrf.mxu2 }
0x1003   : > { %v1475_v33 = vadd.f32 %v1472_v32, %v3485_v56  ;;  %v2799_v56 = vld [vmem:[%s4085_s13 + $0x30] sm:$0xff] }
0x1004   : > { %1542 = vmatpush.msrb.mxu1 %v2799_v56 }
0x1005   : > { %v3591_v34 = vadd.f32 %v2988_v31, %v1475_v33 }
0x1006   : > { %1543 = vmatpush.msrb.mxu1 %v2798_v42 }
0x1007   : > { %v1486_v35 = vsel %vm589_vm2, %v3591_v34, 0.0 }
0x1008   : > { %1487 = vadd.xlane.f32.xlu2 %v1486_v35  ;;  %1544 = vmatpush.msrb.mxu1 %v2797_v43 }
0x107b   : > { %v1488_v36 = vpop.xlane.xlu2 %1487 }
0x107c   : > { %v1489_v37 = vmul.f32 %v1488_v36, %v3300_v24 }
0x107e   : > { %v1490_v38 = vsub.f32 %v3591_v34, %v1489_v37  ;;  %v2826_v37 = vld [vmem:[%s4079_s7 + $0x58] sm:$0xff] }
0x107f   : > { %1665 = vmatpush.msrb.mxu0 %v2826_v37 }
0x1080   : > { %v1491_v39 = vmul.f32 %v1490_v38, %v1490_v38 }
0x1082   : > { %v1492_v40 = vsel %vm589_vm2, %v1491_v39, 0.0  ;;  %v2824_v39 = vld [vmem:[%s4079_s7 + $0x48] sm:$0xff] }
0x1083   : > { %1493 = vadd.xlane.f32.xlu0 %v1492_v40  ;;  %v2823_v40 = vld [vmem:[%s4079_s7 + $0x40] sm:$0xff] }
0x10f6   : > { %v1494_v47 = vpop.xlane.xlu0 %1493 }
0x10f7   : > { %v1495_v48 = vmul.f32 %v1494_v47, %v3300_v24 }
0x10f9   : > { %v1496_v50 = vadd.f32 1e-06, %v1495_v48 }
0x10fb   : > { %3051 = vrsqrt.f32 %v1496_v50  ;;  %vm1503_vm15 = vweird.f32 %v1496_v50 }
0x1101   : > { %v3052_v51 = vpop.eup %3051 }
0x1102   : > { %v1498_v52 = vmul.f32 %v3052_v51, %v1496_v50  ;;  %vm1504_vm7 = vweird.f32 %v3052_v51 }
0x1103   : > { %vm1505_vm0 = vmor %vm1503_vm15, %vm1504_vm7 }
0x1104   : > { %v1499_v53 = vmul.f32 %v3052_v51, %v1498_v52  ;;  %v2994_v52 = vld [vmem:[%s4078_s6 + $0x2] ss:$0 sm:$0xff] }
0x1106   : > { %v1500_v54 = vmul.f32 0.5, %v1499_v53 }
0x1108   : > { %v1501_v55 = vsub.f32 1.5, %v1500_v54 }
0x110a   : > { %v1502_v57 = vmul.f32 %v3052_v51, %v1501_v55  ;;  %v2995_v55 = vld [vmem:[%s4080_s8 + $0x2] ss:$0 sm:$0xff] }
0x110c   : > { %v1506_v59 = vsel %vm1505_vm0, %v3052_v51, %v1502_v57 }
0x110d   : > { %v1507_v60 = vmul.f32 %v1506_v59, %v1490_v38  ;;  %v2825_v38 = vld [vmem:[%s4079_s7 + $0x50] sm:$0xff] }
0x110e   : > { %1666 = vmatpush.msrb.mxu0 %v2825_v38 }
0x110f   : > { %v1511_v63 = vmul.f32 %v2989_v58, %v1507_v60 }
0x1110   : > { %1667 = vmatpush.msrb.mxu0 %v2824_v39 }
0x1111   : > { %v1515_v0 = vadd.f32 %v2990_v61, %v1511_v63 }
0x1112   : > { %1668 = vmatpush.msrb.mxu0 %v2823_v40 }
0x1113   : > { %2802 = vmatmul.msk.f32.vlgmr.msrb.gmra.mxu1 %vm635_vm8, %v1515_v0 }
0x1190   : > { %v1546_v12 = vpop.f32.mrf.mxu1 }
0x1191   : > { %v1547_v13 = vadd.f32 %v2991_v11, %v1546_v12 }
0x1193   : > { %v1550_v15 = vmul.f32 0.044715, %v1547_v13  ;;  %v1549_v21 = vmul.f32 0.5, %v1547_v13 }
0x1195   : > { %v1551_v16 = vmul.f32 %v1550_v15, %v1547_v13 }
0x1197   : > { %v1552_v17 = vmul.f32 %v1551_v16, %v1547_v13 }
0x1199   : > { %v1553_v18 = vadd.f32 %v1552_v17, %v1547_v13 }
0x119b   : > { %v1554_v19 = vmul.f32 0.7978846, %v1553_v18 }
0x119d   : > { %3053 = vtanh.f32 %v1554_v19 }
0x11a3   : > { %v3054_v20 = vpop.eup %3053 }
0x11a4   : > { %v1556_v22 = vadd.f32 1.0, %v3054_v20 }
0x11a6   : > { %v1557_v23 = vmul.f32 %v1556_v22, %v1549_v21 }
0x11a8   : > { %1591 = vmatmul.f32.vlgmr.msra.gmra.mxu3 %v1557_v23 }
0x122b   : > { %v1592_v26 = vpop.f32.mrf.mxu3 }
0x122c   : > { %v1595_v27 = vadd.f32 %v1592_v26, %v3591_v34 }
0x122e   : > { %v3673_v28 = vadd.f32 %v2992_v25, %v1595_v27 }
0x1230   : > { %v1602_v29 = vperm.slane %v3673_v28, 0  ;;  %v1610_v30 = vsel %vm589_vm2, %v3673_v28, 0.0 }
0x1231   : > { %1611 = vadd.xlane.f32.xlu1 %v1610_v30 }
0x1232   : > { %v1603_v31 = vadd.f32 %v1602_v29, %v3673_v28 }
0x1234   : > { %2820 = vst.msk [vmem:[%s3296_s24 + $0x7] sm:$0x1e] %vm585_vm3, %v1603_v31 }
0x12a4   : > { %v1612_v32 = vpop.xlane.xlu1 %1611 }
0x12a5   : > { %v1613_v33 = vmul.f32 %v1612_v32, %v3300_v24 }
0x12a7   : > { %v1614_v35 = vsub.f32 %v3673_v28, %v1613_v33 }
0x12a9   : > { %v1615_v36 = vmul.f32 %v1614_v35, %v1614_v35 }
0x12ab   : > { %v1616_v34 = vsel %vm589_vm2, %v1615_v36, 0.0 }
0x12ac   : > { %1617 = vadd.xlane.f32.xlu2 %v1616_v34 }
0x131f   : > { %v1618_v41 = vpop.xlane.xlu2 %1617 }
0x1320   : > { %v1619_v56 = vmul.f32 %v1618_v41, %v3300_v24 }
0x1322   : > { %v1620_v42 = vadd.f32 1e-06, %v1619_v56 }
0x1324   : > { %3055 = vrsqrt.f32 %v1620_v42  ;;  %vm1627_vm4 = vweird.f32 %v1620_v42 }
0x132a   : > { %v3056_v43 = vpop.eup %3055 }
0x132b   : > { %v1622_v44 = vmul.f32 %v3056_v43, %v1620_v42  ;;  %vm1628_vm1 = vweird.f32 %v3056_v43 }
0x132c   : > { %vm1629_vm5 = vmor %vm1627_vm4, %vm1628_vm1 }
0x132d   : > { %v1623_v45 = vmul.f32 %v3056_v43, %v1622_v44 }
0x132f   : > { %v1624_v46 = vmul.f32 0.5, %v1623_v45 }
0x1331   : > { %v1625_v47 = vsub.f32 1.5, %v1624_v46 }
0x1333   : > { %v1626_v48 = vmul.f32 %v3056_v43, %v1625_v47 }
0x1335   : > { %v1630_v50 = vsel %vm1629_vm5, %v3056_v43, %v1626_v48 }
0x1336   : > { %v1631_v51 = vmul.f32 %v1630_v50, %v1614_v35 }
0x1338   : > { %v1635_v53 = vmul.f32 %v2993_v49, %v1631_v51 }
0x133a   : > { %v1639_v54 = vadd.f32 %v2994_v52, %v1635_v53 }
0x133c   : > { %2828 = vmatmul.msk.f32.vlgmr.msrb.gmra.mxu0 %vm635_vm8, %v1639_v54 }
0x13b9   : > { %v1670_v57 = vpop.f32.mrf.mxu0 }
0x13ba   : > { %v3707_v58 = vadd.f32 %v2995_v55, %v1670_v57  ;;  %v2848_v55 = vld [vmem:[%s4167_s2 + $0x58] sm:$0xff]  ;;  %v2847_v57 = vld [vmem:[%s4167_s2 + $0x50] sm:$0xff] }
0x13bc   : > { %1739 = vrot.lane.b32.xlu1 %v3707_v58, %s4163_s29  ;;  %1741 = vrot.lane.b32.xlu0 %v3707_v58, %s4164_s30 }
0x13bd   : > { %1674 = vrot.lane.b32.xlu2 %v3707_v58, %s4165_s10 }
0x13c4   : > { %1712 = vrot.lane.b32.xlu1 %v3707_v58, %s4154_s17 }
0x1417   : > { %v1675_v59 = vpop.permute.xlu2 %1674 }
0x1418   : > { %2829 = vmatpush.xpose.msk.msrb.mxu2 %vm662_vm10, %v1675_v59  ;;  %v2845_v59 = vld [vmem:[%s4167_s2 + $0x40] sm:$0xff] }
0x141b   : > { %2830 = vmatmul.msk.f32.vlgmr.msrb.gmra.mxu2 %vm662_vm10, %v3707_v58 }
0x142e   : > { %v1740_v60 = vpop.permute.xlu1 %1739  ;;  %v1742_v61 = vpop.permute.xlu0 %1741 }
0x142f   : > { %2833 = vmatpush.xpose.msk.msra.mxu0 %vm662_vm10, %v1742_v61 }
0x1432   : > { %2834 = vmatmul.msk.f32.vlgmr.msra.gmra.mxu0 %vm662_vm10, %v1740_v60 }
0x1436   : > { %v1713_v63 = vpop.permute.xlu1 %1712 }
0x1437   : > { %2831 = vmatpush.msk.msra.mxu1 %vm706_vm9, %v1713_v63 }
0x149e   : > { %v1697_v0 = vpop.f32.mrf.mxu2 }
0x149f   : > { %v1700_v62 = vmul.f32 0.35355338, %v1697_v0 }
0x14a1   : > { %v1701_v1 = vsel %vm688_vm11, %v1700_v62, -inf }
0x14a2   : > { %1702 = vmax.xlane.f32.xlu2 %v1701_v1 }
0x14af   : > { %v1764_v2 = vpop.f32.mrf.mxu0 }
0x14b0   : > { %v1767_v3 = vmul.f32 0.35355338, %v1764_v2  ;;  %v2996_v2 = vld [vmem:[%s4168_s20 + $0x2] ss:$0 sm:$0xff] }
0x14b2   : > { %v1768_v4 = vsel %vm688_vm11, %v1767_v3, -inf }
0x14b3   : > { %1769 = vmax.xlane.f32.xlu0 %v1768_v4 }
0x14ba   : > { %1779 = vrot.lane.b32.xlu2 %v3707_v58, %s4152_s26 }
0x14c2   : > { %1873 = vrot.lane.b32.xlu2 %v3707_v58, %s4156_s28 }
0x14c7   : > { %1875 = vrot.lane.b32.xlu0 %v3707_v58, %s4155_s19 }
0x1515   : > { %v1703_v5 = vpop.xlane.xlu2 %1702 }
0x1516   : > { %v1704_v14 = vsub.f32 %v1700_v62, %v1703_v5 }
0x1518   : > { %v1705_v6 = vmul.f32 1.442695, %v1704_v14 }
0x151a   : > { %3057 = vpow2.f32 %v1705_v6 }
0x151d   : > { %v1780_v7 = vpop.permute.xlu2 %1779 }
0x151e   : > { %2835 = vmatpush.msk.msra.mxu2 %vm706_vm9, %v1780_v7 }
0x1520   : > { %v3058_v8 = vpop.eup %3057 }
0x1521   : > { %v1707_v9 = vsel %vm688_vm11, %v3058_v8, 0.0 }
0x1522   : > { %1708 = vadd.xlane.f32.xlu0 %v1707_v9 }
0x1525   : > { %v1874_v25 = vpop.permute.xlu2 %1873 }
0x1526   : > { %v1770_v10 = vpop.xlane.xlu0 %1769 }
0x1527   : > { %v1771_v11 = vsub.f32 %v1767_v3, %v1770_v10 }
0x1529   : > { %v1772_v12 = vmul.f32 1.442695, %v1771_v11  ;;  %v2856_v11 = vld [vmem:[%s4085_s13 + $0x58] sm:$0xff] }
0x152b   : > { %3059 = vpow2.f32 %v1772_v12  ;;  %v2854_v12 = vld [vmem:[%s4085_s13 + $0x48] sm:$0xff] }
0x1531   : > { %v3060_v13 = vpop.eup %3059 }
0x1532   : > { %v1774_v15 = vsel %vm688_vm11, %v3060_v13, 0.0 }
0x1533   : > { %1775 = vadd.xlane.f32.xlu1 %v1774_v15  ;;  %v2874_v15 = vld [vmem:[%s4087_s15 + $0x178] sm:$0xff] }
0x1536   : > { %1808 = vrot.lane.b32.xlu0 %v3707_v58, %s4153_s25 }
0x1539   : > { %v1876_v16 = vpop.permute.xlu0 %1875 }
0x153a   : > { %2841 = vmatpush.xpose.msk.msrb.mxu2 %vm662_vm10, %v1876_v16  ;;  %v2873_v16 = vld [vmem:[%s4087_s15 + $0x170] sm:$0xff] }
0x154c   : > { %1806 = vrot.lane.b32.xlu1 %v3707_v58, %s4157_s18 }
0x1595   : > { %v1709_v17 = vpop.xlane.xlu0 %1708 }
0x1596   : > { %3061 = vrcp.f32 %v1709_v17  ;;  %v2872_v17 = vld [vmem:[%s4087_s15 + $0x168] sm:$0xff] }
0x159c   : > { %v3062_v18 = vpop.eup %3061 }
0x159d   : > { %v1711_v19 = vmul.f32 %v3062_v18, %v3058_v8 }
0x159f   : > { %2832 = vmatmul.msk.f32.vlgmr.msra.gmra.mxu1 %vm702_vm12, %v1711_v19 }
0x15a6   : > { %v1776_v20 = vpop.xlane.xlu1 %1775 }
0x15a7   : > { %3063 = vrcp.f32 %v1776_v20  ;;  %v2871_v20 = vld [vmem:[%s4087_s15 + $0x160] sm:$0xff] }
0x15a8   : > { %v1809_v21 = vpop.permute.xlu0 %1808 }
0x15a9   : > { %2837 = vmatpush.xpose.msk.msrb.mxu1 %vm662_vm10, %v1809_v21 }
0x15ad   : > { %v3064_v22 = vpop.eup %3063 }
0x15ae   : > { %v1778_v23 = vmul.f32 %v3064_v22, %v3060_v13  ;;  %v2853_v13 = vld [vmem:[%s4085_s13 + $0x40] sm:$0xff] }
0x15b0   : > { %2836 = vmatmul.msk.f32.vlgmr.msra.gmra.mxu2 %vm702_vm12, %v1778_v23 }
0x15b1   : > { %2049 = vmatpush.msra.mxu2 %v2856_v11 }
0x15b8   : > { %2842 = vmatmul.msk.f32.vlgmr.msrb.gmra.mxu2 %vm662_vm10, %v1874_v25 }
0x15be   : > { %v1807_v26 = vpop.permute.xlu1 %1806 }
0x15bf   : > { %2838 = vmatmul.msk.f32.vlgmr.msrb.gmra.mxu1 %vm662_vm10, %v1807_v26 }
0x161c   : > { %v1736_v29 = vpop.f32.mrf.mxu1 }
0x1633   : > { %v1803_v27 = vpop.f32.mrf.mxu2 }
0x163b   : > { %v1898_v30 = vpop.f32.mrf.mxu2 }
0x163c   : > { %v1901_v31 = vmul.f32 0.35355338, %v1898_v30  ;;  %v1831_v32 = vpop.f32.mrf.mxu1  ;;  %v2997_v30 = vld [vmem:[%s4083_s11 + $0x2] ss:$0 sm:$0xff] }
0x163d   : > { %v1834_v33 = vmul.f32 0.35355338, %v1831_v32 }
0x163e   : > { %v1902_v35 = vsel %vm688_vm11, %v1901_v31, -inf }
0x163f   : > { %1903 = vmax.xlane.f32.xlu0 %v1902_v35  ;;  %v1835_v36 = vsel %vm688_vm11, %v1834_v33, -inf }
0x1640   : > { %1836 = vmax.xlane.f32.xlu2 %v1835_v36 }
0x1653   : > { %1846 = vrot.lane.b32.xlu0 %v3707_v58, %s4158_s21 }
0x16b2   : > { %v1904_v34 = vpop.xlane.xlu0 %1903 }
0x16b3   : > { %v1905_v37 = vsub.f32 %v1901_v31, %v1904_v34  ;;  %v1837_v38 = vpop.xlane.xlu2 %1836  ;;  %v2870_v34 = vld [vmem:[%s4087_s15 + $0x158] sm:$0xff] }
0x16b4   : > { %v1838_v39 = vsub.f32 %v1834_v33, %v1837_v38  ;;  %v2998_v33 = vld [vmem:[%s4084_s12 + $0x2] ss:$0 sm:$0xff]  ;;  %v2868_v38 = vld [vmem:[%s4087_s15 + $0x148] sm:$0xff] }
0x16b5   : > { %v1906_v40 = vmul.f32 1.442695, %v1905_v37  ;;  %v2869_v37 = vld [vmem:[%s4087_s15 + $0x150] sm:$0xff] }
0x16b6   : > { %v1839_v41 = vmul.f32 1.442695, %v1838_v39  ;;  %v2867_v39 = vld [vmem:[%s4087_s15 + $0x140] sm:$0xff] }
0x16b7   : > { %3065 = vpow2.f32 %v1906_v40  ;;  %v2866_v40 = vld [vmem:[%s4087_s15 + $0x138] sm:$0xff] }
0x16b8   : > { %3067 = vpow2.f32 %v1839_v41  ;;  %v2865_v41 = vld [vmem:[%s4087_s15 + $0x130] sm:$0xff] }
0x16bd   : > { %v3066_v56 = vpop.eup %3065 }
0x16be   : > { %v3068_v42 = vpop.eup %3067  ;;  %v1908_v43 = vsel %vm688_vm11, %v3066_v56, 0.0 }
0x16bf   : > { %1909 = vadd.xlane.f32.xlu2 %v1908_v43  ;;  %v1841_v44 = vsel %vm688_vm11, %v3068_v42, 0.0  ;;  %v2862_v43 = vld [vmem:[%s4087_s15 + $0x118] sm:$0xff] }
0x16c0   : > { %1842 = vadd.xlane.f32.xlu1 %v1841_v44  ;;  %v2861_v44 = vld [vmem:[%s4087_s15 + $0x110] sm:$0xff] }
0x16c5   : > { %v1847_v45 = vpop.permute.xlu0 %1846 }
0x16c6   : > { %2839 = vmatpush.msk.msrb.mxu0 %vm706_vm9, %v1847_v45  ;;  %v2860_v45 = vld [vmem:[%s4087_s15 + $0x108] sm:$0xff] }
0x16c8   : > { %1975 = vmatpush.msra.mxu0 %v2848_v55 }
0x16ca   : > { %1976 = vmatpush.msra.mxu0 %v2847_v57 }
0x16d7   : > { %1941 = vrot.lane.b32.xlu2 %v1803_v27, %s4159_s23 }
0x16d9   : > { %1913 = vrot.lane.b32.xlu1 %v3707_v58, %s4160_s0  ;;  %v2846_v58 = vld [vmem:[%s4167_s2 + $0x48] sm:$0xff]  ;;  %s4174_s2 = sld [smem:[#allocation14_spill]] }
0x16da   : > { %1977 = vmatpush.msra.mxu0 %v2846_v58 }
0x16dc   : > { %1978 = vmatpush.msra.mxu0 %v2845_v59 }
0x1732   : > { %v1910_v49 = vpop.xlane.xlu2 %1909 }
0x1733   : > { %v1843_v46 = vpop.xlane.xlu1 %1842 }
0x1734   : > { %3069 = vrcp.f32 %v1843_v46  ;;  %v2859_v46 = vld [vmem:[%s4087_s15 + $0x100] sm:$0xff] }
0x1735   : > { %3071 = vrcp.f32 %v1910_v49 }
0x173a   : > { %v3070_v47 = vpop.eup %3069  ;;  %v1942_v60 = vpop.permute.xlu2 %1941 }
0x173b   : > { %v1845_v48 = vmul.f32 %v3070_v47, %v3068_v42  ;;  %v3072_v50 = vpop.eup %3071  ;;  %v1952_v63 = vsel %vm662_vm10, %v1736_v29, %v1942_v60  ;;  %v2863_v42 = vld [vmem:[%s4087_s15 + $0x120] sm:$0xff] }
0x173c   : > { %v1912_v51 = vmul.f32 %v3072_v50, %v3066_v56  ;;  %v2864_v56 = vld [vmem:[%s4087_s15 + $0x128] sm:$0xff]  ;;  %v2999_v47 = vld [vmem:[%s4086_s14 + $0x2] ss:$0 sm:$0xff] }
0x173d   : > { %2840 = vmatmul.msk.f32.vlgmr.msrb.gmra.mxu0 %vm702_vm12, %v1845_v48  ;;  %v3000_v60 = vld [vmem:[%s4088_s16 + $0x2] ss:$0 sm:$0xff] }
0x174b   : > { %v1914_v52 = vpop.permute.xlu1 %1913 }
0x174c   : > { %2843 = vmatpush.msk.msra.mxu1 %vm706_vm9, %v1914_v52 }
0x174d   : > { %2844 = vmatmul.msk.f32.vlgmr.msra.gmra.mxu1 %vm702_vm12, %v1912_v51 }
0x174e   : > { %2083 = vmatpush.msrb.mxu1 %v2874_v15 }
0x1750   : > { %2084 = vmatpush.msrb.mxu1 %v2873_v16 }
0x1752   : > { %2085 = vmatpush.msrb.mxu1 %v2872_v17 }
0x1754   : > { %2086 = vmatpush.msrb.mxu1 %v2871_v20  ;;  %v3001_v20 = vld [vmem:[%s4077_s5 + $0x3] ss:$0 sm:$0xff] }
0x1756   : > { %2087 = vmatpush.msrb.mxu1 %v2870_v34 }
0x1758   : > { %2088 = vmatpush.msrb.mxu1 %v2869_v37 }
0x175a   : > { %2089 = vmatpush.msrb.mxu1 %v2868_v38 }
0x175c   : > { %2090 = vmatpush.msrb.mxu1 %v2867_v39 }
0x175e   : > { %2091 = vmatpush.msrb.mxu1 %v2866_v40 }
0x1760   : > { %2092 = vmatpush.msrb.mxu1 %v2865_v41 }
0x1762   : > { %2093 = vmatpush.msrb.mxu1 %v2864_v56 }
0x1764   : > { %2094 = vmatpush.msrb.mxu1 %v2863_v42 }
0x1766   : > { %2095 = vmatpush.msrb.mxu1 %v2862_v43 }
0x1768   : > { %2096 = vmatpush.msrb.mxu1 %v2861_v44 }
0x176a   : > { %2097 = vmatpush.msrb.mxu1 %v2860_v45 }
0x176c   : > { %2098 = vmatpush.msrb.mxu1 %v2859_v46 }
0x17ba   : > { %v1870_v53 = vpop.f32.mrf.mxu0 }
0x17bb   : > { %1945 = vrot.lane.b32.xlu0 %v1870_v53, %s4161_s4 }
0x17ca   : > { %v1937_v54 = vpop.f32.mrf.mxu1 }
0x17cb   : > { %1949 = vrot.lane.b32.xlu1 %v1937_v54, %s4166_s22 }
0x182d   : > { %v1946_v61 = vpop.permute.xlu0 %1945 }
0x182e   : > { %v1953_v0 = vsel %vm943_vm13, %v1952_v63, %v1946_v61 }
0x183d   : > { %v1950_v62 = vpop.permute.xlu1 %1949 }
0x183e   : > { %v1954_v1 = vsel %vm945_vm14, %v1953_v0, %v1950_v62 }
0x183f   : > { %2849 = vmatmul.msk.f32.vlgmr.msra.gmra.mxu0 %vm635_vm8, %v1954_v1 }
0x18bc   : > { %v1980_v3 = vpop.f32.mrf.mxu0 }
0x18bd   : > { %v1983_v4 = vadd.f32 %v1980_v3, %v3673_v28  ;;  %v2855_v28 = vld [vmem:[%s4085_s13 + $0x50] sm:$0xff] }
0x18be   : > { %2050 = vmatpush.msra.mxu2 %v2855_v28 }
0x18bf   : > { %v3779_v5 = vadd.f32 %v2996_v2, %v1983_v4 }
0x18c0   : > { %2051 = vmatpush.msra.mxu2 %v2854_v12 }
0x18c1   : > { %v1994_v14 = vsel %vm589_vm2, %v3779_v5, 0.0 }
0x18c2   : > { %1995 = vadd.xlane.f32.xlu0 %v1994_v14  ;;  %2052 = vmatpush.msra.mxu2 %v2853_v13 }
0x1935   : > { %v1996_v6 = vpop.xlane.xlu0 %1995 }
0x1936   : > { %v1997_v7 = vmul.f32 %v1996_v6, %v3300_v24 }
0x1938   : > { %v1998_v8 = vsub.f32 %v3779_v5, %v1997_v7  ;;  %v2882_v7 = vld [vmem:[%s4079_s7 + $0x78] sm:$0xff] }
0x1939   : > { %2173 = vmatpush.msrb.mxu3 %v2882_v7 }
0x193a   : > { %v1999_v9 = vmul.f32 %v1998_v8, %v1998_v8 }
0x193c   : > { %v2000_v10 = vsel %vm589_vm2, %v1999_v9, 0.0  ;;  %v2880_v9 = vld [vmem:[%s4079_s7 + $0x68] sm:$0xff] }
0x193d   : > { %2001 = vadd.xlane.f32.xlu2 %v2000_v10  ;;  %v2879_v10 = vld [vmem:[%s4079_s7 + $0x60] sm:$0xff] }
0x19b0   : > { %v2002_v18 = vpop.xlane.xlu2 %2001 }
0x19b1   : > { %v2003_v19 = vmul.f32 %v2002_v18, %v3300_v24 }
0x19b3   : > { %v2004_v21 = vadd.f32 1e-06, %v2003_v19 }
0x19b5   : > { %3073 = vrsqrt.f32 %v2004_v21  ;;  %vm2011_vm7 = vweird.f32 %v2004_v21 }
0x19bb   : > { %v3074_v22 = vpop.eup %3073 }
0x19bc   : > { %v2006_v23 = vmul.f32 %v3074_v22, %v2004_v21  ;;  %vm2012_vm6 = vweird.f32 %v3074_v22 }
0x19bd   : > { %vm2013_vm15 = vmor %vm2011_vm7, %vm2012_vm6 }
0x19be   : > { %v2007_v25 = vmul.f32 %v3074_v22, %v2006_v23  ;;  %v3002_v23 = vld [vmem:[%s4078_s6 + $0x3] ss:$0 sm:$0xff] }
0x19c0   : > { %v2008_v26 = vmul.f32 0.5, %v2007_v25 }
0x19c2   : > { %v2009_v27 = vsub.f32 1.5, %v2008_v26 }
0x19c4   : > { %v2010_v29 = vmul.f32 %v3074_v22, %v2009_v27  ;;  %v3003_v27 = vld [vmem:[%s4080_s8 + $0x3] ss:$0 sm:$0xff] }
0x19c6   : > { %v2014_v31 = vsel %vm2013_vm15, %v3074_v22, %v2010_v29 }
0x19c7   : > { %v2015_v32 = vmul.f32 %v2014_v31, %v1998_v8  ;;  %v2881_v8 = vld [vmem:[%s4079_s7 + $0x70] sm:$0xff] }
0x19c8   : > { %2174 = vmatpush.msrb.mxu3 %v2881_v8 }
0x19c9   : > { %v2019_v35 = vmul.f32 %v2997_v30, %v2015_v32 }
0x19ca   : > { %2175 = vmatpush.msrb.mxu3 %v2880_v9 }
0x19cb   : > { %v2023_v36 = vadd.f32 %v2998_v33, %v2019_v35 }
0x19cc   : > { %2176 = vmatpush.msrb.mxu3 %v2879_v10 }
0x19cd   : > { %2858 = vmatmul.msk.f32.vlgmr.msra.gmra.mxu2 %vm635_vm8, %v2023_v36 }
0x1a50   : > { %v2054_v48 = vpop.f32.mrf.mxu2 }
0x1a51   : > { %v2055_v49 = vadd.f32 %v2999_v47, %v2054_v48 }
0x1a53   : > { %v2058_v50 = vmul.f32 0.044715, %v2055_v49  ;;  %v2057_v57 = vmul.f32 0.5, %v2055_v49 }
0x1a55   : > { %v2059_v51 = vmul.f32 %v2058_v50, %v2055_v49 }
0x1a57   : > { %v2060_v52 = vmul.f32 %v2059_v51, %v2055_v49 }
0x1a59   : > { %v2061_v53 = vadd.f32 %v2060_v52, %v2055_v49 }
0x1a5b   : > { %v2062_v54 = vmul.f32 0.7978846, %v2061_v53 }
0x1a5d   : > { %3075 = vtanh.f32 %v2062_v54 }
0x1a63   : > { %v3076_v55 = vpop.eup %3075 }
0x1a64   : > { %v2064_v58 = vadd.f32 1.0, %v3076_v55 }
0x1a66   : > { %v2065_v59 = vmul.f32 %v2064_v58, %v2057_v57 }
0x1a68   : > { %2099 = vmatmul.f32.vlgmr.msrb.gmra.mxu1 %v2065_v59 }
0x1ae5   : > { %v2100_v61 = vpop.f32.mrf.mxu1 }
0x1ae6   : > { %v2103_v63 = vadd.f32 %v2100_v61, %v3779_v5 }
0x1ae8   : > { %v3861_v0 = vadd.f32 %v3000_v60, %v2103_v63 }
0x1aea   : > { %v2110_v62 = vperm.slane %v3861_v0, 0  ;;  %v2118_v1 = vsel %vm589_vm2, %v3861_v0, 0.0 }
0x1aeb   : > { %2119 = vadd.xlane.f32.xlu1 %v2118_v1 }
0x1aec   : > { %v2111_v2 = vadd.f32 %v2110_v62, %v3861_v0 }
0x1aee   : > { %2876 = vst.msk [vmem:[%s3296_s24 + $0xb] sm:$0x1e] %vm585_vm3, %v2111_v2 }
0x1b5e   : > { %v2120_v3 = vpop.xlane.xlu1 %2119 }
0x1b5f   : > { %v2121_v4 = vmul.f32 %v2120_v3, %v3300_v24 }
0x1b61   : > { %v2122_v14 = vsub.f32 %v3861_v0, %v2121_v4 }
0x1b63   : > { %v2123_v6 = vmul.f32 %v2122_v14, %v2122_v14 }
0x1b65   : > { %v2124_v5 = vsel %vm589_vm2, %v2123_v6, 0.0 }
0x1b66   : > { %2125 = vadd.xlane.f32.xlu0 %v2124_v5 }
0x1bd9   : > { %v2126_v11 = vpop.xlane.xlu0 %2125 }
0x1bda   : > { %v2127_v28 = vmul.f32 %v2126_v11, %v3300_v24 }
0x1bdc   : > { %v2128_v12 = vadd.f32 1e-06, %v2127_v28 }
0x1bde   : > { %3077 = vrsqrt.f32 %v2128_v12  ;;  %vm2135_vm1 = vweird.f32 %v2128_v12 }
0x1be4   : > { %v3078_v13 = vpop.eup %3077 }
0x1be5   : > { %v2130_v15 = vmul.f32 %v3078_v13, %v2128_v12  ;;  %vm2136_vm0 = vweird.f32 %v3078_v13 }
0x1be6   : > { %vm2137_vm4 = vmor %vm2135_vm1, %vm2136_vm0 }
0x1be7   : > { %v2131_v16 = vmul.f32 %v3078_v13, %v2130_v15 }
0x1be9   : > { %v2132_v17 = vmul.f32 0.5, %v2131_v16 }
0x1beb   : > { %v2133_v18 = vsub.f32 1.5, %v2132_v17 }
0x1bed   : > { %v2134_v19 = vmul.f32 %v3078_v13, %v2133_v18 }
0x1bef   : > { %v2138_v21 = vsel %vm2137_vm4, %v3078_v13, %v2134_v19 }
0x1bf0   : > { %v2139_v22 = vmul.f32 %v2138_v21, %v2122_v14 }
0x1bf2   : > { %v2143_v25 = vmul.f32 %v3001_v20, %v2139_v22 }
0x1bf4   : > { %v2147_v26 = vadd.f32 %v3002_v23, %v2143_v25 }
0x1bf6   : > { %2884 = vmatmul.msk.f32.vlgmr.msrb.gmra.mxu3 %vm635_vm8, %v2147_v26 }
0x1c79   : > { %v2178_v29 = vpop.f32.mrf.mxu3 }
0x1c7a   : > { %v3895_v30 = vadd.f32 %v3003_v27, %v2178_v29 }
0x1c7c   : > { %2247 = vrot.lane.b32.xlu0 %v3895_v30, %s4163_s29  ;;  %2249 = vrot.lane.b32.xlu1 %v3895_v30, %s4164_s30 }
0x1c7d   : > { %2182 = vrot.lane.b32.xlu2 %v3895_v30, %s4165_s10  ;;  %s4172_s10 = smov 16  }
0x1cd7   : > { %v2183_v31 = vpop.permute.xlu2 %2182 }
0x1cd8   : > { %2885 = vmatpush.xpose.msk.msrb.mxu0 %vm662_vm10, %v2183_v31 }
0x1cdb   : > { %2886 = vmatmul.msk.f32.vlgmr.msrb.gmra.mxu0 %vm662_vm10, %v3895_v30 }
0x1cee   : > { %v2250_v32 = vpop.permute.xlu1 %2249  ;;  %v2248_v33 = vpop.permute.xlu0 %2247 }
0x1cef   : > { %2889 = vmatpush.xpose.msk.msra.mxu3 %vm662_vm10, %v2250_v32 }
0x1cf2   : > { %2890 = vmatmul.msk.f32.vlgmr.msra.gmra.mxu3 %vm662_vm10, %v2248_v33 }
0x1d58   : > { %v2205_v35 = vpop.f32.mrf.mxu0 }
0x1d59   : > { %v2208_v36 = vmul.f32 0.35355338, %v2205_v35 }
0x1d5b   : > { %v2209_v34 = vsel %vm688_vm11, %v2208_v36, -inf }
0x1d5c   : > { %2210 = vmax.xlane.f32.xlu2 %v2209_v34 }
0x1d74   : > { %2316 = vrot.lane.b32.xlu2 %v3895_v30, %s4153_s25  ;;  %s4170_s25 = smov 8  }
0x1d75   : > { %v2272_v37 = vpop.f32.mrf.mxu3 }
0x1d76   : > { %v2275_v38 = vmul.f32 0.35355338, %v2272_v37 }
0x1d78   : > { %v2276_v39 = vsel %vm688_vm11, %v2275_v38, -inf }
0x1d79   : > { %2277 = vmax.xlane.f32.xlu0 %v2276_v39 }
0x1d8d   : > { %2220 = vrot.lane.b32.xlu0 %v3895_v30, %s4154_s17 }
0x1d95   : > { %2314 = vrot.lane.b32.xlu0 %v3895_v30, %s4157_s18  ;;  %s4176_s18 = sld [smem:[#allocation4_spill]] (%p3253_p4) }
0x1d9d   : > { %2381 = vrot.lane.b32.xlu0 %v3895_v30, %s4156_s28  ;;  %s4171_s28 = sld [smem:[#allocation13_spill]] }
0x1da3   : > { %v2904_v25 = vld [vmem:[%s4171_s28 + $0x78] sm:$0xff]  ;;  %v2903_v26 = vld [vmem:[%s4171_s28 + $0x70] sm:$0xff]  ;;  %v2902_v27 = vld [vmem:[%s4171_s28 + $0x68] sm:$0xff] }
0x1da4   : > { %v2901_v31 = vld [vmem:[%s4171_s28 + $0x60] sm:$0xff] }
0x1dcf   : > { %v2211_v40 = vpop.xlane.xlu2 %2210 }
0x1dd0   : > { %v2212_v41 = vsub.f32 %v2208_v36, %v2211_v40 }
0x1dd2   : > { %v2213_v56 = vmul.f32 1.442695, %v2212_v41 }
0x1dd4   : > { %3079 = vpow2.f32 %v2213_v56 }
0x1dd7   : > { %v2317_v50 = vpop.permute.xlu2 %2316 }
0x1dda   : > { %v3080_v42 = vpop.eup %3079 }
0x1ddb   : > { %v2215_v43 = vsel %vm688_vm11, %v3080_v42, 0.0 }
0x1ddc   : > { %2216 = vadd.xlane.f32.xlu1 %v2215_v43 }
0x1dec   : > { %v2278_v44 = vpop.xlane.xlu0 %2277 }
0x1ded   : > { %v2279_v45 = vsub.f32 %v2275_v38, %v2278_v44  ;;  %v3004_v38 = vld [vmem:[%s4174_s2 + $0x3] ss:$0 sm:$0xff] }
0x1def   : > { %v2280_v46 = vmul.f32 1.442695, %v2279_v45 }
0x1df1   : > { %3081 = vpow2.f32 %v2280_v46 }
0x1df5   : > { %2287 = vrot.lane.b32.xlu1 %v3895_v30, %s4152_s26  ;;  %s4169_s26 = smov 40  }
0x1df7   : > { %v3082_v47 = vpop.eup %3081 }
0x1df8   : > { %v2282_v48 = vsel %vm688_vm11, %v3082_v47, 0.0 }
0x1df9   : > { %2283 = vadd.xlane.f32.xlu2 %v2282_v48  ;;  %v2910_v48 = vld [vmem:[%s4085_s13 + $0x68] sm:$0xff] }
0x1dff   : > { %v2221_v49 = vpop.permute.xlu0 %2220 }
0x1e00   : > { %2887 = vmatpush.msk.msrb.mxu2 %vm706_vm9, %v2221_v49  ;;  %v2909_v49 = vld [vmem:[%s4085_s13 + $0x60] sm:$0xff] }
0x1e02   : > { %2893 = vmatpush.xpose.msk.msra.mxu2 %vm662_vm10, %v2317_v50  ;;  %v2930_v50 = vld [vmem:[%s4087_s15 + $0x1f8] sm:$0xff] }
0x1e07   : > { %v2315_v54 = vpop.permute.xlu0 %2314 }
0x1e0f   : > { %v2382_v61 = vpop.permute.xlu0 %2381 }
0x1e11   : > { %2383 = vrot.lane.b32.xlu2 %v3895_v30, %s4155_s19 }
0x1e4f   : > { %v2217_v51 = vpop.xlane.xlu1 %2216 }
0x1e50   : > { %3083 = vrcp.f32 %v2217_v51  ;;  %v2929_v51 = vld [vmem:[%s4087_s15 + $0x1f0] sm:$0xff] }
0x1e56   : > { %v3084_v52 = vpop.eup %3083 }
0x1e57   : > { %v2219_v53 = vmul.f32 %v3084_v52, %v3080_v42  ;;  %v2928_v52 = vld [vmem:[%s4087_s15 + $0x1e8] sm:$0xff] }
0x1e59   : > { %2888 = vmatmul.msk.f32.vlgmr.msrb.gmra.mxu2 %vm702_vm12, %v2219_v53 }
0x1e61   : > { %2894 = vmatmul.msk.f32.vlgmr.msra.gmra.mxu2 %vm662_vm10, %v2315_v54 }
0x1e67   : > { %v2288_v55 = vpop.permute.xlu1 %2287 }
0x1e68   : > { %2891 = vmatpush.msk.msra.mxu0 %vm706_vm9, %v2288_v55  ;;  %v2927_v55 = vld [vmem:[%s4087_s15 + $0x1e0] sm:$0xff] }
0x1e6c   : > { %v2284_v57 = vpop.xlane.xlu2 %2283 }
0x1e6d   : > { %3085 = vrcp.f32 %v2284_v57 }
0x1e73   : > { %v3086_v58 = vpop.eup %3085 }
0x1e74   : > { %v2286_v59 = vmul.f32 %v3086_v58, %v3082_v47  ;;  %v2384_v60 = vpop.permute.xlu2 %2383  ;;  %v2912_v47 = vld [vmem:[%s4085_s13 + $0x78] sm:$0xff] }
0x1e75   : > { %2897 = vmatpush.xpose.msk.msrb.mxu0 %vm662_vm10, %v2384_v60 }
0x1e76   : > { %2892 = vmatmul.msk.f32.vlgmr.msra.gmra.mxu0 %vm702_vm12, %v2286_v59 }
0x1e79   : > { %2557 = vmatpush.msra.mxu0 %v2912_v47 }
0x1e7e   : > { %2898 = vmatmul.msk.f32.vlgmr.msrb.gmra.mxu0 %vm662_vm10, %v2382_v61 }
0x1edc   : > { %v2244_v63 = vpop.f32.mrf.mxu2 }
0x1ee4   : > { %v2339_v62 = vpop.f32.mrf.mxu2 }
0x1ee5   : > { %v2342_v1 = vmul.f32 0.35355338, %v2339_v62 }
0x1ee7   : > { %v2343_v2 = vsel %vm688_vm11, %v2342_v1, -inf }
0x1ee8   : > { %2344 = vmax.xlane.f32.xlu1 %v2343_v2 }
0x1ef3   : > { %v2311_v3 = vpop.f32.mrf.mxu0 }
0x1efb   : > { %v2406_v4 = vpop.f32.mrf.mxu0 }
0x1efc   : > { %v2409_v14 = vmul.f32 0.35355338, %v2406_v4 }
0x1efe   : > { %v2410_v6 = vsel %vm688_vm11, %v2409_v14, -inf }
0x1eff   : > { %2411 = vmax.xlane.f32.xlu2 %v2410_v6  ;;  %v2926_v6 = vld [vmem:[%s4087_s15 + $0x1d8] sm:$0xff] }
0x1f17   : > { %2354 = vrot.lane.b32.xlu2 %v3895_v30, %s4158_s21  ;;  %s2933_s21 = sshll.u32 (%p3253_p4), %s4176_s18, 2 }
0x1f5b   : > { %v2345_v5 = vpop.xlane.xlu1 %2344 }
0x1f5c   : > { %v2346_v7 = vsub.f32 %v2342_v1, %v2345_v5  ;;  %v2925_v5 = vld [vmem:[%s4087_s15 + $0x1d0] sm:$0xff] }
0x1f5e   : > { %v2347_v8 = vmul.f32 1.442695, %v2346_v7  ;;  %v2924_v7 = vld [vmem:[%s4087_s15 + $0x1c8] sm:$0xff] }
0x1f60   : > { %3087 = vpow2.f32 %v2347_v8  ;;  %v2923_v8 = vld [vmem:[%s4087_s15 + $0x1c0] sm:$0xff] }
0x1f66   : > { %v3088_v9 = vpop.eup %3087 }
0x1f67   : > { %v2349_v10 = vsel %vm688_vm11, %v3088_v9, 0.0 }
0x1f68   : > { %2350 = vadd.xlane.f32.xlu0 %v2349_v10  ;;  %v2921_v10 = vld [vmem:[%s4087_s15 + $0x1b0] sm:$0xff] }
0x1f72   : > { %v2412_v11 = vpop.xlane.xlu2 %2411 }
0x1f73   : > { %v2413_v28 = vsub.f32 %v2409_v14, %v2412_v11  ;;  %v2920_v11 = vld [vmem:[%s4087_s15 + $0x1a8] sm:$0xff] }
0x1f75   : > { %v2414_v12 = vmul.f32 1.442695, %v2413_v28  ;;  %v2919_v28 = vld [vmem:[%s4087_s15 + $0x1a0] sm:$0xff] }
0x1f77   : > { %3089 = vpow2.f32 %v2414_v12  ;;  %v2918_v12 = vld [vmem:[%s4087_s15 + $0x198] sm:$0xff] }
0x1f7a   : > { %v2355_v13 = vpop.permute.xlu2 %2354 }
0x1f7b   : > { %2895 = vmatpush.msk.msrb.mxu3 %vm706_vm9, %v2355_v13  ;;  %v2917_v13 = vld [vmem:[%s4087_s15 + $0x190] sm:$0xff] }
0x1f7c   : > { %2421 = vrot.lane.b32.xlu0 %v3895_v30, %s4169_s26 }
0x1f7d   : > { %v3090_v15 = vpop.eup %3089  ;;  %2483 = vmatpush.msra.mxu3 %v2904_v25 }
0x1f7e   : > { %v2416_v16 = vsel %vm688_vm11, %v3090_v15, 0.0 }
0x1f7f   : > { %2417 = vadd.xlane.f32.xlu1 %v2416_v16  ;;  %2484 = vmatpush.msra.mxu3 %v2903_v26  ;;  %v2915_v16 = vld [vmem:[%s4087_s15 + $0x180] sm:$0xff] }
0x1f81   : > { %2485 = vmatpush.msra.mxu3 %v2902_v27 }
0x1f83   : > { %2486 = vmatpush.msra.mxu3 %v2901_v31  ;;  %v3008_v31 = vld [vmem:[%s4088_s16 + $0x3] ss:$0 sm:$0xff] }
0x1f98   : > { %2449 = vrot.lane.b32.xlu1 %v2311_v3, %s4170_s25  ;;  %v3006_v3 = vld [vmem:[%s4084_s12 + $0x3] ss:$0 sm:$0xff] }
0x1fdb   : > { %v2351_v17 = vpop.xlane.xlu0 %2350 }
0x1fdc   : > { %3091 = vrcp.f32 %v2351_v17  ;;  %v3007_v17 = vld [vmem:[%s4086_s14 + $0x3] ss:$0 sm:$0xff] }
0x1fe2   : > { %v3092_v18 = vpop.eup %3091 }
0x1fe3   : > { %v2353_v19 = vmul.f32 %v3092_v18, %v3088_v9  ;;  %v2922_v9 = vld [vmem:[%s4087_s15 + $0x1b8] sm:$0xff] }
0x1fe5   : > { %2896 = vmatmul.msk.f32.vlgmr.msrb.gmra.mxu3 %vm702_vm12, %v2353_v19 }
0x1fee   : > { %v2422_v20 = vpop.permute.xlu0 %2421 }
0x1fef   : > { %2899 = vmatpush.msk.msrb.mxu2 %vm706_vm9, %v2422_v20 }
0x1ff1   : > { %2591 = vmatpush.msra.mxu2 %v2930_v50 }
0x1ff2   : > { %v2418_v21 = vpop.xlane.xlu1 %2417 }
0x1ff3   : > { %3093 = vrcp.f32 %v2418_v21  ;;  %2592 = vmatpush.msra.mxu2 %v2929_v51 }
0x1ff5   : > { %2593 = vmatpush.msra.mxu2 %v2928_v52 }
0x1ff7   : > { %2594 = vmatpush.msra.mxu2 %v2927_v55 }
0x1ff9   : > { %v3094_v22 = vpop.eup %3093  ;;  %2595 = vmatpush.msra.mxu2 %v2926_v6 }
0x1ffa   : > { %v2420_v23 = vmul.f32 %v3094_v22, %v3090_v15  ;;  %v2916_v15 = vld [vmem:[%s4087_s15 + $0x188] sm:$0xff] }
0x1ffb   : > { %2596 = vmatpush.msra.mxu2 %v2925_v5 }
0x1ffc   : > { %2900 = vmatmul.msk.f32.vlgmr.msrb.gmra.mxu2 %vm702_vm12, %v2420_v23 }
0x1ffd   : > { %2597 = vmatpush.msra.mxu2 %v2924_v7 }
0x1fff   : > { %2598 = vmatpush.msra.mxu2 %v2923_v8 }
0x2001   : > { %2599 = vmatpush.msra.mxu2 %v2922_v9 }
0x2003   : > { %2600 = vmatpush.msra.mxu2 %v2921_v10 }
0x2005   : > { %2601 = vmatpush.msra.mxu2 %v2920_v11 }
0x2007   : > { %2602 = vmatpush.msra.mxu2 %v2919_v28 }
0x2009   : > { %2603 = vmatpush.msra.mxu2 %v2918_v12 }
0x200a   : > { %v2450_v32 = vpop.permute.xlu1 %2449 }
0x200b   : > { %v2460_v35 = vsel %vm662_vm10, %v2244_v63, %v2450_v32  ;;  %2604 = vmatpush.msra.mxu2 %v2917_v13 }
0x200d   : > { %2605 = vmatpush.msra.mxu2 %v2916_v15 }
0x200f   : > { %2606 = vmatpush.msra.mxu2 %v2915_v16 }
0x2068   : > { %v2378_v29 = vpop.f32.mrf.mxu3 }
0x2069   : > { %2453 = vrot.lane.b32.xlu0 %v2378_v29, %s4172_s10  ;;  %s4177_s10 = sld [smem:[#allocation15_spill]] (%p3253_p4) }
0x207f   : > { %v2445_v30 = vpop.f32.mrf.mxu2 }
0x2080   : > { %2457 = vrot.lane.b32.xlu2 %v2445_v30, %s4173_s3  ;;  %s2630_s3 = scalar_lea.vmem (%p3253_p4), %s4177_s10, %s2933_s21 }
0x20da   : > { %v2458_v33 = vpop.permute.xlu2 %2457 }
0x20db   : > { %v2454_v36 = vpop.permute.xlu0 %2453 }
0x20dc   : > { %v2461_v34 = vsel %vm943_vm13, %v2460_v35, %v2454_v36 }
0x20dd   : > { %v2462_v37 = vsel %vm945_vm14, %v2461_v34, %v2458_v33 }
0x20de   : > { %2905 = vmatmul.msk.f32.vlgmr.msra.gmra.mxu3 %vm635_vm8, %v2462_v37  ;;  %v2647_v37 = vld [vmem:[%s3296_s24] sm:$0xf] (%p3253_p4) }
0x20df   : > { %2648 = vst [vmem:[%s2630_s3] sm:$0xf] (%p3253_p4), %v2647_v37 }
0x2161   : > { %v2488_v39 = vpop.f32.mrf.mxu3 }
0x2162   : > { %v2491_v40 = vadd.f32 %v2488_v39, %v3861_v0  ;;  %v2911_v0 = vld [vmem:[%s4085_s13 + $0x70] sm:$0xff]  ;;  %v2651_v39 = vld [vmem:[%s3296_s24 + $0x8] sm:$0xf] (%p3253_p4) }
0x2163   : > { %2558 = vmatpush.msra.mxu0 %v2911_v0  ;;  %2652 = vst [vmem:[%s2630_s3 + $0x10] sm:$0xf] (%p3253_p4), %v2651_v39 }
0x2164   : > { %v3967_v41 = vadd.f32 %v3004_v38, %v2491_v40  ;;  %v2649_v38 = vld [vmem:[%s3296_s24 + $0x4] sm:$0xf] (%p3253_p4)  ;;  %v2653_v40 = vld [vmem:[%s3296_s24 + $0xc] sm:$0xf] (%p3253_p4) }
0x2165   : > { %2559 = vmatpush.msra.mxu0 %v2910_v48  ;;  %2650 = vst [vmem:[%s2630_s3 + $0x8] sm:$0xf] (%p3253_p4), %v2649_v38 }
0x2166   : > { %v2502_v56 = vsel %vm589_vm2, %v3967_v41, 0.0  ;;  %2654 = vst [vmem:[%s2630_s3 + $0x18] sm:$0xf] (%p3253_p4), %v2653_v40 }
0x2167   : > { %2503 = vadd.xlane.f32.xlu1 %v2502_v56  ;;  %2560 = vmatpush.msra.mxu0 %v2909_v49 }
0x21da   : > { %v2504_v42 = vpop.xlane.xlu1 %2503 }
0x21db   : > { %v2505_v43 = vmul.f32 %v2504_v42, %v3300_v24 }
0x21dd   : > { %v2506_v44 = vsub.f32 %v3967_v41, %v2505_v43 }
0x21df   : > { %v2507_v45 = vmul.f32 %v2506_v44, %v2506_v44 }
0x21e1   : > { %v2508_v46 = vsel %vm589_vm2, %v2507_v45, 0.0 }
0x21e2   : > { %2509 = vadd.xlane.f32.xlu0 %v2508_v46 }
0x2255   : > { %v2510_v53 = vpop.xlane.xlu0 %2509 }
0x2256   : > { %v2511_v54 = vmul.f32 %v2510_v53, %v3300_v24  ;;  %v3005_v24 = vld [vmem:[%s4083_s11 + $0x3] ss:$0 sm:$0xff] }
0x2258   : > { %v2512_v57 = vadd.f32 1e-06, %v2511_v54 }
0x225a   : > { %3095 = vrsqrt.f32 %v2512_v57  ;;  %vm2519_vm9 = vweird.f32 %v2512_v57 }
0x2260   : > { %v3096_v58 = vpop.eup %3095 }
0x2261   : > { %v2514_v59 = vmul.f32 %v3096_v58, %v2512_v57  ;;  %vm2520_vm2 = vweird.f32 %v3096_v58 }
0x2262   : > { %vm2521_vm10 = vmor %vm2519_vm9, %vm2520_vm2 }
0x2263   : > { %v2515_v60 = vmul.f32 %v3096_v58, %v2514_v59 }
0x2265   : > { %v2516_v61 = vmul.f32 0.5, %v2515_v60 }
0x2267   : > { %v2517_v63 = vsub.f32 1.5, %v2516_v61 }
0x2269   : > { %v2518_v62 = vmul.f32 %v3096_v58, %v2517_v63 }
0x226b   : > { %v2522_v1 = vsel %vm2521_vm10, %v3096_v58, %v2518_v62 }
0x226c   : > { %v2523_v2 = vmul.f32 %v2522_v1, %v2506_v44 }
0x226e   : > { %v2527_v4 = vmul.f32 %v3005_v24, %v2523_v2 }
0x2270   : > { %v2531_v14 = vadd.f32 %v3006_v3, %v2527_v4 }
0x2272   : > { %2914 = vmatmul.msk.f32.vlgmr.msra.gmra.mxu0 %vm635_vm8, %v2531_v14 }
0x22ef   : > { %v2562_v18 = vpop.f32.mrf.mxu0 }
0x22f0   : > { %v2563_v19 = vadd.f32 %v3007_v17, %v2562_v18 }
0x22f2   : > { %v2566_v20 = vmul.f32 0.044715, %v2563_v19  ;;  %v2565_v27 = vmul.f32 0.5, %v2563_v19 }
0x22f4   : > { %v2567_v21 = vmul.f32 %v2566_v20, %v2563_v19 }
0x22f6   : > { %v2568_v22 = vmul.f32 %v2567_v21, %v2563_v19 }
0x22f8   : > { %v2569_v23 = vadd.f32 %v2568_v22, %v2563_v19 }
0x22fa   : > { %v2570_v25 = vmul.f32 0.7978846, %v2569_v23 }
0x22fc   : > { %3097 = vtanh.f32 %v2570_v25 }
0x2302   : > { %v3098_v26 = vpop.eup %3097 }
0x2303   : > { %v2572_v29 = vadd.f32 1.0, %v3098_v26 }
0x2305   : > { %v2573_v30 = vmul.f32 %v2572_v29, %v2565_v27 }
0x2307   : > { %2607 = vmatmul.f32.vlgmr.msra.gmra.mxu2 %v2573_v30 }
0x238a   : > { %v2608_v32 = vpop.f32.mrf.mxu2 }
0x238b   : > { %v2611_v33 = vadd.f32 %v2608_v32, %v3967_v41 }
0x238d   : > { %v2617_v35 = vadd.f32 %v3008_v31, %v2611_v33 }
0x238f   : > { %v2618_v36 = vperm.slane %v2617_v35, 0  ;;  %2628 = sbr.rel (!%p3253_p4) target bundleno = 9116 (0x239c), region = 92 }
0x2391   : > { %v2619_v34 = vadd.f32 %v2618_v36, %v2617_v35 }
0x2393   : > { %2932 = vst.msk [vmem:[%s3296_s24 + $0xf] sm:$0x1e] %vm585_vm3, %v2619_v34 }
0x239a   : > { %v2655_v41 = vld [vmem:[%s3296_s24 + $0x10] sm:$0xf] }
0x239b   : > { %2656 = vst [vmem:[%s2630_s3 + $0x20] sm:$0xf] %v2655_v41 }
0x239c PF: > { %s4178_s26 = sld [smem:[#allocation5_spill]] }
0x239d   : > { %s4179_s24 = sld [smem:[#allocation3_spill]] }
0x239e   : > { %s4180_s25 = sld [smem:[#allocation6_spill]] }
0x23a2   : > { %p24_p8 = scmp.ge.s32.totalorder %s4178_s26, 4  }
0x23a4   :  { %26 = sbr.rel (!%p24_p8) target bundleno = 11 (0xb), region = 199 }

</bundles_post_ra>
